<compile_context>
chip_gen: v7x
topology: tpu7x:2x2x1
jax: 0.10.0
libtpu: 0.0.40
codegen_flags: <defaults>
</compile_context>

<pallas_src>
import math

import jax
import jax.numpy as jnp
from jax.experimental import pallas as pl
from jax.experimental.pallas import tpu as pltpu

# ---------------- scaled-down ViT config ----------------
BATCH = 2
IN_CH = 3
IMG = 32
PATCH = 16
NUM_PATCHES = (IMG // PATCH) ** 2          # 4
SEQ = NUM_PATCHES + 1                      # 5 (CLS + patches)
HIDDEN = 64
NUM_HEADS = 4
HEAD_DIM = HIDDEN // NUM_HEADS             # 16
INTERMEDIATE = 128
NUM_LAYERS = 2
FC_OUT = 128
PATCH_DIM = IN_CH * PATCH * PATCH          # 768
LN_EPS = 1e-12                             # HF ViT layer_norm_eps

VMEM = pltpu.MemorySpace.VMEM


# ---------------- in-kernel helpers (pure functions on values) ----------------
def _layer_norm(x, g, b):
    mu = jnp.mean(x, axis=-1, keepdims=True)
    var = jnp.mean(jnp.square(x - mu), axis=-1, keepdims=True)
    return (x - mu) * jax.lax.rsqrt(var + LN_EPS) * g + b


def _gelu_tanh(x):
    # TODO(synk): HF ViT uses exact (erf) GELU; tanh approximation used since erf
    # lowering inside Mosaic is not guaranteed (deviation ~1e-3).
    c = math.sqrt(2.0 / math.pi)
    return 0.5 * x * (1.0 + jnp.tanh(c * (x + 0.044715 * x * x * x)))


# ---------------- single fused kernel: whole ViT forward for one batch element ----------------
def _vit_fused_kernel(patches_ref, patch_w_ref, pos_ref,
                      ln1_g_ref, ln1_b_ref,
                      wq_ref, bq_ref, wk_ref, bk_ref, wv_ref, bv_ref,
                      wo_ref, bo_ref,
                      ln2_g_ref, ln2_b_ref,
                      w1_ref, b1_ref, w2_ref, b2_ref,
                      lnf_g_ref, lnf_b_ref, fc_w_ref, fc_b_ref,
                      out_ref):
    # Patch-embed as one matmul: CLS token + Conv2d bias are pre-folded into pos_ref,
    # and the patch matrix has a zero row at the CLS position.
    h = jnp.dot(patches_ref[...], patch_w_ref[...],
                preferred_element_type=jnp.float32) + pos_ref[...]            # (SEQ, HIDDEN)

    for l in range(NUM_LAYERS):                                               # unrolled (L=2)
        # --- self-attention block (pre-LN) ---
        hn = _layer_norm(h, ln1_g_ref[l], ln1_b_ref[l])
        attn = None
        for hd in range(NUM_HEADS):                                           # unrolled (NH=4)
            # 1/sqrt(head_dim) already folded into wq/bq at pack time.
            q = jnp.dot(hn, wq_ref[l, hd], preferred_element_type=jnp.float32) + bq_ref[l, hd]
            k = jnp.dot(hn, wk_ref[l, hd], preferred_element_type=jnp.float32) + bk_ref[l, hd]
            v = jnp.dot(hn, wv_ref[l, hd], preferred_element_type=jnp.float32) + bv_ref[l, hd]
            # q @ k^T without materializing a transpose: MXU consumes K directly.
            s = jax.lax.dot_general(q, k, (((1,), (1,)), ((), ())),
                                    preferred_element_type=jnp.float32)       # (SEQ, SEQ)
            s = s - jnp.max(s, axis=-1, keepdims=True)
            p = jnp.exp(s)
            p = p * pl.reciprocal(jnp.sum(p, axis=-1, keepdims=True), approx=True)
            ctx = jnp.dot(p, v, preferred_element_type=jnp.float32)           # (SEQ, HEAD_DIM)
            # per-head slab of the output projection, accumulated (no head concat)
            part = jnp.dot(ctx, wo_ref[l, hd], preferred_element_type=jnp.float32)
            attn = part if attn is None else attn + part
        h = h + attn + bo_ref[l]

        # --- MLP block (pre-LN) ---
        hn2 = _layer_norm(h, ln2_g_ref[l], ln2_b_ref[l])
        m = jnp.dot(hn2, w1_ref[l], preferred_element_type=jnp.float32) + b1_ref[l]
        m = _gelu_tanh(m)
        m = jnp.dot(m, w2_ref[l], preferred_element_type=jnp.float32) + b2_ref[l]
        h = h + m

    # final LayerNorm -> last_hidden_state; mean over sequence (incl. CLS) -> fc head
    hf = _layer_norm(h, lnf_g_ref[...], lnf_b_ref[...])
    pooled = jnp.mean(hf, axis=0, keepdims=True)                              # (1, HIDDEN)
    out = jnp.dot(pooled, fc_w_ref[...], preferred_element_type=jnp.float32) + fc_b_ref[...]
    out_ref[...] = out.astype(out_ref.dtype)                                  # (1, 128) lane-dense


# ---------------- parameter init (deterministic, synthetic; same as reference) ----------------
def init_params(key):
    keys = jax.random.split(key, 4 + NUM_LAYERS)

    def dense(k, shape):
        return jax.random.normal(k, shape, jnp.float32) * 0.02

    params = {
        "patch_w": dense(keys[0], (PATCH_DIM, HIDDEN)),
        "patch_b": jnp.zeros((HIDDEN,), jnp.float32),
        "cls": dense(keys[1], (1, 1, HIDDEN)),
        "pos": dense(keys[2], (1, SEQ, HIDDEN)),
        "ln_f_g": jnp.ones((HIDDEN,), jnp.float32),
        "ln_f_b": jnp.zeros((HIDDEN,), jnp.float32),
        "fc_w": dense(keys[3], (HIDDEN, FC_OUT)),
        "fc_b": jnp.zeros((FC_OUT,), jnp.float32),
    }
    layers = []
    for i in range(NUM_LAYERS):
        lk = jax.random.split(keys[4 + i], 6)
        layers.append(dict(
            ln1_g=jnp.ones((HIDDEN,), jnp.float32), ln1_b=jnp.zeros((HIDDEN,), jnp.float32),
            wq=dense(lk[0], (HIDDEN, HIDDEN)), bq=jnp.zeros((HIDDEN,), jnp.float32),
            wk=dense(lk[1], (HIDDEN, HIDDEN)), bk=jnp.zeros((HIDDEN,), jnp.float32),
            wv=dense(lk[2], (HIDDEN, HIDDEN)), bv=jnp.zeros((HIDDEN,), jnp.float32),
            wo=dense(lk[3], (HIDDEN, HIDDEN)), bo=jnp.zeros((HIDDEN,), jnp.float32),
            ln2_g=jnp.ones((HIDDEN,), jnp.float32), ln2_b=jnp.zeros((HIDDEN,), jnp.float32),
            w1=dense(lk[4], (HIDDEN, INTERMEDIATE)), b1=jnp.zeros((INTERMEDIATE,), jnp.float32),
            w2=dense(lk[5], (INTERMEDIATE, HIDDEN)), b2=jnp.zeros((HIDDEN,), jnp.float32),
        ))
    params["layers"] = layers
    return params


# ---------------- one-time parameter packing for the fused kernel ----------------
def pack_params(params):
    scale = 1.0 / math.sqrt(HEAD_DIM)

    # Effective positional embedding: row 0 = cls + pos[0] (patch row is zeros there);
    # rows 1.. = pos[i] + patch_bias (Conv2d bias folded in).
    pos = params["pos"][0]                       # (SEQ, HIDDEN)
    cls = params["cls"][0]                       # (1, HIDDEN)
    pos_eff = jnp.concatenate(
        [pos[:1] + cls, pos[1:] + params["patch_b"][None, :]], axis=0)

    def per_head_in(w):      # (HIDDEN, HIDDEN) -> (NH, HIDDEN, HEAD_DIM), column-grouped heads
        return w.reshape(HIDDEN, NUM_HEADS, HEAD_DIM).transpose(1, 0, 2)

    def per_head_bias(b):    # (HIDDEN,) -> (NH, 1, HEAD_DIM)
        return b.reshape(NUM_HEADS, 1, HEAD_DIM)

    L = params["layers"]
    stack = lambda f: jnp.stack([f(lp) for lp in L], axis=0)

    flat = (
        params["patch_w"],                                               # (768, 64)
        pos_eff,                                                         # (5, 64)
        stack(lambda lp: lp["ln1_g"][None, :]),                          # (L, 1, 64)
        stack(lambda lp: lp["ln1_b"][None, :]),
        stack(lambda lp: per_head_in(lp["wq"]) * scale),                 # (L, NH, 64, 16) scaled
        stack(lambda lp: per_head_bias(lp["bq"]) * scale),               # (L, NH, 1, 16)  scaled
        stack(lambda lp: per_head_in(lp["wk"])),
        stack(lambda lp: per_head_bias(lp["bk"])),
        stack(lambda lp: per_head_in(lp["wv"])),
        stack(lambda lp: per_head_bias(lp["bv"])),
        stack(lambda lp: lp["wo"].reshape(NUM_HEADS, HEAD_DIM, HIDDEN)),  # (L, NH, 16, 64)
        stack(lambda lp: lp["bo"][None, :]),                             # (L, 1, 64)
        stack(lambda lp: lp["ln2_g"][None, :]),
        stack(lambda lp: lp["ln2_b"][None, :]),
        stack(lambda lp: lp["w1"]),                                      # (L, 64, 128)
        stack(lambda lp: lp["b1"][None, :]),                             # (L, 1, 128)
        stack(lambda lp: lp["w2"]),                                      # (L, 128, 64)
        stack(lambda lp: lp["b2"][None, :]),                             # (L, 1, 64)
        params["ln_f_g"][None, :],                                       # (1, 64)
        params["ln_f_b"][None, :],
        params["fc_w"],                                                  # (64, 128)
        params["fc_b"][None, :],                                         # (1, 128)
    )
    return flat


# ---------------- forward: one fused pallas_call ----------------
def vit_forward(flat_params, x):
    B, C, H, W = x.shape
    nh, nw = H // PATCH, W // PATCH

    # NCHW patch extraction (pure layout glue), flattened in (C, ph, pw) order.
    # TODO(synk): at real ViT scale, store pixel_values pre-patchified to avoid this
    # XLA-side transpose / extra HBM pass.
    patches = x.reshape(B, C, nh, PATCH, nw, PATCH)
    patches = patches.transpose(0, 2, 4, 1, 3, 5).reshape(B, nh * nw, C * PATCH * PATCH)
    # zero row at position 0 stands in for the CLS token (folded into pos_eff)
    patches = jnp.concatenate(
        [jnp.zeros((B, 1, C * PATCH * PATCH), patches.dtype), patches], axis=1)  # (B, SEQ, CPP)

    out = pl.pallas_call(
        _vit_fused_kernel,
        out_shape=jax.ShapeDtypeStruct((B, 1, FC_OUT), jnp.float32),
        grid=(B,),
        in_specs=[pl.BlockSpec((None, SEQ, PATCH_DIM), lambda b: (b, 0, 0))]
                 + [pl.BlockSpec(memory_space=VMEM)] * len(flat_params),
        out_specs=pl.BlockSpec((None, 1, FC_OUT), lambda b: (b, 0, 0)),
        compiler_params=pltpu.CompilerParams(
            dimension_semantics=("parallel",)),   # v7x megacore: one batch per TensorCore
    )(patches, *flat_params)
    return out.reshape(B, FC_OUT)


if __name__ == "__main__":
    key = jax.random.PRNGKey(0)
    pkey, xkey = jax.random.split(key)
    params = init_params(pkey)
    flat_params = pack_params(params)
    x = jax.random.normal(xkey, (BATCH, IN_CH, IMG, IMG), jnp.float32)

    out = jax.jit(vit_forward)(flat_params, x)
    jax.block_until_ready(out)
    assert out.shape == (BATCH, FC_OUT)
    assert bool(jnp.all(jnp.isfinite(out)))
    print("KERNEL_OK")
</pallas_src>

<mosaic_0001>
module attributes {stable_mosaic.version = 11 : i64} {
  func.func @_vit_fused_kernel(%arg0: i32, %arg1: memref<1x5x768xf32, #tpu.memory_space<vmem>>, %arg2: memref<768x64xf32, #tpu.memory_space<vmem>>, %arg3: memref<5x64xf32, #tpu.memory_space<vmem>>, %arg4: memref<2x1x64xf32, #tpu.memory_space<vmem>>, %arg5: memref<2x1x64xf32, #tpu.memory_space<vmem>>, %arg6: memref<2x4x64x16xf32, #tpu.memory_space<vmem>>, %arg7: memref<2x4x1x16xf32, #tpu.memory_space<vmem>>, %arg8: memref<2x4x64x16xf32, #tpu.memory_space<vmem>>, %arg9: memref<2x4x1x16xf32, #tpu.memory_space<vmem>>, %arg10: memref<2x4x64x16xf32, #tpu.memory_space<vmem>>, %arg11: memref<2x4x1x16xf32, #tpu.memory_space<vmem>>, %arg12: memref<2x4x16x64xf32, #tpu.memory_space<vmem>>, %arg13: memref<2x1x64xf32, #tpu.memory_space<vmem>>, %arg14: memref<2x1x64xf32, #tpu.memory_space<vmem>>, %arg15: memref<2x1x64xf32, #tpu.memory_space<vmem>>, %arg16: memref<2x64x128xf32, #tpu.memory_space<vmem>>, %arg17: memref<2x1x128xf32, #tpu.memory_space<vmem>>, %arg18: memref<2x128x64xf32, #tpu.memory_space<vmem>>, %arg19: memref<2x1x64xf32, #tpu.memory_space<vmem>>, %arg20: memref<1x64xf32, #tpu.memory_space<vmem>>, %arg21: memref<1x64xf32, #tpu.memory_space<vmem>>, %arg22: memref<64x128xf32, #tpu.memory_space<vmem>>, %arg23: memref<1x128xf32, #tpu.memory_space<vmem>>, %arg24: memref<1x1x128xf32, #tpu.memory_space<vmem>>) attributes {dimension_semantics = [#tpu.dimension_semantics<parallel>], iteration_bounds = array<i64: 2>, scalar_prefetch = 0 : i64, scratch_operands = 0 : i64, tpu.core_type = #tpu.core_type<tc>, window_params = [{transform_indices = @transform_0, window_bounds = array<i64: 1, 5, 768>}, {pipeline_mode = #tpu.pipeline_mode<synchronous>, transform_indices = @transform_1, window_bounds = array<i64: 768, 64>}, {pipeline_mode = #tpu.pipeline_mode<synchronous>, transform_indices = @transform_2, window_bounds = array<i64: 5, 64>}, {pipeline_mode = #tpu.pipeline_mode<synchronous>, transform_indices = @transform_3, window_bounds = array<i64: 2, 1, 64>}, {pipeline_mode = #tpu.pipeline_mode<synchronous>, transform_indices = @transform_4, window_bounds = array<i64: 2, 1, 64>}, {pipeline_mode = #tpu.pipeline_mode<synchronous>, transform_indices = @transform_5, window_bounds = array<i64: 2, 4, 64, 16>}, {pipeline_mode = #tpu.pipeline_mode<synchronous>, transform_indices = @transform_6, window_bounds = array<i64: 2, 4, 1, 16>}, {pipeline_mode = #tpu.pipeline_mode<synchronous>, transform_indices = @transform_7, window_bounds = array<i64: 2, 4, 64, 16>}, {pipeline_mode = #tpu.pipeline_mode<synchronous>, transform_indices = @transform_8, window_bounds = array<i64: 2, 4, 1, 16>}, {pipeline_mode = #tpu.pipeline_mode<synchronous>, transform_indices = @transform_9, window_bounds = array<i64: 2, 4, 64, 16>}, {pipeline_mode = #tpu.pipeline_mode<synchronous>, transform_indices = @transform_10, window_bounds = array<i64: 2, 4, 1, 16>}, {pipeline_mode = #tpu.pipeline_mode<synchronous>, transform_indices = @transform_11, window_bounds = array<i64: 2, 4, 16, 64>}, {pipeline_mode = #tpu.pipeline_mode<synchronous>, transform_indices = @transform_12, window_bounds = array<i64: 2, 1, 64>}, {pipeline_mode = #tpu.pipeline_mode<synchronous>, transform_indices = @transform_13, window_bounds = array<i64: 2, 1, 64>}, {pipeline_mode = #tpu.pipeline_mode<synchronous>, transform_indices = @transform_14, window_bounds = array<i64: 2, 1, 64>}, {pipeline_mode = #tpu.pipeline_mode<synchronous>, transform_indices = @transform_15, window_bounds = array<i64: 2, 64, 128>}, {pipeline_mode = #tpu.pipeline_mode<synchronous>, transform_indices = @transform_16, window_bounds = array<i64: 2, 1, 128>}, {pipeline_mode = #tpu.pipeline_mode<synchronous>, transform_indices = @transform_17, window_bounds = array<i64: 2, 128, 64>}, {pipeline_mode = #tpu.pipeline_mode<synchronous>, transform_indices = @transform_18, window_bounds = array<i64: 2, 1, 64>}, {pipeline_mode = #tpu.pipeline_mode<synchronous>, transform_indices = @transform_19, window_bounds = array<i64: 1, 64>}, {pipeline_mode = #tpu.pipeline_mode<synchronous>, transform_indices = @transform_20, window_bounds = array<i64: 1, 64>}, {pipeline_mode = #tpu.pipeline_mode<synchronous>, transform_indices = @transform_21, window_bounds = array<i64: 64, 128>}, {pipeline_mode = #tpu.pipeline_mode<synchronous>, transform_indices = @transform_22, window_bounds = array<i64: 1, 128>}, {transform_indices = @transform_23, window_bounds = array<i64: 1, 1, 128>}]} {
    %c0 = arith.constant 0 : index
    %c0_0 = arith.constant 0 : index
    %c0_1 = arith.constant 0 : index
    %0 = vector.load %arg1[%c0, %c0_0, %c0_1] : memref<1x5x768xf32, #tpu.memory_space<vmem>>, vector<1x5x768xf32>
    %1 = vector.shape_cast %0 : vector<1x5x768xf32> to vector<5x768xf32>
    %c0_2 = arith.constant 0 : index
    %c0_3 = arith.constant 0 : index
    %2 = vector.load %arg2[%c0_2, %c0_3] : memref<768x64xf32, #tpu.memory_space<vmem>>, vector<768x64xf32>
    %cst = arith.constant dense<0.000000e+00> : vector<5x64xf32>
    %3 = tpu.matmul %1, %2, %cst {dimension_numbers = #tpu.dot_dimension_numbers<[1], [0], [0], [1], [0, 0, 1, 1], [], []>} : vector<5x768xf32>, vector<768x64xf32>, vector<5x64xf32> -> vector<5x64xf32>
    %c0_4 = arith.constant 0 : index
    %c0_5 = arith.constant 0 : index
    %4 = vector.load %arg3[%c0_4, %c0_5] : memref<5x64xf32, #tpu.memory_space<vmem>>, vector<5x64xf32>
    %5 = arith.addf %3, %4 : vector<5x64xf32>
    %c0_6 = arith.constant 0 : index
    %c0_7 = arith.constant 0 : index
    %c0_8 = arith.constant 0 : index
    %6 = vector.load %arg4[%c0_6, %c0_7, %c0_8] : memref<2x1x64xf32, #tpu.memory_space<vmem>>, vector<1x1x64xf32>
    %7 = vector.shape_cast %6 : vector<1x1x64xf32> to vector<1x64xf32>
    %c0_9 = arith.constant 0 : index
    %c0_10 = arith.constant 0 : index
    %c0_11 = arith.constant 0 : index
    %8 = vector.load %arg5[%c0_9, %c0_10, %c0_11] : memref<2x1x64xf32, #tpu.memory_space<vmem>>, vector<1x1x64xf32>
    %9 = vector.shape_cast %8 : vector<1x1x64xf32> to vector<1x64xf32>
    %cst_12 = arith.constant dense<0.000000e+00> : vector<5xf32>
    %10 = vector.multi_reduction <add>, %5, %cst_12 [1] : vector<5x64xf32> to vector<5xf32>
    %11 = vector.shape_cast %10 : vector<5xf32> to vector<5x1xf32>
    %cst_13 = arith.constant 6.400000e+01 : f32
    %12 = vector.broadcast %cst_13 : f32 to vector<5x1xf32>
    %13 = arith.divf %11, %12 : vector<5x1xf32>
    %14 = vector.broadcast %13 : vector<5x1xf32> to vector<5x64xf32>
    %15 = arith.subf %5, %14 : vector<5x64xf32>
    %16 = arith.mulf %15, %15 : vector<5x64xf32>
    %cst_14 = arith.constant dense<0.000000e+00> : vector<5xf32>
    %17 = vector.multi_reduction <add>, %16, %cst_14 [1] : vector<5x64xf32> to vector<5xf32>
    %18 = vector.shape_cast %17 : vector<5xf32> to vector<5x1xf32>
    %cst_15 = arith.constant 6.400000e+01 : f32
    %19 = vector.broadcast %cst_15 : f32 to vector<5x1xf32>
    %20 = arith.divf %18, %19 : vector<5x1xf32>
    %21 = vector.broadcast %13 : vector<5x1xf32> to vector<5x64xf32>
    %22 = arith.subf %5, %21 : vector<5x64xf32>
    %cst_16 = arith.constant 9.99999996E-13 : f32
    %23 = vector.broadcast %cst_16 : f32 to vector<5x1xf32>
    %24 = arith.addf %20, %23 : vector<5x1xf32>
    %25 = math.rsqrt %24 : vector<5x1xf32>
    %26 = vector.broadcast %25 : vector<5x1xf32> to vector<5x64xf32>
    %27 = arith.mulf %22, %26 : vector<5x64xf32>
    %28 = vector.broadcast %7 : vector<1x64xf32> to vector<5x64xf32>
    %29 = arith.mulf %27, %28 : vector<5x64xf32>
    %30 = vector.broadcast %9 : vector<1x64xf32> to vector<5x64xf32>
    %31 = arith.addf %29, %30 : vector<5x64xf32>
    %c0_17 = arith.constant 0 : index
    %c0_18 = arith.constant 0 : index
    %c0_19 = arith.constant 0 : index
    %c0_20 = arith.constant 0 : index
    %32 = vector.load %arg6[%c0_17, %c0_18, %c0_19, %c0_20] : memref<2x4x64x16xf32, #tpu.memory_space<vmem>>, vector<1x1x64x16xf32>
    %33 = vector.shape_cast %32 : vector<1x1x64x16xf32> to vector<64x16xf32>
    %cst_21 = arith.constant dense<0.000000e+00> : vector<5x16xf32>
    %34 = tpu.matmul %31, %33, %cst_21 {dimension_numbers = #tpu.dot_dimension_numbers<[1], [0], [0], [1], [0, 0, 1, 1], [], []>} : vector<5x64xf32>, vector<64x16xf32>, vector<5x16xf32> -> vector<5x16xf32>
    %c0_22 = arith.constant 0 : index
    %c0_23 = arith.constant 0 : index
    %c0_24 = arith.constant 0 : index
    %c0_25 = arith.constant 0 : index
    %35 = vector.load %arg7[%c0_22, %c0_23, %c0_24, %c0_25] : memref<2x4x1x16xf32, #tpu.memory_space<vmem>>, vector<1x1x1x16xf32>
    %36 = vector.shape_cast %35 : vector<1x1x1x16xf32> to vector<1x16xf32>
    %37 = vector.broadcast %36 : vector<1x16xf32> to vector<5x16xf32>
    %38 = arith.addf %34, %37 : vector<5x16xf32>
    %c0_26 = arith.constant 0 : index
    %c0_27 = arith.constant 0 : index
    %c0_28 = arith.constant 0 : index
    %c0_29 = arith.constant 0 : index
    %39 = vector.load %arg8[%c0_26, %c0_27, %c0_28, %c0_29] : memref<2x4x64x16xf32, #tpu.memory_space<vmem>>, vector<1x1x64x16xf32>
    %40 = vector.shape_cast %39 : vector<1x1x64x16xf32> to vector<64x16xf32>
    %cst_30 = arith.constant dense<0.000000e+00> : vector<5x16xf32>
    %41 = tpu.matmul %31, %40, %cst_30 {dimension_numbers = #tpu.dot_dimension_numbers<[1], [0], [0], [1], [0, 0, 1, 1], [], []>} : vector<5x64xf32>, vector<64x16xf32>, vector<5x16xf32> -> vector<5x16xf32>
    %c0_31 = arith.constant 0 : index
    %c0_32 = arith.constant 0 : index
    %c0_33 = arith.constant 0 : index
    %c0_34 = arith.constant 0 : index
    %42 = vector.load %arg9[%c0_31, %c0_32, %c0_33, %c0_34] : memref<2x4x1x16xf32, #tpu.memory_space<vmem>>, vector<1x1x1x16xf32>
    %43 = vector.shape_cast %42 : vector<1x1x1x16xf32> to vector<1x16xf32>
    %44 = vector.broadcast %43 : vector<1x16xf32> to vector<5x16xf32>
    %45 = arith.addf %41, %44 : vector<5x16xf32>
    %c0_35 = arith.constant 0 : index
    %c0_36 = arith.constant 0 : index
    %c0_37 = arith.constant 0 : index
    %c0_38 = arith.constant 0 : index
    %46 = vector.load %arg10[%c0_35, %c0_36, %c0_37, %c0_38] : memref<2x4x64x16xf32, #tpu.memory_space<vmem>>, vector<1x1x64x16xf32>
    %47 = vector.shape_cast %46 : vector<1x1x64x16xf32> to vector<64x16xf32>
    %cst_39 = arith.constant dense<0.000000e+00> : vector<5x16xf32>
    %48 = tpu.matmul %31, %47, %cst_39 {dimension_numbers = #tpu.dot_dimension_numbers<[1], [0], [0], [1], [0, 0, 1, 1], [], []>} : vector<5x64xf32>, vector<64x16xf32>, vector<5x16xf32> -> vector<5x16xf32>
    %c0_40 = arith.constant 0 : index
    %c0_41 = arith.constant 0 : index
    %c0_42 = arith.constant 0 : index
    %c0_43 = arith.constant 0 : index
    %49 = vector.load %arg11[%c0_40, %c0_41, %c0_42, %c0_43] : memref<2x4x1x16xf32, #tpu.memory_space<vmem>>, vector<1x1x1x16xf32>
    %50 = vector.shape_cast %49 : vector<1x1x1x16xf32> to vector<1x16xf32>
    %51 = vector.broadcast %50 : vector<1x16xf32> to vector<5x16xf32>
    %52 = arith.addf %48, %51 : vector<5x16xf32>
    %cst_44 = arith.constant dense<0.000000e+00> : vector<5x5xf32>
    %53 = tpu.matmul %38, %45, %cst_44 {dimension_numbers = #tpu.dot_dimension_numbers<[1], [1], [0], [0], [0, 0, 1, 0], [], []>} : vector<5x16xf32>, vector<5x16xf32>, vector<5x5xf32> -> vector<5x5xf32>
    %cst_45 = arith.constant dense<0xFF800000> : vector<5xf32>
    %54 = vector.multi_reduction <maximumf>, %53, %cst_45 [1] : vector<5x5xf32> to vector<5xf32>
    %55 = vector.shape_cast %54 : vector<5xf32> to vector<5x1xf32>
    %56 = vector.broadcast %55 : vector<5x1xf32> to vector<5x5xf32>
    %57 = arith.subf %53, %56 : vector<5x5xf32>
    %58 = math.exp %57 : vector<5x5xf32>
    %cst_46 = arith.constant dense<0.000000e+00> : vector<5xf32>
    %59 = vector.multi_reduction <add>, %58, %cst_46 [1] : vector<5x5xf32> to vector<5xf32>
    %60 = vector.shape_cast %59 : vector<5xf32> to vector<5x1xf32>
    %61 = tpu.reciprocal %60 {approx = true} : vector<5x1xf32> -> vector<5x1xf32>
    %62 = vector.broadcast %61 : vector<5x1xf32> to vector<5x5xf32>
    %63 = arith.mulf %58, %62 : vector<5x5xf32>
    %cst_47 = arith.constant dense<0.000000e+00> : vector<5x16xf32>
    %64 = tpu.matmul %63, %52, %cst_47 {dimension_numbers = #tpu.dot_dimension_numbers<[1], [0], [0], [1], [0, 0, 1, 1], [], []>} : vector<5x5xf32>, vector<5x16xf32>, vector<5x16xf32> -> vector<5x16xf32>
    %c0_48 = arith.constant 0 : index
    %c0_49 = arith.constant 0 : index
    %c0_50 = arith.constant 0 : index
    %c0_51 = arith.constant 0 : index
    %65 = vector.load %arg12[%c0_48, %c0_49, %c0_50, %c0_51] : memref<2x4x16x64xf32, #tpu.memory_space<vmem>>, vector<1x1x16x64xf32>
    %66 = vector.shape_cast %65 : vector<1x1x16x64xf32> to vector<16x64xf32>
    %cst_52 = arith.constant dense<0.000000e+00> : vector<5x64xf32>
    %67 = tpu.matmul %64, %66, %cst_52 {dimension_numbers = #tpu.dot_dimension_numbers<[1], [0], [0], [1], [0, 0, 1, 1], [], []>} : vector<5x16xf32>, vector<16x64xf32>, vector<5x64xf32> -> vector<5x64xf32>
    %c0_53 = arith.constant 0 : index
    %c1 = arith.constant 1 : index
    %c0_54 = arith.constant 0 : index
    %c0_55 = arith.constant 0 : index
    %68 = vector.load %arg6[%c0_53, %c1, %c0_54, %c0_55] : memref<2x4x64x16xf32, #tpu.memory_space<vmem>>, vector<1x1x64x16xf32>
    %69 = vector.shape_cast %68 : vector<1x1x64x16xf32> to vector<64x16xf32>
    %cst_56 = arith.constant dense<0.000000e+00> : vector<5x16xf32>
    %70 = tpu.matmul %31, %69, %cst_56 {dimension_numbers = #tpu.dot_dimension_numbers<[1], [0], [0], [1], [0, 0, 1, 1], [], []>} : vector<5x64xf32>, vector<64x16xf32>, vector<5x16xf32> -> vector<5x16xf32>
    %c0_57 = arith.constant 0 : index
    %c1_58 = arith.constant 1 : index
    %c0_59 = arith.constant 0 : index
    %c0_60 = arith.constant 0 : index
    %71 = vector.load %arg7[%c0_57, %c1_58, %c0_59, %c0_60] : memref<2x4x1x16xf32, #tpu.memory_space<vmem>>, vector<1x1x1x16xf32>
    %72 = vector.shape_cast %71 : vector<1x1x1x16xf32> to vector<1x16xf32>
    %73 = vector.broadcast %72 : vector<1x16xf32> to vector<5x16xf32>
    %74 = arith.addf %70, %73 : vector<5x16xf32>
    %c0_61 = arith.constant 0 : index
    %c1_62 = arith.constant 1 : index
    %c0_63 = arith.constant 0 : index
    %c0_64 = arith.constant 0 : index
    %75 = vector.load %arg8[%c0_61, %c1_62, %c0_63, %c0_64] : memref<2x4x64x16xf32, #tpu.memory_space<vmem>>, vector<1x1x64x16xf32>
    %76 = vector.shape_cast %75 : vector<1x1x64x16xf32> to vector<64x16xf32>
    %cst_65 = arith.constant dense<0.000000e+00> : vector<5x16xf32>
    %77 = tpu.matmul %31, %76, %cst_65 {dimension_numbers = #tpu.dot_dimension_numbers<[1], [0], [0], [1], [0, 0, 1, 1], [], []>} : vector<5x64xf32>, vector<64x16xf32>, vector<5x16xf32> -> vector<5x16xf32>
    %c0_66 = arith.constant 0 : index
    %c1_67 = arith.constant 1 : index
    %c0_68 = arith.constant 0 : index
    %c0_69 = arith.constant 0 : index
    %78 = vector.load %arg9[%c0_66, %c1_67, %c0_68, %c0_69] : memref<2x4x1x16xf32, #tpu.memory_space<vmem>>, vector<1x1x1x16xf32>
    %79 = vector.shape_cast %78 : vector<1x1x1x16xf32> to vector<1x16xf32>
    %80 = vector.broadcast %79 : vector<1x16xf32> to vector<5x16xf32>
    %81 = arith.addf %77, %80 : vector<5x16xf32>
    %c0_70 = arith.constant 0 : index
    %c1_71 = arith.constant 1 : index
    %c0_72 = arith.constant 0 : index
    %c0_73 = arith.constant 0 : index
    %82 = vector.load %arg10[%c0_70, %c1_71, %c0_72, %c0_73] : memref<2x4x64x16xf32, #tpu.memory_space<vmem>>, vector<1x1x64x16xf32>
    %83 = vector.shape_cast %82 : vector<1x1x64x16xf32> to vector<64x16xf32>
    %cst_74 = arith.constant dense<0.000000e+00> : vector<5x16xf32>
    %84 = tpu.matmul %31, %83, %cst_74 {dimension_numbers = #tpu.dot_dimension_numbers<[1], [0], [0], [1], [0, 0, 1, 1], [], []>} : vector<5x64xf32>, vector<64x16xf32>, vector<5x16xf32> -> vector<5x16xf32>
    %c0_75 = arith.constant 0 : index
    %c1_76 = arith.constant 1 : index
    %c0_77 = arith.constant 0 : index
    %c0_78 = arith.constant 0 : index
    %85 = vector.load %arg11[%c0_75, %c1_76, %c0_77, %c0_78] : memref<2x4x1x16xf32, #tpu.memory_space<vmem>>, vector<1x1x1x16xf32>
    %86 = vector.shape_cast %85 : vector<1x1x1x16xf32> to vector<1x16xf32>
    %87 = vector.broadcast %86 : vector<1x16xf32> to vector<5x16xf32>
    %88 = arith.addf %84, %87 : vector<5x16xf32>
    %cst_79 = arith.constant dense<0.000000e+00> : vector<5x5xf32>
    %89 = tpu.matmul %74, %81, %cst_79 {dimension_numbers = #tpu.dot_dimension_numbers<[1], [1], [0], [0], [0, 0, 1, 0], [], []>} : vector<5x16xf32>, vector<5x16xf32>, vector<5x5xf32> -> vector<5x5xf32>
    %cst_80 = arith.constant dense<0xFF800000> : vector<5xf32>
    %90 = vector.multi_reduction <maximumf>, %89, %cst_80 [1] : vector<5x5xf32> to vector<5xf32>
    %91 = vector.shape_cast %90 : vector<5xf32> to vector<5x1xf32>
    %92 = vector.broadcast %91 : vector<5x1xf32> to vector<5x5xf32>
    %93 = arith.subf %89, %92 : vector<5x5xf32>
    %94 = math.exp %93 : vector<5x5xf32>
    %cst_81 = arith.constant dense<0.000000e+00> : vector<5xf32>
    %95 = vector.multi_reduction <add>, %94, %cst_81 [1] : vector<5x5xf32> to vector<5xf32>
    %96 = vector.shape_cast %95 : vector<5xf32> to vector<5x1xf32>
    %97 = tpu.reciprocal %96 {approx = true} : vector<5x1xf32> -> vector<5x1xf32>
    %98 = vector.broadcast %97 : vector<5x1xf32> to vector<5x5xf32>
    %99 = arith.mulf %94, %98 : vector<5x5xf32>
    %cst_82 = arith.constant dense<0.000000e+00> : vector<5x16xf32>
    %100 = tpu.matmul %99, %88, %cst_82 {dimension_numbers = #tpu.dot_dimension_numbers<[1], [0], [0], [1], [0, 0, 1, 1], [], []>} : vector<5x5xf32>, vector<5x16xf32>, vector<5x16xf32> -> vector<5x16xf32>
    %c0_83 = arith.constant 0 : index
    %c1_84 = arith.constant 1 : index
    %c0_85 = arith.constant 0 : index
    %c0_86 = arith.constant 0 : index
    %101 = vector.load %arg12[%c0_83, %c1_84, %c0_85, %c0_86] : memref<2x4x16x64xf32, #tpu.memory_space<vmem>>, vector<1x1x16x64xf32>
    %102 = vector.shape_cast %101 : vector<1x1x16x64xf32> to vector<16x64xf32>
    %cst_87 = arith.constant dense<0.000000e+00> : vector<5x64xf32>
    %103 = tpu.matmul %100, %102, %cst_87 {dimension_numbers = #tpu.dot_dimension_numbers<[1], [0], [0], [1], [0, 0, 1, 1], [], []>} : vector<5x16xf32>, vector<16x64xf32>, vector<5x64xf32> -> vector<5x64xf32>
    %104 = arith.addf %67, %103 : vector<5x64xf32>
    %c0_88 = arith.constant 0 : index
    %c2 = arith.constant 2 : index
    %c0_89 = arith.constant 0 : index
    %c0_90 = arith.constant 0 : index
    %105 = vector.load %arg6[%c0_88, %c2, %c0_89, %c0_90] : memref<2x4x64x16xf32, #tpu.memory_space<vmem>>, vector<1x1x64x16xf32>
    %106 = vector.shape_cast %105 : vector<1x1x64x16xf32> to vector<64x16xf32>
    %cst_91 = arith.constant dense<0.000000e+00> : vector<5x16xf32>
    %107 = tpu.matmul %31, %106, %cst_91 {dimension_numbers = #tpu.dot_dimension_numbers<[1], [0], [0], [1], [0, 0, 1, 1], [], []>} : vector<5x64xf32>, vector<64x16xf32>, vector<5x16xf32> -> vector<5x16xf32>
    %c0_92 = arith.constant 0 : index
    %c2_93 = arith.constant 2 : index
    %c0_94 = arith.constant 0 : index
    %c0_95 = arith.constant 0 : index
    %108 = vector.load %arg7[%c0_92, %c2_93, %c0_94, %c0_95] : memref<2x4x1x16xf32, #tpu.memory_space<vmem>>, vector<1x1x1x16xf32>
    %109 = vector.shape_cast %108 : vector<1x1x1x16xf32> to vector<1x16xf32>
    %110 = vector.broadcast %109 : vector<1x16xf32> to vector<5x16xf32>
    %111 = arith.addf %107, %110 : vector<5x16xf32>
    %c0_96 = arith.constant 0 : index
    %c2_97 = arith.constant 2 : index
    %c0_98 = arith.constant 0 : index
    %c0_99 = arith.constant 0 : index
    %112 = vector.load %arg8[%c0_96, %c2_97, %c0_98, %c0_99] : memref<2x4x64x16xf32, #tpu.memory_space<vmem>>, vector<1x1x64x16xf32>
    %113 = vector.shape_cast %112 : vector<1x1x64x16xf32> to vector<64x16xf32>
    %cst_100 = arith.constant dense<0.000000e+00> : vector<5x16xf32>
    %114 = tpu.matmul %31, %113, %cst_100 {dimension_numbers = #tpu.dot_dimension_numbers<[1], [0], [0], [1], [0, 0, 1, 1], [], []>} : vector<5x64xf32>, vector<64x16xf32>, vector<5x16xf32> -> vector<5x16xf32>
    %c0_101 = arith.constant 0 : index
    %c2_102 = arith.constant 2 : index
    %c0_103 = arith.constant 0 : index
    %c0_104 = arith.constant 0 : index
    %115 = vector.load %arg9[%c0_101, %c2_102, %c0_103, %c0_104] : memref<2x4x1x16xf32, #tpu.memory_space<vmem>>, vector<1x1x1x16xf32>
    %116 = vector.shape_cast %115 : vector<1x1x1x16xf32> to vector<1x16xf32>
    %117 = vector.broadcast %116 : vector<1x16xf32> to vector<5x16xf32>
    %118 = arith.addf %114, %117 : vector<5x16xf32>
    %c0_105 = arith.constant 0 : index
    %c2_106 = arith.constant 2 : index
    %c0_107 = arith.constant 0 : index
    %c0_108 = arith.constant 0 : index
    %119 = vector.load %arg10[%c0_105, %c2_106, %c0_107, %c0_108] : memref<2x4x64x16xf32, #tpu.memory_space<vmem>>, vector<1x1x64x16xf32>
    %120 = vector.shape_cast %119 : vector<1x1x64x16xf32> to vector<64x16xf32>
    %cst_109 = arith.constant dense<0.000000e+00> : vector<5x16xf32>
    %121 = tpu.matmul %31, %120, %cst_109 {dimension_numbers = #tpu.dot_dimension_numbers<[1], [0], [0], [1], [0, 0, 1, 1], [], []>} : vector<5x64xf32>, vector<64x16xf32>, vector<5x16xf32> -> vector<5x16xf32>
    %c0_110 = arith.constant 0 : index
    %c2_111 = arith.constant 2 : index
    %c0_112 = arith.constant 0 : index
    %c0_113 = arith.constant 0 : index
    %122 = vector.load %arg11[%c0_110, %c2_111, %c0_112, %c0_113] : memref<2x4x1x16xf32, #tpu.memory_space<vmem>>, vector<1x1x1x16xf32>
    %123 = vector.shape_cast %122 : vector<1x1x1x16xf32> to vector<1x16xf32>
    %124 = vector.broadcast %123 : vector<1x16xf32> to vector<5x16xf32>
    %125 = arith.addf %121, %124 : vector<5x16xf32>
    %cst_114 = arith.constant dense<0.000000e+00> : vector<5x5xf32>
    %126 = tpu.matmul %111, %118, %cst_114 {dimension_numbers = #tpu.dot_dimension_numbers<[1], [1], [0], [0], [0, 0, 1, 0], [], []>} : vector<5x16xf32>, vector<5x16xf32>, vector<5x5xf32> -> vector<5x5xf32>
    %cst_115 = arith.constant dense<0xFF800000> : vector<5xf32>
    %127 = vector.multi_reduction <maximumf>, %126, %cst_115 [1] : vector<5x5xf32> to vector<5xf32>
    %128 = vector.shape_cast %127 : vector<5xf32> to vector<5x1xf32>
    %129 = vector.broadcast %128 : vector<5x1xf32> to vector<5x5xf32>
    %130 = arith.subf %126, %129 : vector<5x5xf32>
    %131 = math.exp %130 : vector<5x5xf32>
    %cst_116 = arith.constant dense<0.000000e+00> : vector<5xf32>
    %132 = vector.multi_reduction <add>, %131, %cst_116 [1] : vector<5x5xf32> to vector<5xf32>
    %133 = vector.shape_cast %132 : vector<5xf32> to vector<5x1xf32>
    %134 = tpu.reciprocal %133 {approx = true} : vector<5x1xf32> -> vector<5x1xf32>
    %135 = vector.broadcast %134 : vector<5x1xf32> to vector<5x5xf32>
    %136 = arith.mulf %131, %135 : vector<5x5xf32>
    %cst_117 = arith.constant dense<0.000000e+00> : vector<5x16xf32>
    %137 = tpu.matmul %136, %125, %cst_117 {dimension_numbers = #tpu.dot_dimension_numbers<[1], [0], [0], [1], [0, 0, 1, 1], [], []>} : vector<5x5xf32>, vector<5x16xf32>, vector<5x16xf32> -> vector<5x16xf32>
    %c0_118 = arith.constant 0 : index
    %c2_119 = arith.constant 2 : index
    %c0_120 = arith.constant 0 : index
    %c0_121 = arith.constant 0 : index
    %138 = vector.load %arg12[%c0_118, %c2_119, %c0_120, %c0_121] : memref<2x4x16x64xf32, #tpu.memory_space<vmem>>, vector<1x1x16x64xf32>
    %139 = vector.shape_cast %138 : vector<1x1x16x64xf32> to vector<16x64xf32>
    %cst_122 = arith.constant dense<0.000000e+00> : vector<5x64xf32>
    %140 = tpu.matmul %137, %139, %cst_122 {dimension_numbers = #tpu.dot_dimension_numbers<[1], [0], [0], [1], [0, 0, 1, 1], [], []>} : vector<5x16xf32>, vector<16x64xf32>, vector<5x64xf32> -> vector<5x64xf32>
    %141 = arith.addf %104, %140 : vector<5x64xf32>
    %c0_123 = arith.constant 0 : index
    %c3 = arith.constant 3 : index
    %c0_124 = arith.constant 0 : index
    %c0_125 = arith.constant 0 : index
    %142 = vector.load %arg6[%c0_123, %c3, %c0_124, %c0_125] : memref<2x4x64x16xf32, #tpu.memory_space<vmem>>, vector<1x1x64x16xf32>
    %143 = vector.shape_cast %142 : vector<1x1x64x16xf32> to vector<64x16xf32>
    %cst_126 = arith.constant dense<0.000000e+00> : vector<5x16xf32>
    %144 = tpu.matmul %31, %143, %cst_126 {dimension_numbers = #tpu.dot_dimension_numbers<[1], [0], [0], [1], [0, 0, 1, 1], [], []>} : vector<5x64xf32>, vector<64x16xf32>, vector<5x16xf32> -> vector<5x16xf32>
    %c0_127 = arith.constant 0 : index
    %c3_128 = arith.constant 3 : index
    %c0_129 = arith.constant 0 : index
    %c0_130 = arith.constant 0 : index
    %145 = vector.load %arg7[%c0_127, %c3_128, %c0_129, %c0_130] : memref<2x4x1x16xf32, #tpu.memory_space<vmem>>, vector<1x1x1x16xf32>
    %146 = vector.shape_cast %145 : vector<1x1x1x16xf32> to vector<1x16xf32>
    %147 = vector.broadcast %146 : vector<1x16xf32> to vector<5x16xf32>
    %148 = arith.addf %144, %147 : vector<5x16xf32>
    %c0_131 = arith.constant 0 : index
    %c3_132 = arith.constant 3 : index
    %c0_133 = arith.constant 0 : index
    %c0_134 = arith.constant 0 : index
    %149 = vector.load %arg8[%c0_131, %c3_132, %c0_133, %c0_134] : memref<2x4x64x16xf32, #tpu.memory_space<vmem>>, vector<1x1x64x16xf32>
    %150 = vector.shape_cast %149 : vector<1x1x64x16xf32> to vector<64x16xf32>
    %cst_135 = arith.constant dense<0.000000e+00> : vector<5x16xf32>
    %151 = tpu.matmul %31, %150, %cst_135 {dimension_numbers = #tpu.dot_dimension_numbers<[1], [0], [0], [1], [0, 0, 1, 1], [], []>} : vector<5x64xf32>, vector<64x16xf32>, vector<5x16xf32> -> vector<5x16xf32>
    %c0_136 = arith.constant 0 : index
    %c3_137 = arith.constant 3 : index
    %c0_138 = arith.constant 0 : index
    %c0_139 = arith.constant 0 : index
    %152 = vector.load %arg9[%c0_136, %c3_137, %c0_138, %c0_139] : memref<2x4x1x16xf32, #tpu.memory_space<vmem>>, vector<1x1x1x16xf32>
    %153 = vector.shape_cast %152 : vector<1x1x1x16xf32> to vector<1x16xf32>
    %154 = vector.broadcast %153 : vector<1x16xf32> to vector<5x16xf32>
    %155 = arith.addf %151, %154 : vector<5x16xf32>
    %c0_140 = arith.constant 0 : index
    %c3_141 = arith.constant 3 : index
    %c0_142 = arith.constant 0 : index
    %c0_143 = arith.constant 0 : index
    %156 = vector.load %arg10[%c0_140, %c3_141, %c0_142, %c0_143] : memref<2x4x64x16xf32, #tpu.memory_space<vmem>>, vector<1x1x64x16xf32>
    %157 = vector.shape_cast %156 : vector<1x1x64x16xf32> to vector<64x16xf32>
    %cst_144 = arith.constant dense<0.000000e+00> : vector<5x16xf32>
    %158 = tpu.matmul %31, %157, %cst_144 {dimension_numbers = #tpu.dot_dimension_numbers<[1], [0], [0], [1], [0, 0, 1, 1], [], []>} : vector<5x64xf32>, vector<64x16xf32>, vector<5x16xf32> -> vector<5x16xf32>
    %c0_145 = arith.constant 0 : index
    %c3_146 = arith.constant 3 : index
    %c0_147 = arith.constant 0 : index
    %c0_148 = arith.constant 0 : index
    %159 = vector.load %arg11[%c0_145, %c3_146, %c0_147, %c0_148] : memref<2x4x1x16xf32, #tpu.memory_space<vmem>>, vector<1x1x1x16xf32>
    %160 = vector.shape_cast %159 : vector<1x1x1x16xf32> to vector<1x16xf32>
    %161 = vector.broadcast %160 : vector<1x16xf32> to vector<5x16xf32>
    %162 = arith.addf %158, %161 : vector<5x16xf32>
    %cst_149 = arith.constant dense<0.000000e+00> : vector<5x5xf32>
    %163 = tpu.matmul %148, %155, %cst_149 {dimension_numbers = #tpu.dot_dimension_numbers<[1], [1], [0], [0], [0, 0, 1, 0], [], []>} : vector<5x16xf32>, vector<5x16xf32>, vector<5x5xf32> -> vector<5x5xf32>
    %cst_150 = arith.constant dense<0xFF800000> : vector<5xf32>
    %164 = vector.multi_reduction <maximumf>, %163, %cst_150 [1] : vector<5x5xf32> to vector<5xf32>
    %165 = vector.shape_cast %164 : vector<5xf32> to vector<5x1xf32>
    %166 = vector.broadcast %165 : vector<5x1xf32> to vector<5x5xf32>
    %167 = arith.subf %163, %166 : vector<5x5xf32>
    %168 = math.exp %167 : vector<5x5xf32>
    %cst_151 = arith.constant dense<0.000000e+00> : vector<5xf32>
    %169 = vector.multi_reduction <add>, %168, %cst_151 [1] : vector<5x5xf32> to vector<5xf32>
    %170 = vector.shape_cast %169 : vector<5xf32> to vector<5x1xf32>
    %171 = tpu.reciprocal %170 {approx = true} : vector<5x1xf32> -> vector<5x1xf32>
    %172 = vector.broadcast %171 : vector<5x1xf32> to vector<5x5xf32>
    %173 = arith.mulf %168, %172 : vector<5x5xf32>
    %cst_152 = arith.constant dense<0.000000e+00> : vector<5x16xf32>
    %174 = tpu.matmul %173, %162, %cst_152 {dimension_numbers = #tpu.dot_dimension_numbers<[1], [0], [0], [1], [0, 0, 1, 1], [], []>} : vector<5x5xf32>, vector<5x16xf32>, vector<5x16xf32> -> vector<5x16xf32>
    %c0_153 = arith.constant 0 : index
    %c3_154 = arith.constant 3 : index
    %c0_155 = arith.constant 0 : index
    %c0_156 = arith.constant 0 : index
    %175 = vector.load %arg12[%c0_153, %c3_154, %c0_155, %c0_156] : memref<2x4x16x64xf32, #tpu.memory_space<vmem>>, vector<1x1x16x64xf32>
    %176 = vector.shape_cast %175 : vector<1x1x16x64xf32> to vector<16x64xf32>
    %cst_157 = arith.constant dense<0.000000e+00> : vector<5x64xf32>
    %177 = tpu.matmul %174, %176, %cst_157 {dimension_numbers = #tpu.dot_dimension_numbers<[1], [0], [0], [1], [0, 0, 1, 1], [], []>} : vector<5x16xf32>, vector<16x64xf32>, vector<5x64xf32> -> vector<5x64xf32>
    %178 = arith.addf %141, %177 : vector<5x64xf32>
    %179 = arith.addf %5, %178 : vector<5x64xf32>
    %c0_158 = arith.constant 0 : index
    %c0_159 = arith.constant 0 : index
    %c0_160 = arith.constant 0 : index
    %180 = vector.load %arg13[%c0_158, %c0_159, %c0_160] : memref<2x1x64xf32, #tpu.memory_space<vmem>>, vector<1x1x64xf32>
    %181 = vector.shape_cast %180 : vector<1x1x64xf32> to vector<1x64xf32>
    %182 = vector.broadcast %181 : vector<1x64xf32> to vector<5x64xf32>
    %183 = arith.addf %179, %182 : vector<5x64xf32>
    %c0_161 = arith.constant 0 : index
    %c0_162 = arith.constant 0 : index
    %c0_163 = arith.constant 0 : index
    %184 = vector.load %arg14[%c0_161, %c0_162, %c0_163] : memref<2x1x64xf32, #tpu.memory_space<vmem>>, vector<1x1x64xf32>
    %185 = vector.shape_cast %184 : vector<1x1x64xf32> to vector<1x64xf32>
    %c0_164 = arith.constant 0 : index
    %c0_165 = arith.constant 0 : index
    %c0_166 = arith.constant 0 : index
    %186 = vector.load %arg15[%c0_164, %c0_165, %c0_166] : memref<2x1x64xf32, #tpu.memory_space<vmem>>, vector<1x1x64xf32>
    %187 = vector.shape_cast %186 : vector<1x1x64xf32> to vector<1x64xf32>
    %cst_167 = arith.constant dense<0.000000e+00> : vector<5xf32>
    %188 = vector.multi_reduction <add>, %183, %cst_167 [1] : vector<5x64xf32> to vector<5xf32>
    %189 = vector.shape_cast %188 : vector<5xf32> to vector<5x1xf32>
    %cst_168 = arith.constant 6.400000e+01 : f32
    %190 = vector.broadcast %cst_168 : f32 to vector<5x1xf32>
    %191 = arith.divf %189, %190 : vector<5x1xf32>
    %192 = vector.broadcast %191 : vector<5x1xf32> to vector<5x64xf32>
    %193 = arith.subf %183, %192 : vector<5x64xf32>
    %194 = arith.mulf %193, %193 : vector<5x64xf32>
    %cst_169 = arith.constant dense<0.000000e+00> : vector<5xf32>
    %195 = vector.multi_reduction <add>, %194, %cst_169 [1] : vector<5x64xf32> to vector<5xf32>
    %196 = vector.shape_cast %195 : vector<5xf32> to vector<5x1xf32>
    %cst_170 = arith.constant 6.400000e+01 : f32
    %197 = vector.broadcast %cst_170 : f32 to vector<5x1xf32>
    %198 = arith.divf %196, %197 : vector<5x1xf32>
    %199 = vector.broadcast %191 : vector<5x1xf32> to vector<5x64xf32>
    %200 = arith.subf %183, %199 : vector<5x64xf32>
    %cst_171 = arith.constant 9.99999996E-13 : f32
    %201 = vector.broadcast %cst_171 : f32 to vector<5x1xf32>
    %202 = arith.addf %198, %201 : vector<5x1xf32>
    %203 = math.rsqrt %202 : vector<5x1xf32>
    %204 = vector.broadcast %203 : vector<5x1xf32> to vector<5x64xf32>
    %205 = arith.mulf %200, %204 : vector<5x64xf32>
    %206 = vector.broadcast %185 : vector<1x64xf32> to vector<5x64xf32>
    %207 = arith.mulf %205, %206 : vector<5x64xf32>
    %208 = vector.broadcast %187 : vector<1x64xf32> to vector<5x64xf32>
    %209 = arith.addf %207, %208 : vector<5x64xf32>
    %c0_172 = arith.constant 0 : index
    %c0_173 = arith.constant 0 : index
    %c0_174 = arith.constant 0 : index
    %210 = vector.load %arg16[%c0_172, %c0_173, %c0_174] : memref<2x64x128xf32, #tpu.memory_space<vmem>>, vector<1x64x128xf32>
    %211 = vector.shape_cast %210 : vector<1x64x128xf32> to vector<64x128xf32>
    %cst_175 = arith.constant dense<0.000000e+00> : vector<5x128xf32>
    %212 = tpu.matmul %209, %211, %cst_175 {dimension_numbers = #tpu.dot_dimension_numbers<[1], [0], [0], [1], [0, 0, 1, 1], [], []>} : vector<5x64xf32>, vector<64x128xf32>, vector<5x128xf32> -> vector<5x128xf32>
    %c0_176 = arith.constant 0 : index
    %c0_177 = arith.constant 0 : index
    %c0_178 = arith.constant 0 : index
    %213 = vector.load %arg17[%c0_176, %c0_177, %c0_178] : memref<2x1x128xf32, #tpu.memory_space<vmem>>, vector<1x1x128xf32>
    %214 = vector.shape_cast %213 : vector<1x1x128xf32> to vector<1x128xf32>
    %215 = vector.broadcast %214 : vector<1x128xf32> to vector<5x128xf32>
    %216 = arith.addf %212, %215 : vector<5x128xf32>
    %cst_179 = arith.constant 5.000000e-01 : f32
    %217 = vector.broadcast %cst_179 : f32 to vector<5x128xf32>
    %218 = arith.mulf %217, %216 : vector<5x128xf32>
    %cst_180 = arith.constant 4.471500e-02 : f32
    %219 = vector.broadcast %cst_180 : f32 to vector<5x128xf32>
    %220 = arith.mulf %219, %216 : vector<5x128xf32>
    %221 = arith.mulf %220, %216 : vector<5x128xf32>
    %222 = arith.mulf %221, %216 : vector<5x128xf32>
    %223 = arith.addf %216, %222 : vector<5x128xf32>
    %cst_181 = arith.constant 0.797884583 : f32
    %224 = vector.broadcast %cst_181 : f32 to vector<5x128xf32>
    %225 = arith.mulf %224, %223 : vector<5x128xf32>
    %226 = math.tanh %225 : vector<5x128xf32>
    %cst_182 = arith.constant 1.000000e+00 : f32
    %227 = vector.broadcast %cst_182 : f32 to vector<5x128xf32>
    %228 = arith.addf %227, %226 : vector<5x128xf32>
    %229 = arith.mulf %218, %228 : vector<5x128xf32>
    %c0_183 = arith.constant 0 : index
    %c0_184 = arith.constant 0 : index
    %c0_185 = arith.constant 0 : index
    %230 = vector.load %arg18[%c0_183, %c0_184, %c0_185] : memref<2x128x64xf32, #tpu.memory_space<vmem>>, vector<1x128x64xf32>
    %231 = vector.shape_cast %230 : vector<1x128x64xf32> to vector<128x64xf32>
    %cst_186 = arith.constant dense<0.000000e+00> : vector<5x64xf32>
    %232 = tpu.matmul %229, %231, %cst_186 {dimension_numbers = #tpu.dot_dimension_numbers<[1], [0], [0], [1], [0, 0, 1, 1], [], []>} : vector<5x128xf32>, vector<128x64xf32>, vector<5x64xf32> -> vector<5x64xf32>
    %c0_187 = arith.constant 0 : index
    %c0_188 = arith.constant 0 : index
    %c0_189 = arith.constant 0 : index
    %233 = vector.load %arg19[%c0_187, %c0_188, %c0_189] : memref<2x1x64xf32, #tpu.memory_space<vmem>>, vector<1x1x64xf32>
    %234 = vector.shape_cast %233 : vector<1x1x64xf32> to vector<1x64xf32>
    %235 = vector.broadcast %234 : vector<1x64xf32> to vector<5x64xf32>
    %236 = arith.addf %232, %235 : vector<5x64xf32>
    %237 = arith.addf %183, %236 : vector<5x64xf32>
    %c1_190 = arith.constant 1 : index
    %c0_191 = arith.constant 0 : index
    %c0_192 = arith.constant 0 : index
    %238 = vector.load %arg4[%c1_190, %c0_191, %c0_192] : memref<2x1x64xf32, #tpu.memory_space<vmem>>, vector<1x1x64xf32>
    %239 = vector.shape_cast %238 : vector<1x1x64xf32> to vector<1x64xf32>
    %c1_193 = arith.constant 1 : index
    %c0_194 = arith.constant 0 : index
    %c0_195 = arith.constant 0 : index
    %240 = vector.load %arg5[%c1_193, %c0_194, %c0_195] : memref<2x1x64xf32, #tpu.memory_space<vmem>>, vector<1x1x64xf32>
    %241 = vector.shape_cast %240 : vector<1x1x64xf32> to vector<1x64xf32>
    %cst_196 = arith.constant dense<0.000000e+00> : vector<5xf32>
    %242 = vector.multi_reduction <add>, %237, %cst_196 [1] : vector<5x64xf32> to vector<5xf32>
    %243 = vector.shape_cast %242 : vector<5xf32> to vector<5x1xf32>
    %cst_197 = arith.constant 6.400000e+01 : f32
    %244 = vector.broadcast %cst_197 : f32 to vector<5x1xf32>
    %245 = arith.divf %243, %244 : vector<5x1xf32>
    %246 = vector.broadcast %245 : vector<5x1xf32> to vector<5x64xf32>
    %247 = arith.subf %237, %246 : vector<5x64xf32>
    %248 = arith.mulf %247, %247 : vector<5x64xf32>
    %cst_198 = arith.constant dense<0.000000e+00> : vector<5xf32>
    %249 = vector.multi_reduction <add>, %248, %cst_198 [1] : vector<5x64xf32> to vector<5xf32>
    %250 = vector.shape_cast %249 : vector<5xf32> to vector<5x1xf32>
    %cst_199 = arith.constant 6.400000e+01 : f32
    %251 = vector.broadcast %cst_199 : f32 to vector<5x1xf32>
    %252 = arith.divf %250, %251 : vector<5x1xf32>
    %253 = vector.broadcast %245 : vector<5x1xf32> to vector<5x64xf32>
    %254 = arith.subf %237, %253 : vector<5x64xf32>
    %cst_200 = arith.constant 9.99999996E-13 : f32
    %255 = vector.broadcast %cst_200 : f32 to vector<5x1xf32>
    %256 = arith.addf %252, %255 : vector<5x1xf32>
    %257 = math.rsqrt %256 : vector<5x1xf32>
    %258 = vector.broadcast %257 : vector<5x1xf32> to vector<5x64xf32>
    %259 = arith.mulf %254, %258 : vector<5x64xf32>
    %260 = vector.broadcast %239 : vector<1x64xf32> to vector<5x64xf32>
    %261 = arith.mulf %259, %260 : vector<5x64xf32>
    %262 = vector.broadcast %241 : vector<1x64xf32> to vector<5x64xf32>
    %263 = arith.addf %261, %262 : vector<5x64xf32>
    %c1_201 = arith.constant 1 : index
    %c0_202 = arith.constant 0 : index
    %c0_203 = arith.constant 0 : index
    %c0_204 = arith.constant 0 : index
    %264 = vector.load %arg6[%c1_201, %c0_202, %c0_203, %c0_204] : memref<2x4x64x16xf32, #tpu.memory_space<vmem>>, vector<1x1x64x16xf32>
    %265 = vector.shape_cast %264 : vector<1x1x64x16xf32> to vector<64x16xf32>
    %cst_205 = arith.constant dense<0.000000e+00> : vector<5x16xf32>
    %266 = tpu.matmul %263, %265, %cst_205 {dimension_numbers = #tpu.dot_dimension_numbers<[1], [0], [0], [1], [0, 0, 1, 1], [], []>} : vector<5x64xf32>, vector<64x16xf32>, vector<5x16xf32> -> vector<5x16xf32>
    %c1_206 = arith.constant 1 : index
    %c0_207 = arith.constant 0 : index
    %c0_208 = arith.constant 0 : index
    %c0_209 = arith.constant 0 : index
    %267 = vector.load %arg7[%c1_206, %c0_207, %c0_208, %c0_209] : memref<2x4x1x16xf32, #tpu.memory_space<vmem>>, vector<1x1x1x16xf32>
    %268 = vector.shape_cast %267 : vector<1x1x1x16xf32> to vector<1x16xf32>
    %269 = vector.broadcast %268 : vector<1x16xf32> to vector<5x16xf32>
    %270 = arith.addf %266, %269 : vector<5x16xf32>
    %c1_210 = arith.constant 1 : index
    %c0_211 = arith.constant 0 : index
    %c0_212 = arith.constant 0 : index
    %c0_213 = arith.constant 0 : index
    %271 = vector.load %arg8[%c1_210, %c0_211, %c0_212, %c0_213] : memref<2x4x64x16xf32, #tpu.memory_space<vmem>>, vector<1x1x64x16xf32>
    %272 = vector.shape_cast %271 : vector<1x1x64x16xf32> to vector<64x16xf32>
    %cst_214 = arith.constant dense<0.000000e+00> : vector<5x16xf32>
    %273 = tpu.matmul %263, %272, %cst_214 {dimension_numbers = #tpu.dot_dimension_numbers<[1], [0], [0], [1], [0, 0, 1, 1], [], []>} : vector<5x64xf32>, vector<64x16xf32>, vector<5x16xf32> -> vector<5x16xf32>
    %c1_215 = arith.constant 1 : index
    %c0_216 = arith.constant 0 : index
    %c0_217 = arith.constant 0 : index
    %c0_218 = arith.constant 0 : index
    %274 = vector.load %arg9[%c1_215, %c0_216, %c0_217, %c0_218] : memref<2x4x1x16xf32, #tpu.memory_space<vmem>>, vector<1x1x1x16xf32>
    %275 = vector.shape_cast %274 : vector<1x1x1x16xf32> to vector<1x16xf32>
    %276 = vector.broadcast %275 : vector<1x16xf32> to vector<5x16xf32>
    %277 = arith.addf %273, %276 : vector<5x16xf32>
    %c1_219 = arith.constant 1 : index
    %c0_220 = arith.constant 0 : index
    %c0_221 = arith.constant 0 : index
    %c0_222 = arith.constant 0 : index
    %278 = vector.load %arg10[%c1_219, %c0_220, %c0_221, %c0_222] : memref<2x4x64x16xf32, #tpu.memory_space<vmem>>, vector<1x1x64x16xf32>
    %279 = vector.shape_cast %278 : vector<1x1x64x16xf32> to vector<64x16xf32>
    %cst_223 = arith.constant dense<0.000000e+00> : vector<5x16xf32>
    %280 = tpu.matmul %263, %279, %cst_223 {dimension_numbers = #tpu.dot_dimension_numbers<[1], [0], [0], [1], [0, 0, 1, 1], [], []>} : vector<5x64xf32>, vector<64x16xf32>, vector<5x16xf32> -> vector<5x16xf32>
    %c1_224 = arith.constant 1 : index
    %c0_225 = arith.constant 0 : index
    %c0_226 = arith.constant 0 : index
    %c0_227 = arith.constant 0 : index
    %281 = vector.load %arg11[%c1_224, %c0_225, %c0_226, %c0_227] : memref<2x4x1x16xf32, #tpu.memory_space<vmem>>, vector<1x1x1x16xf32>
    %282 = vector.shape_cast %281 : vector<1x1x1x16xf32> to vector<1x16xf32>
    %283 = vector.broadcast %282 : vector<1x16xf32> to vector<5x16xf32>
    %284 = arith.addf %280, %283 : vector<5x16xf32>
    %cst_228 = arith.constant dense<0.000000e+00> : vector<5x5xf32>
    %285 = tpu.matmul %270, %277, %cst_228 {dimension_numbers = #tpu.dot_dimension_numbers<[1], [1], [0], [0], [0, 0, 1, 0], [], []>} : vector<5x16xf32>, vector<5x16xf32>, vector<5x5xf32> -> vector<5x5xf32>
    %cst_229 = arith.constant dense<0xFF800000> : vector<5xf32>
    %286 = vector.multi_reduction <maximumf>, %285, %cst_229 [1] : vector<5x5xf32> to vector<5xf32>
    %287 = vector.shape_cast %286 : vector<5xf32> to vector<5x1xf32>
    %288 = vector.broadcast %287 : vector<5x1xf32> to vector<5x5xf32>
    %289 = arith.subf %285, %288 : vector<5x5xf32>
    %290 = math.exp %289 : vector<5x5xf32>
    %cst_230 = arith.constant dense<0.000000e+00> : vector<5xf32>
    %291 = vector.multi_reduction <add>, %290, %cst_230 [1] : vector<5x5xf32> to vector<5xf32>
    %292 = vector.shape_cast %291 : vector<5xf32> to vector<5x1xf32>
    %293 = tpu.reciprocal %292 {approx = true} : vector<5x1xf32> -> vector<5x1xf32>
    %294 = vector.broadcast %293 : vector<5x1xf32> to vector<5x5xf32>
    %295 = arith.mulf %290, %294 : vector<5x5xf32>
    %cst_231 = arith.constant dense<0.000000e+00> : vector<5x16xf32>
    %296 = tpu.matmul %295, %284, %cst_231 {dimension_numbers = #tpu.dot_dimension_numbers<[1], [0], [0], [1], [0, 0, 1, 1], [], []>} : vector<5x5xf32>, vector<5x16xf32>, vector<5x16xf32> -> vector<5x16xf32>
    %c1_232 = arith.constant 1 : index
    %c0_233 = arith.constant 0 : index
    %c0_234 = arith.constant 0 : index
    %c0_235 = arith.constant 0 : index
    %297 = vector.load %arg12[%c1_232, %c0_233, %c0_234, %c0_235] : memref<2x4x16x64xf32, #tpu.memory_space<vmem>>, vector<1x1x16x64xf32>
    %298 = vector.shape_cast %297 : vector<1x1x16x64xf32> to vector<16x64xf32>
    %cst_236 = arith.constant dense<0.000000e+00> : vector<5x64xf32>
    %299 = tpu.matmul %296, %298, %cst_236 {dimension_numbers = #tpu.dot_dimension_numbers<[1], [0], [0], [1], [0, 0, 1, 1], [], []>} : vector<5x16xf32>, vector<16x64xf32>, vector<5x64xf32> -> vector<5x64xf32>
    %c1_237 = arith.constant 1 : index
    %c1_238 = arith.constant 1 : index
    %c0_239 = arith.constant 0 : index
    %c0_240 = arith.constant 0 : index
    %300 = vector.load %arg6[%c1_237, %c1_238, %c0_239, %c0_240] : memref<2x4x64x16xf32, #tpu.memory_space<vmem>>, vector<1x1x64x16xf32>
    %301 = vector.shape_cast %300 : vector<1x1x64x16xf32> to vector<64x16xf32>
    %cst_241 = arith.constant dense<0.000000e+00> : vector<5x16xf32>
    %302 = tpu.matmul %263, %301, %cst_241 {dimension_numbers = #tpu.dot_dimension_numbers<[1], [0], [0], [1], [0, 0, 1, 1], [], []>} : vector<5x64xf32>, vector<64x16xf32>, vector<5x16xf32> -> vector<5x16xf32>
    %c1_242 = arith.constant 1 : index
    %c1_243 = arith.constant 1 : index
    %c0_244 = arith.constant 0 : index
    %c0_245 = arith.constant 0 : index
    %303 = vector.load %arg7[%c1_242, %c1_243, %c0_244, %c0_245] : memref<2x4x1x16xf32, #tpu.memory_space<vmem>>, vector<1x1x1x16xf32>
    %304 = vector.shape_cast %303 : vector<1x1x1x16xf32> to vector<1x16xf32>
    %305 = vector.broadcast %304 : vector<1x16xf32> to vector<5x16xf32>
    %306 = arith.addf %302, %305 : vector<5x16xf32>
    %c1_246 = arith.constant 1 : index
    %c1_247 = arith.constant 1 : index
    %c0_248 = arith.constant 0 : index
    %c0_249 = arith.constant 0 : index
    %307 = vector.load %arg8[%c1_246, %c1_247, %c0_248, %c0_249] : memref<2x4x64x16xf32, #tpu.memory_space<vmem>>, vector<1x1x64x16xf32>
    %308 = vector.shape_cast %307 : vector<1x1x64x16xf32> to vector<64x16xf32>
    %cst_250 = arith.constant dense<0.000000e+00> : vector<5x16xf32>
    %309 = tpu.matmul %263, %308, %cst_250 {dimension_numbers = #tpu.dot_dimension_numbers<[1], [0], [0], [1], [0, 0, 1, 1], [], []>} : vector<5x64xf32>, vector<64x16xf32>, vector<5x16xf32> -> vector<5x16xf32>
    %c1_251 = arith.constant 1 : index
    %c1_252 = arith.constant 1 : index
    %c0_253 = arith.constant 0 : index
    %c0_254 = arith.constant 0 : index
    %310 = vector.load %arg9[%c1_251, %c1_252, %c0_253, %c0_254] : memref<2x4x1x16xf32, #tpu.memory_space<vmem>>, vector<1x1x1x16xf32>
    %311 = vector.shape_cast %310 : vector<1x1x1x16xf32> to vector<1x16xf32>
    %312 = vector.broadcast %311 : vector<1x16xf32> to vector<5x16xf32>
    %313 = arith.addf %309, %312 : vector<5x16xf32>
    %c1_255 = arith.constant 1 : index
    %c1_256 = arith.constant 1 : index
    %c0_257 = arith.constant 0 : index
    %c0_258 = arith.constant 0 : index
    %314 = vector.load %arg10[%c1_255, %c1_256, %c0_257, %c0_258] : memref<2x4x64x16xf32, #tpu.memory_space<vmem>>, vector<1x1x64x16xf32>
    %315 = vector.shape_cast %314 : vector<1x1x64x16xf32> to vector<64x16xf32>
    %cst_259 = arith.constant dense<0.000000e+00> : vector<5x16xf32>
    %316 = tpu.matmul %263, %315, %cst_259 {dimension_numbers = #tpu.dot_dimension_numbers<[1], [0], [0], [1], [0, 0, 1, 1], [], []>} : vector<5x64xf32>, vector<64x16xf32>, vector<5x16xf32> -> vector<5x16xf32>
    %c1_260 = arith.constant 1 : index
    %c1_261 = arith.constant 1 : index
    %c0_262 = arith.constant 0 : index
    %c0_263 = arith.constant 0 : index
    %317 = vector.load %arg11[%c1_260, %c1_261, %c0_262, %c0_263] : memref<2x4x1x16xf32, #tpu.memory_space<vmem>>, vector<1x1x1x16xf32>
    %318 = vector.shape_cast %317 : vector<1x1x1x16xf32> to vector<1x16xf32>
    %319 = vector.broadcast %318 : vector<1x16xf32> to vector<5x16xf32>
    %320 = arith.addf %316, %319 : vector<5x16xf32>
    %cst_264 = arith.constant dense<0.000000e+00> : vector<5x5xf32>
    %321 = tpu.matmul %306, %313, %cst_264 {dimension_numbers = #tpu.dot_dimension_numbers<[1], [1], [0], [0], [0, 0, 1, 0], [], []>} : vector<5x16xf32>, vector<5x16xf32>, vector<5x5xf32> -> vector<5x5xf32>
    %cst_265 = arith.constant dense<0xFF800000> : vector<5xf32>
    %322 = vector.multi_reduction <maximumf>, %321, %cst_265 [1] : vector<5x5xf32> to vector<5xf32>
    %323 = vector.shape_cast %322 : vector<5xf32> to vector<5x1xf32>
    %324 = vector.broadcast %323 : vector<5x1xf32> to vector<5x5xf32>
    %325 = arith.subf %321, %324 : vector<5x5xf32>
    %326 = math.exp %325 : vector<5x5xf32>
    %cst_266 = arith.constant dense<0.000000e+00> : vector<5xf32>
    %327 = vector.multi_reduction <add>, %326, %cst_266 [1] : vector<5x5xf32> to vector<5xf32>
    %328 = vector.shape_cast %327 : vector<5xf32> to vector<5x1xf32>
    %329 = tpu.reciprocal %328 {approx = true} : vector<5x1xf32> -> vector<5x1xf32>
    %330 = vector.broadcast %329 : vector<5x1xf32> to vector<5x5xf32>
    %331 = arith.mulf %326, %330 : vector<5x5xf32>
    %cst_267 = arith.constant dense<0.000000e+00> : vector<5x16xf32>
    %332 = tpu.matmul %331, %320, %cst_267 {dimension_numbers = #tpu.dot_dimension_numbers<[1], [0], [0], [1], [0, 0, 1, 1], [], []>} : vector<5x5xf32>, vector<5x16xf32>, vector<5x16xf32> -> vector<5x16xf32>
    %c1_268 = arith.constant 1 : index
    %c1_269 = arith.constant 1 : index
    %c0_270 = arith.constant 0 : index
    %c0_271 = arith.constant 0 : index
    %333 = vector.load %arg12[%c1_268, %c1_269, %c0_270, %c0_271] : memref<2x4x16x64xf32, #tpu.memory_space<vmem>>, vector<1x1x16x64xf32>
    %334 = vector.shape_cast %333 : vector<1x1x16x64xf32> to vector<16x64xf32>
    %cst_272 = arith.constant dense<0.000000e+00> : vector<5x64xf32>
    %335 = tpu.matmul %332, %334, %cst_272 {dimension_numbers = #tpu.dot_dimension_numbers<[1], [0], [0], [1], [0, 0, 1, 1], [], []>} : vector<5x16xf32>, vector<16x64xf32>, vector<5x64xf32> -> vector<5x64xf32>
    %336 = arith.addf %299, %335 : vector<5x64xf32>
    %c1_273 = arith.constant 1 : index
    %c2_274 = arith.constant 2 : index
    %c0_275 = arith.constant 0 : index
    %c0_276 = arith.constant 0 : index
    %337 = vector.load %arg6[%c1_273, %c2_274, %c0_275, %c0_276] : memref<2x4x64x16xf32, #tpu.memory_space<vmem>>, vector<1x1x64x16xf32>
    %338 = vector.shape_cast %337 : vector<1x1x64x16xf32> to vector<64x16xf32>
    %cst_277 = arith.constant dense<0.000000e+00> : vector<5x16xf32>
    %339 = tpu.matmul %263, %338, %cst_277 {dimension_numbers = #tpu.dot_dimension_numbers<[1], [0], [0], [1], [0, 0, 1, 1], [], []>} : vector<5x64xf32>, vector<64x16xf32>, vector<5x16xf32> -> vector<5x16xf32>
    %c1_278 = arith.constant 1 : index
    %c2_279 = arith.constant 2 : index
    %c0_280 = arith.constant 0 : index
    %c0_281 = arith.constant 0 : index
    %340 = vector.load %arg7[%c1_278, %c2_279, %c0_280, %c0_281] : memref<2x4x1x16xf32, #tpu.memory_space<vmem>>, vector<1x1x1x16xf32>
    %341 = vector.shape_cast %340 : vector<1x1x1x16xf32> to vector<1x16xf32>
    %342 = vector.broadcast %341 : vector<1x16xf32> to vector<5x16xf32>
    %343 = arith.addf %339, %342 : vector<5x16xf32>
    %c1_282 = arith.constant 1 : index
    %c2_283 = arith.constant 2 : index
    %c0_284 = arith.constant 0 : index
    %c0_285 = arith.constant 0 : index
    %344 = vector.load %arg8[%c1_282, %c2_283, %c0_284, %c0_285] : memref<2x4x64x16xf32, #tpu.memory_space<vmem>>, vector<1x1x64x16xf32>
    %345 = vector.shape_cast %344 : vector<1x1x64x16xf32> to vector<64x16xf32>
    %cst_286 = arith.constant dense<0.000000e+00> : vector<5x16xf32>
    %346 = tpu.matmul %263, %345, %cst_286 {dimension_numbers = #tpu.dot_dimension_numbers<[1], [0], [0], [1], [0, 0, 1, 1], [], []>} : vector<5x64xf32>, vector<64x16xf32>, vector<5x16xf32> -> vector<5x16xf32>
    %c1_287 = arith.constant 1 : index
    %c2_288 = arith.constant 2 : index
    %c0_289 = arith.constant 0 : index
    %c0_290 = arith.constant 0 : index
    %347 = vector.load %arg9[%c1_287, %c2_288, %c0_289, %c0_290] : memref<2x4x1x16xf32, #tpu.memory_space<vmem>>, vector<1x1x1x16xf32>
    %348 = vector.shape_cast %347 : vector<1x1x1x16xf32> to vector<1x16xf32>
    %349 = vector.broadcast %348 : vector<1x16xf32> to vector<5x16xf32>
    %350 = arith.addf %346, %349 : vector<5x16xf32>
    %c1_291 = arith.constant 1 : index
    %c2_292 = arith.constant 2 : index
    %c0_293 = arith.constant 0 : index
    %c0_294 = arith.constant 0 : index
    %351 = vector.load %arg10[%c1_291, %c2_292, %c0_293, %c0_294] : memref<2x4x64x16xf32, #tpu.memory_space<vmem>>, vector<1x1x64x16xf32>
    %352 = vector.shape_cast %351 : vector<1x1x64x16xf32> to vector<64x16xf32>
    %cst_295 = arith.constant dense<0.000000e+00> : vector<5x16xf32>
    %353 = tpu.matmul %263, %352, %cst_295 {dimension_numbers = #tpu.dot_dimension_numbers<[1], [0], [0], [1], [0, 0, 1, 1], [], []>} : vector<5x64xf32>, vector<64x16xf32>, vector<5x16xf32> -> vector<5x16xf32>
    %c1_296 = arith.constant 1 : index
    %c2_297 = arith.constant 2 : index
    %c0_298 = arith.constant 0 : index
    %c0_299 = arith.constant 0 : index
    %354 = vector.load %arg11[%c1_296, %c2_297, %c0_298, %c0_299] : memref<2x4x1x16xf32, #tpu.memory_space<vmem>>, vector<1x1x1x16xf32>
    %355 = vector.shape_cast %354 : vector<1x1x1x16xf32> to vector<1x16xf32>
    %356 = vector.broadcast %355 : vector<1x16xf32> to vector<5x16xf32>
    %357 = arith.addf %353, %356 : vector<5x16xf32>
    %cst_300 = arith.constant dense<0.000000e+00> : vector<5x5xf32>
    %358 = tpu.matmul %343, %350, %cst_300 {dimension_numbers = #tpu.dot_dimension_numbers<[1], [1], [0], [0], [0, 0, 1, 0], [], []>} : vector<5x16xf32>, vector<5x16xf32>, vector<5x5xf32> -> vector<5x5xf32>
    %cst_301 = arith.constant dense<0xFF800000> : vector<5xf32>
    %359 = vector.multi_reduction <maximumf>, %358, %cst_301 [1] : vector<5x5xf32> to vector<5xf32>
    %360 = vector.shape_cast %359 : vector<5xf32> to vector<5x1xf32>
    %361 = vector.broadcast %360 : vector<5x1xf32> to vector<5x5xf32>
    %362 = arith.subf %358, %361 : vector<5x5xf32>
    %363 = math.exp %362 : vector<5x5xf32>
    %cst_302 = arith.constant dense<0.000000e+00> : vector<5xf32>
    %364 = vector.multi_reduction <add>, %363, %cst_302 [1] : vector<5x5xf32> to vector<5xf32>
    %365 = vector.shape_cast %364 : vector<5xf32> to vector<5x1xf32>
    %366 = tpu.reciprocal %365 {approx = true} : vector<5x1xf32> -> vector<5x1xf32>
    %367 = vector.broadcast %366 : vector<5x1xf32> to vector<5x5xf32>
    %368 = arith.mulf %363, %367 : vector<5x5xf32>
    %cst_303 = arith.constant dense<0.000000e+00> : vector<5x16xf32>
    %369 = tpu.matmul %368, %357, %cst_303 {dimension_numbers = #tpu.dot_dimension_numbers<[1], [0], [0], [1], [0, 0, 1, 1], [], []>} : vector<5x5xf32>, vector<5x16xf32>, vector<5x16xf32> -> vector<5x16xf32>
    %c1_304 = arith.constant 1 : index
    %c2_305 = arith.constant 2 : index
    %c0_306 = arith.constant 0 : index
    %c0_307 = arith.constant 0 : index
    %370 = vector.load %arg12[%c1_304, %c2_305, %c0_306, %c0_307] : memref<2x4x16x64xf32, #tpu.memory_space<vmem>>, vector<1x1x16x64xf32>
    %371 = vector.shape_cast %370 : vector<1x1x16x64xf32> to vector<16x64xf32>
    %cst_308 = arith.constant dense<0.000000e+00> : vector<5x64xf32>
    %372 = tpu.matmul %369, %371, %cst_308 {dimension_numbers = #tpu.dot_dimension_numbers<[1], [0], [0], [1], [0, 0, 1, 1], [], []>} : vector<5x16xf32>, vector<16x64xf32>, vector<5x64xf32> -> vector<5x64xf32>
    %373 = arith.addf %336, %372 : vector<5x64xf32>
    %c1_309 = arith.constant 1 : index
    %c3_310 = arith.constant 3 : index
    %c0_311 = arith.constant 0 : index
    %c0_312 = arith.constant 0 : index
    %374 = vector.load %arg6[%c1_309, %c3_310, %c0_311, %c0_312] : memref<2x4x64x16xf32, #tpu.memory_space<vmem>>, vector<1x1x64x16xf32>
    %375 = vector.shape_cast %374 : vector<1x1x64x16xf32> to vector<64x16xf32>
    %cst_313 = arith.constant dense<0.000000e+00> : vector<5x16xf32>
    %376 = tpu.matmul %263, %375, %cst_313 {dimension_numbers = #tpu.dot_dimension_numbers<[1], [0], [0], [1], [0, 0, 1, 1], [], []>} : vector<5x64xf32>, vector<64x16xf32>, vector<5x16xf32> -> vector<5x16xf32>
    %c1_314 = arith.constant 1 : index
    %c3_315 = arith.constant 3 : index
    %c0_316 = arith.constant 0 : index
    %c0_317 = arith.constant 0 : index
    %377 = vector.load %arg7[%c1_314, %c3_315, %c0_316, %c0_317] : memref<2x4x1x16xf32, #tpu.memory_space<vmem>>, vector<1x1x1x16xf32>
    %378 = vector.shape_cast %377 : vector<1x1x1x16xf32> to vector<1x16xf32>
    %379 = vector.broadcast %378 : vector<1x16xf32> to vector<5x16xf32>
    %380 = arith.addf %376, %379 : vector<5x16xf32>
    %c1_318 = arith.constant 1 : index
    %c3_319 = arith.constant 3 : index
    %c0_320 = arith.constant 0 : index
    %c0_321 = arith.constant 0 : index
    %381 = vector.load %arg8[%c1_318, %c3_319, %c0_320, %c0_321] : memref<2x4x64x16xf32, #tpu.memory_space<vmem>>, vector<1x1x64x16xf32>
    %382 = vector.shape_cast %381 : vector<1x1x64x16xf32> to vector<64x16xf32>
    %cst_322 = arith.constant dense<0.000000e+00> : vector<5x16xf32>
    %383 = tpu.matmul %263, %382, %cst_322 {dimension_numbers = #tpu.dot_dimension_numbers<[1], [0], [0], [1], [0, 0, 1, 1], [], []>} : vector<5x64xf32>, vector<64x16xf32>, vector<5x16xf32> -> vector<5x16xf32>
    %c1_323 = arith.constant 1 : index
    %c3_324 = arith.constant 3 : index
    %c0_325 = arith.constant 0 : index
    %c0_326 = arith.constant 0 : index
    %384 = vector.load %arg9[%c1_323, %c3_324, %c0_325, %c0_326] : memref<2x4x1x16xf32, #tpu.memory_space<vmem>>, vector<1x1x1x16xf32>
    %385 = vector.shape_cast %384 : vector<1x1x1x16xf32> to vector<1x16xf32>
    %386 = vector.broadcast %385 : vector<1x16xf32> to vector<5x16xf32>
    %387 = arith.addf %383, %386 : vector<5x16xf32>
    %c1_327 = arith.constant 1 : index
    %c3_328 = arith.constant 3 : index
    %c0_329 = arith.constant 0 : index
    %c0_330 = arith.constant 0 : index
    %388 = vector.load %arg10[%c1_327, %c3_328, %c0_329, %c0_330] : memref<2x4x64x16xf32, #tpu.memory_space<vmem>>, vector<1x1x64x16xf32>
    %389 = vector.shape_cast %388 : vector<1x1x64x16xf32> to vector<64x16xf32>
    %cst_331 = arith.constant dense<0.000000e+00> : vector<5x16xf32>
    %390 = tpu.matmul %263, %389, %cst_331 {dimension_numbers = #tpu.dot_dimension_numbers<[1], [0], [0], [1], [0, 0, 1, 1], [], []>} : vector<5x64xf32>, vector<64x16xf32>, vector<5x16xf32> -> vector<5x16xf32>
    %c1_332 = arith.constant 1 : index
    %c3_333 = arith.constant 3 : index
    %c0_334 = arith.constant 0 : index
    %c0_335 = arith.constant 0 : index
    %391 = vector.load %arg11[%c1_332, %c3_333, %c0_334, %c0_335] : memref<2x4x1x16xf32, #tpu.memory_space<vmem>>, vector<1x1x1x16xf32>
    %392 = vector.shape_cast %391 : vector<1x1x1x16xf32> to vector<1x16xf32>
    %393 = vector.broadcast %392 : vector<1x16xf32> to vector<5x16xf32>
    %394 = arith.addf %390, %393 : vector<5x16xf32>
    %cst_336 = arith.constant dense<0.000000e+00> : vector<5x5xf32>
    %395 = tpu.matmul %380, %387, %cst_336 {dimension_numbers = #tpu.dot_dimension_numbers<[1], [1], [0], [0], [0, 0, 1, 0], [], []>} : vector<5x16xf32>, vector<5x16xf32>, vector<5x5xf32> -> vector<5x5xf32>
    %cst_337 = arith.constant dense<0xFF800000> : vector<5xf32>
    %396 = vector.multi_reduction <maximumf>, %395, %cst_337 [1] : vector<5x5xf32> to vector<5xf32>
    %397 = vector.shape_cast %396 : vector<5xf32> to vector<5x1xf32>
    %398 = vector.broadcast %397 : vector<5x1xf32> to vector<5x5xf32>
    %399 = arith.subf %395, %398 : vector<5x5xf32>
    %400 = math.exp %399 : vector<5x5xf32>
    %cst_338 = arith.constant dense<0.000000e+00> : vector<5xf32>
    %401 = vector.multi_reduction <add>, %400, %cst_338 [1] : vector<5x5xf32> to vector<5xf32>
    %402 = vector.shape_cast %401 : vector<5xf32> to vector<5x1xf32>
    %403 = tpu.reciprocal %402 {approx = true} : vector<5x1xf32> -> vector<5x1xf32>
    %404 = vector.broadcast %403 : vector<5x1xf32> to vector<5x5xf32>
    %405 = arith.mulf %400, %404 : vector<5x5xf32>
    %cst_339 = arith.constant dense<0.000000e+00> : vector<5x16xf32>
    %406 = tpu.matmul %405, %394, %cst_339 {dimension_numbers = #tpu.dot_dimension_numbers<[1], [0], [0], [1], [0, 0, 1, 1], [], []>} : vector<5x5xf32>, vector<5x16xf32>, vector<5x16xf32> -> vector<5x16xf32>
    %c1_340 = arith.constant 1 : index
    %c3_341 = arith.constant 3 : index
    %c0_342 = arith.constant 0 : index
    %c0_343 = arith.constant 0 : index
    %407 = vector.load %arg12[%c1_340, %c3_341, %c0_342, %c0_343] : memref<2x4x16x64xf32, #tpu.memory_space<vmem>>, vector<1x1x16x64xf32>
    %408 = vector.shape_cast %407 : vector<1x1x16x64xf32> to vector<16x64xf32>
    %cst_344 = arith.constant dense<0.000000e+00> : vector<5x64xf32>
    %409 = tpu.matmul %406, %408, %cst_344 {dimension_numbers = #tpu.dot_dimension_numbers<[1], [0], [0], [1], [0, 0, 1, 1], [], []>} : vector<5x16xf32>, vector<16x64xf32>, vector<5x64xf32> -> vector<5x64xf32>
    %410 = arith.addf %373, %409 : vector<5x64xf32>
    %411 = arith.addf %237, %410 : vector<5x64xf32>
    %c1_345 = arith.constant 1 : index
    %c0_346 = arith.constant 0 : index
    %c0_347 = arith.constant 0 : index
    %412 = vector.load %arg13[%c1_345, %c0_346, %c0_347] : memref<2x1x64xf32, #tpu.memory_space<vmem>>, vector<1x1x64xf32>
    %413 = vector.shape_cast %412 : vector<1x1x64xf32> to vector<1x64xf32>
    %414 = vector.broadcast %413 : vector<1x64xf32> to vector<5x64xf32>
    %415 = arith.addf %411, %414 : vector<5x64xf32>
    %c1_348 = arith.constant 1 : index
    %c0_349 = arith.constant 0 : index
    %c0_350 = arith.constant 0 : index
    %416 = vector.load %arg14[%c1_348, %c0_349, %c0_350] : memref<2x1x64xf32, #tpu.memory_space<vmem>>, vector<1x1x64xf32>
    %417 = vector.shape_cast %416 : vector<1x1x64xf32> to vector<1x64xf32>
    %c1_351 = arith.constant 1 : index
    %c0_352 = arith.constant 0 : index
    %c0_353 = arith.constant 0 : index
    %418 = vector.load %arg15[%c1_351, %c0_352, %c0_353] : memref<2x1x64xf32, #tpu.memory_space<vmem>>, vector<1x1x64xf32>
    %419 = vector.shape_cast %418 : vector<1x1x64xf32> to vector<1x64xf32>
    %cst_354 = arith.constant dense<0.000000e+00> : vector<5xf32>
    %420 = vector.multi_reduction <add>, %415, %cst_354 [1] : vector<5x64xf32> to vector<5xf32>
    %421 = vector.shape_cast %420 : vector<5xf32> to vector<5x1xf32>
    %cst_355 = arith.constant 6.400000e+01 : f32
    %422 = vector.broadcast %cst_355 : f32 to vector<5x1xf32>
    %423 = arith.divf %421, %422 : vector<5x1xf32>
    %424 = vector.broadcast %423 : vector<5x1xf32> to vector<5x64xf32>
    %425 = arith.subf %415, %424 : vector<5x64xf32>
    %426 = arith.mulf %425, %425 : vector<5x64xf32>
    %cst_356 = arith.constant dense<0.000000e+00> : vector<5xf32>
    %427 = vector.multi_reduction <add>, %426, %cst_356 [1] : vector<5x64xf32> to vector<5xf32>
    %428 = vector.shape_cast %427 : vector<5xf32> to vector<5x1xf32>
    %cst_357 = arith.constant 6.400000e+01 : f32
    %429 = vector.broadcast %cst_357 : f32 to vector<5x1xf32>
    %430 = arith.divf %428, %429 : vector<5x1xf32>
    %431 = vector.broadcast %423 : vector<5x1xf32> to vector<5x64xf32>
    %432 = arith.subf %415, %431 : vector<5x64xf32>
    %cst_358 = arith.constant 9.99999996E-13 : f32
    %433 = vector.broadcast %cst_358 : f32 to vector<5x1xf32>
    %434 = arith.addf %430, %433 : vector<5x1xf32>
    %435 = math.rsqrt %434 : vector<5x1xf32>
    %436 = vector.broadcast %435 : vector<5x1xf32> to vector<5x64xf32>
    %437 = arith.mulf %432, %436 : vector<5x64xf32>
    %438 = vector.broadcast %417 : vector<1x64xf32> to vector<5x64xf32>
    %439 = arith.mulf %437, %438 : vector<5x64xf32>
    %440 = vector.broadcast %419 : vector<1x64xf32> to vector<5x64xf32>
    %441 = arith.addf %439, %440 : vector<5x64xf32>
    %c1_359 = arith.constant 1 : index
    %c0_360 = arith.constant 0 : index
    %c0_361 = arith.constant 0 : index
    %442 = vector.load %arg16[%c1_359, %c0_360, %c0_361] : memref<2x64x128xf32, #tpu.memory_space<vmem>>, vector<1x64x128xf32>
    %443 = vector.shape_cast %442 : vector<1x64x128xf32> to vector<64x128xf32>
    %cst_362 = arith.constant dense<0.000000e+00> : vector<5x128xf32>
    %444 = tpu.matmul %441, %443, %cst_362 {dimension_numbers = #tpu.dot_dimension_numbers<[1], [0], [0], [1], [0, 0, 1, 1], [], []>} : vector<5x64xf32>, vector<64x128xf32>, vector<5x128xf32> -> vector<5x128xf32>
    %c1_363 = arith.constant 1 : index
    %c0_364 = arith.constant 0 : index
    %c0_365 = arith.constant 0 : index
    %445 = vector.load %arg17[%c1_363, %c0_364, %c0_365] : memref<2x1x128xf32, #tpu.memory_space<vmem>>, vector<1x1x128xf32>
    %446 = vector.shape_cast %445 : vector<1x1x128xf32> to vector<1x128xf32>
    %447 = vector.broadcast %446 : vector<1x128xf32> to vector<5x128xf32>
    %448 = arith.addf %444, %447 : vector<5x128xf32>
    %cst_366 = arith.constant 5.000000e-01 : f32
    %449 = vector.broadcast %cst_366 : f32 to vector<5x128xf32>
    %450 = arith.mulf %449, %448 : vector<5x128xf32>
    %cst_367 = arith.constant 4.471500e-02 : f32
    %451 = vector.broadcast %cst_367 : f32 to vector<5x128xf32>
    %452 = arith.mulf %451, %448 : vector<5x128xf32>
    %453 = arith.mulf %452, %448 : vector<5x128xf32>
    %454 = arith.mulf %453, %448 : vector<5x128xf32>
    %455 = arith.addf %448, %454 : vector<5x128xf32>
    %cst_368 = arith.constant 0.797884583 : f32
    %456 = vector.broadcast %cst_368 : f32 to vector<5x128xf32>
    %457 = arith.mulf %456, %455 : vector<5x128xf32>
    %458 = math.tanh %457 : vector<5x128xf32>
    %cst_369 = arith.constant 1.000000e+00 : f32
    %459 = vector.broadcast %cst_369 : f32 to vector<5x128xf32>
    %460 = arith.addf %459, %458 : vector<5x128xf32>
    %461 = arith.mulf %450, %460 : vector<5x128xf32>
    %c1_370 = arith.constant 1 : index
    %c0_371 = arith.constant 0 : index
    %c0_372 = arith.constant 0 : index
    %462 = vector.load %arg18[%c1_370, %c0_371, %c0_372] : memref<2x128x64xf32, #tpu.memory_space<vmem>>, vector<1x128x64xf32>
    %463 = vector.shape_cast %462 : vector<1x128x64xf32> to vector<128x64xf32>
    %cst_373 = arith.constant dense<0.000000e+00> : vector<5x64xf32>
    %464 = tpu.matmul %461, %463, %cst_373 {dimension_numbers = #tpu.dot_dimension_numbers<[1], [0], [0], [1], [0, 0, 1, 1], [], []>} : vector<5x128xf32>, vector<128x64xf32>, vector<5x64xf32> -> vector<5x64xf32>
    %c1_374 = arith.constant 1 : index
    %c0_375 = arith.constant 0 : index
    %c0_376 = arith.constant 0 : index
    %465 = vector.load %arg19[%c1_374, %c0_375, %c0_376] : memref<2x1x64xf32, #tpu.memory_space<vmem>>, vector<1x1x64xf32>
    %466 = vector.shape_cast %465 : vector<1x1x64xf32> to vector<1x64xf32>
    %467 = vector.broadcast %466 : vector<1x64xf32> to vector<5x64xf32>
    %468 = arith.addf %464, %467 : vector<5x64xf32>
    %469 = arith.addf %415, %468 : vector<5x64xf32>
    %c0_377 = arith.constant 0 : index
    %c0_378 = arith.constant 0 : index
    %470 = vector.load %arg20[%c0_377, %c0_378] : memref<1x64xf32, #tpu.memory_space<vmem>>, vector<1x64xf32>
    %c0_379 = arith.constant 0 : index
    %c0_380 = arith.constant 0 : index
    %471 = vector.load %arg21[%c0_379, %c0_380] : memref<1x64xf32, #tpu.memory_space<vmem>>, vector<1x64xf32>
    %cst_381 = arith.constant dense<0.000000e+00> : vector<5xf32>
    %472 = vector.multi_reduction <add>, %469, %cst_381 [1] : vector<5x64xf32> to vector<5xf32>
    %473 = vector.shape_cast %472 : vector<5xf32> to vector<5x1xf32>
    %cst_382 = arith.constant 6.400000e+01 : f32
    %474 = vector.broadcast %cst_382 : f32 to vector<5x1xf32>
    %475 = arith.divf %473, %474 : vector<5x1xf32>
    %476 = vector.broadcast %475 : vector<5x1xf32> to vector<5x64xf32>
    %477 = arith.subf %469, %476 : vector<5x64xf32>
    %478 = arith.mulf %477, %477 : vector<5x64xf32>
    %cst_383 = arith.constant dense<0.000000e+00> : vector<5xf32>
    %479 = vector.multi_reduction <add>, %478, %cst_383 [1] : vector<5x64xf32> to vector<5xf32>
    %480 = vector.shape_cast %479 : vector<5xf32> to vector<5x1xf32>
    %cst_384 = arith.constant 6.400000e+01 : f32
    %481 = vector.broadcast %cst_384 : f32 to vector<5x1xf32>
    %482 = arith.divf %480, %481 : vector<5x1xf32>
    %483 = vector.broadcast %475 : vector<5x1xf32> to vector<5x64xf32>
    %484 = arith.subf %469, %483 : vector<5x64xf32>
    %cst_385 = arith.constant 9.99999996E-13 : f32
    %485 = vector.broadcast %cst_385 : f32 to vector<5x1xf32>
    %486 = arith.addf %482, %485 : vector<5x1xf32>
    %487 = math.rsqrt %486 : vector<5x1xf32>
    %488 = vector.broadcast %487 : vector<5x1xf32> to vector<5x64xf32>
    %489 = arith.mulf %484, %488 : vector<5x64xf32>
    %490 = vector.broadcast %470 : vector<1x64xf32> to vector<5x64xf32>
    %491 = arith.mulf %489, %490 : vector<5x64xf32>
    %492 = vector.broadcast %471 : vector<1x64xf32> to vector<5x64xf32>
    %493 = arith.addf %491, %492 : vector<5x64xf32>
    %cst_386 = arith.constant dense<0.000000e+00> : vector<64xf32>
    %494 = vector.multi_reduction <add>, %493, %cst_386 [0] : vector<5x64xf32> to vector<64xf32>
    %495 = vector.shape_cast %494 : vector<64xf32> to vector<1x64xf32>
    %cst_387 = arith.constant 5.000000e+00 : f32
    %496 = vector.broadcast %cst_387 : f32 to vector<1x64xf32>
    %497 = arith.divf %495, %496 : vector<1x64xf32>
    %c0_388 = arith.constant 0 : index
    %c0_389 = arith.constant 0 : index
    %498 = vector.load %arg22[%c0_388, %c0_389] : memref<64x128xf32, #tpu.memory_space<vmem>>, vector<64x128xf32>
    %cst_390 = arith.constant dense<0.000000e+00> : vector<1x128xf32>
    %499 = tpu.matmul %497, %498, %cst_390 {dimension_numbers = #tpu.dot_dimension_numbers<[1], [0], [0], [1], [0, 0, 1, 1], [], []>} : vector<1x64xf32>, vector<64x128xf32>, vector<1x128xf32> -> vector<1x128xf32>
    %c0_391 = arith.constant 0 : index
    %c0_392 = arith.constant 0 : index
    %500 = vector.load %arg23[%c0_391, %c0_392] : memref<1x128xf32, #tpu.memory_space<vmem>>, vector<1x128xf32>
    %501 = arith.addf %499, %500 : vector<1x128xf32>
    %c0_393 = arith.constant 0 : index
    %c0_394 = arith.constant 0 : index
    %c0_395 = arith.constant 0 : index
    %502 = vector.load %arg24[%c0_393, %c0_394, %c0_395] : memref<1x1x128xf32, #tpu.memory_space<vmem>>, vector<1x1x128xf32>
    %503 = vector.shape_cast %502 : vector<1x1x128xf32> to vector<1x128xf32>
    %504 = vector.shape_cast %501 : vector<1x128xf32> to vector<1x1x128xf32>
    tpu.vector_store %arg24[%c0_393, %c0_394, %c0_395], %504 {strides = array<i32>} : memref<1x1x128xf32, #tpu.memory_space<vmem>>, vector<1x1x128xf32>,
    return
  }
  func.func @transform_0(%arg0: i32) -> (i32, i32, i32) {
    %c0_i32 = arith.constant 0 : i32
    %c0_i32_0 = arith.constant 0 : i32
    %c0_i32_1 = arith.constant 0 : i32
    return %arg0, %c0_i32, %c0_i32_0 : i32, i32, i32
  }
  func.func @transform_1(%arg0: i32) -> (i32, i32) {
    %c0_i32 = arith.constant 0 : i32
    %c0_i32_0 = arith.constant 0 : i32
    %c0_i32_1 = arith.constant 0 : i32
    return %c0_i32, %c0_i32_0 : i32, i32
  }
  func.func @transform_2(%arg0: i32) -> (i32, i32) {
    %c0_i32 = arith.constant 0 : i32
    %c0_i32_0 = arith.constant 0 : i32
    %c0_i32_1 = arith.constant 0 : i32
    return %c0_i32, %c0_i32_0 : i32, i32
  }
  func.func @transform_3(%arg0: i32) -> (i32, i32, i32) {
    %c0_i32 = arith.constant 0 : i32
    %c0_i32_0 = arith.constant 0 : i32
    %c0_i32_1 = arith.constant 0 : i32
    %c0_i32_2 = arith.constant 0 : i32
    return %c0_i32, %c0_i32_0, %c0_i32_1 : i32, i32, i32
  }
  func.func @transform_4(%arg0: i32) -> (i32, i32, i32) {
    %c0_i32 = arith.constant 0 : i32
    %c0_i32_0 = arith.constant 0 : i32
    %c0_i32_1 = arith.constant 0 : i32
    %c0_i32_2 = arith.constant 0 : i32
    return %c0_i32, %c0_i32_0, %c0_i32_1 : i32, i32, i32
  }
  func.func @transform_5(%arg0: i32) -> (i32, i32, i32, i32) {
    %c0_i32 = arith.constant 0 : i32
    %c0_i32_0 = arith.constant 0 : i32
    %c0_i32_1 = arith.constant 0 : i32
    %c0_i32_2 = arith.constant 0 : i32
    %c0_i32_3 = arith.constant 0 : i32
    return %c0_i32, %c0_i32_0, %c0_i32_1, %c0_i32_2 : i32, i32, i32, i32
  }
  func.func @transform_6(%arg0: i32) -> (i32, i32, i32, i32) {
    %c0_i32 = arith.constant 0 : i32
    %c0_i32_0 = arith.constant 0 : i32
    %c0_i32_1 = arith.constant 0 : i32
    %c0_i32_2 = arith.constant 0 : i32
    %c0_i32_3 = arith.constant 0 : i32
    return %c0_i32, %c0_i32_0, %c0_i32_1, %c0_i32_2 : i32, i32, i32, i32
  }
  func.func @transform_7(%arg0: i32) -> (i32, i32, i32, i32) {
    %c0_i32 = arith.constant 0 : i32
    %c0_i32_0 = arith.constant 0 : i32
    %c0_i32_1 = arith.constant 0 : i32
    %c0_i32_2 = arith.constant 0 : i32
    %c0_i32_3 = arith.constant 0 : i32
    return %c0_i32, %c0_i32_0, %c0_i32_1, %c0_i32_2 : i32, i32, i32, i32
  }
  func.func @transform_8(%arg0: i32) -> (i32, i32, i32, i32) {
    %c0_i32 = arith.constant 0 : i32
    %c0_i32_0 = arith.constant 0 : i32
    %c0_i32_1 = arith.constant 0 : i32
    %c0_i32_2 = arith.constant 0 : i32
    %c0_i32_3 = arith.constant 0 : i32
    return %c0_i32, %c0_i32_0, %c0_i32_1, %c0_i32_2 : i32, i32, i32, i32
  }
  func.func @transform_9(%arg0: i32) -> (i32, i32, i32, i32) {
    %c0_i32 = arith.constant 0 : i32
    %c0_i32_0 = arith.constant 0 : i32
    %c0_i32_1 = arith.constant 0 : i32
    %c0_i32_2 = arith.constant 0 : i32
    %c0_i32_3 = arith.constant 0 : i32
    return %c0_i32, %c0_i32_0, %c0_i32_1, %c0_i32_2 : i32, i32, i32, i32
  }
  func.func @transform_10(%arg0: i32) -> (i32, i32, i32, i32) {
    %c0_i32 = arith.constant 0 : i32
    %c0_i32_0 = arith.constant 0 : i32
    %c0_i32_1 = arith.constant 0 : i32
    %c0_i32_2 = arith.constant 0 : i32
    %c0_i32_3 = arith.constant 0 : i32
    return %c0_i32, %c0_i32_0, %c0_i32_1, %c0_i32_2 : i32, i32, i32, i32
  }
  func.func @transform_11(%arg0: i32) -> (i32, i32, i32, i32) {
    %c0_i32 = arith.constant 0 : i32
    %c0_i32_0 = arith.constant 0 : i32
    %c0_i32_1 = arith.constant 0 : i32
    %c0_i32_2 = arith.constant 0 : i32
    %c0_i32_3 = arith.constant 0 : i32
    return %c0_i32, %c0_i32_0, %c0_i32_1, %c0_i32_2 : i32, i32, i32, i32
  }
  func.func @transform_12(%arg0: i32) -> (i32, i32, i32) {
    %c0_i32 = arith.constant 0 : i32
    %c0_i32_0 = arith.constant 0 : i32
    %c0_i32_1 = arith.constant 0 : i32
    %c0_i32_2 = arith.constant 0 : i32
    return %c0_i32, %c0_i32_0, %c0_i32_1 : i32, i32, i32
  }
  func.func @transform_13(%arg0: i32) -> (i32, i32, i32) {
    %c0_i32 = arith.constant 0 : i32
    %c0_i32_0 = arith.constant 0 : i32
    %c0_i32_1 = arith.constant 0 : i32
    %c0_i32_2 = arith.constant 0 : i32
    return %c0_i32, %c0_i32_0, %c0_i32_1 : i32, i32, i32
  }
  func.func @transform_14(%arg0: i32) -> (i32, i32, i32) {
    %c0_i32 = arith.constant 0 : i32
    %c0_i32_0 = arith.constant 0 : i32
    %c0_i32_1 = arith.constant 0 : i32
    %c0_i32_2 = arith.constant 0 : i32
    return %c0_i32, %c0_i32_0, %c0_i32_1 : i32, i32, i32
  }
  func.func @transform_15(%arg0: i32) -> (i32, i32, i32) {
    %c0_i32 = arith.constant 0 : i32
    %c0_i32_0 = arith.constant 0 : i32
    %c0_i32_1 = arith.constant 0 : i32
    %c0_i32_2 = arith.constant 0 : i32
    return %c0_i32, %c0_i32_0, %c0_i32_1 : i32, i32, i32
  }
  func.func @transform_16(%arg0: i32) -> (i32, i32, i32) {
    %c0_i32 = arith.constant 0 : i32
    %c0_i32_0 = arith.constant 0 : i32
    %c0_i32_1 = arith.constant 0 : i32
    %c0_i32_2 = arith.constant 0 : i32
    return %c0_i32, %c0_i32_0, %c0_i32_1 : i32, i32, i32
  }
  func.func @transform_17(%arg0: i32) -> (i32, i32, i32) {
    %c0_i32 = arith.constant 0 : i32
    %c0_i32_0 = arith.constant 0 : i32
    %c0_i32_1 = arith.constant 0 : i32
    %c0_i32_2 = arith.constant 0 : i32
    return %c0_i32, %c0_i32_0, %c0_i32_1 : i32, i32, i32
  }
  func.func @transform_18(%arg0: i32) -> (i32, i32, i32) {
    %c0_i32 = arith.constant 0 : i32
    %c0_i32_0 = arith.constant 0 : i32
    %c0_i32_1 = arith.constant 0 : i32
    %c0_i32_2 = arith.constant 0 : i32
    return %c0_i32, %c0_i32_0, %c0_i32_1 : i32, i32, i32
  }
  func.func @transform_19(%arg0: i32) -> (i32, i32) {
    %c0_i32 = arith.constant 0 : i32
    %c0_i32_0 = arith.constant 0 : i32
    %c0_i32_1 = arith.constant 0 : i32
    return %c0_i32, %c0_i32_0 : i32, i32
  }
  func.func @transform_20(%arg0: i32) -> (i32, i32) {
    %c0_i32 = arith.constant 0 : i32
    %c0_i32_0 = arith.constant 0 : i32
    %c0_i32_1 = arith.constant 0 : i32
    return %c0_i32, %c0_i32_0 : i32, i32
  }
  func.func @transform_21(%arg0: i32) -> (i32, i32) {
    %c0_i32 = arith.constant 0 : i32
    %c0_i32_0 = arith.constant 0 : i32
    %c0_i32_1 = arith.constant 0 : i32
    return %c0_i32, %c0_i32_0 : i32, i32
  }
  func.func @transform_22(%arg0: i32) -> (i32, i32) {
    %c0_i32 = arith.constant 0 : i32
    %c0_i32_0 = arith.constant 0 : i32
    %c0_i32_1 = arith.constant 0 : i32
    return %c0_i32, %c0_i32_0 : i32, i32
  }
  func.func @transform_23(%arg0: i32) -> (i32, i32, i32) {
    %c0_i32 = arith.constant 0 : i32
    %c0_i32_0 = arith.constant 0 : i32
    %c0_i32_1 = arith.constant 0 : i32
    return %arg0, %c0_i32, %c0_i32_0 : i32, i32, i32
  }
}

</mosaic_0001>

<bundles_post_ra>
// kernel: vit_forward.1
= control target key start
LH: loop header
LB: loop body
LE: loop exit
PB: predicated region body
PF: predicated region fallthrough
CT: control target
= control target key end

     0   :  { %s9750_s0 = inlined_call_operand.vmem [shape: f32[2,5,768], index: 0, kind: input, shape index: {}]   ;;  %s9751_s1 = inlined_call_operand.vmem [shape: f32[768,64], index: 1, kind: input, shape index: {}]   ;;  %s9752_s2 = inlined_call_operand.vmem [shape: f32[5,64], index: 2, kind: input, shape index: {}]   ;;  %s9753_s3 = inlined_call_operand.vmem [shape: f32[2,1,64], index: 3, kind: input, shape index: {}]   ;;  %s9754_s4 = inlined_call_operand.vmem [shape: f32[2,1,64], index: 4, kind: input, shape index: {}]   ;;  %s9755_s5 = inlined_call_operand.vmem [shape: f32[2,4,64,16], index: 5, kind: input, shape index: {}]   ;;  %s9756_s6 = inlined_call_operand.vmem [shape: f32[2,4,1,16], index: 6, kind: input, shape index: {}]   ;;  %s9757_s7 = inlined_call_operand.vmem [shape: f32[2,4,64,16], index: 7, kind: input, shape index: {}]   ;;  %s9758_s8 = inlined_call_operand.vmem [shape: f32[2,4,1,16], index: 8, kind: input, shape index: {}]   ;;  %s9759_s9 = inlined_call_operand.vmem [shape: f32[2,4,64,16], index: 9, kind: input, shape index: {}]   ;;  %s9760_s10 = inlined_call_operand.vmem [shape: f32[2,4,1,16], index: 10, kind: input, shape index: {}]   ;;  %s9761_s11 = inlined_call_operand.vmem [shape: f32[2,4,16,64], index: 11, kind: input, shape index: {}]   ;;  %s9762_s12 = inlined_call_operand.vmem [shape: f32[2,1,64], index: 12, kind: input, shape index: {}]   ;;  %s9763_s13 = inlined_call_operand.vmem [shape: f32[2,1,64], index: 13, kind: input, shape index: {}]   ;;  %s9764_s14 = inlined_call_operand.vmem [shape: f32[2,1,64], index: 14, kind: input, shape index: {}]   ;;  %s9765_s15 = inlined_call_operand.vmem [shape: f32[2,64,128], index: 15, kind: input, shape index: {}]   ;;  %s9766_s16 = inlined_call_operand.vmem [shape: f32[2,1,128], index: 16, kind: input, shape index: {}]   ;;  %s9767_s17 = inlined_call_operand.vmem [shape: f32[2,128,64], index: 17, kind: input, shape index: {}]   ;;  %s9768_s18 = inlined_call_operand.vmem [shape: f32[2,1,64], index: 18, kind: input, shape index: {}]   ;;  %s9769_s19 = inlined_call_operand.vmem [shape: f32[1,64], index: 19, kind: input, shape index: {}]   ;;  %s9770_s20 = inlined_call_operand.vmem [shape: f32[1,64], index: 20, kind: input, shape index: {}]   ;;  %s9771_s21 = inlined_call_operand.vmem [shape: f32[64,128], index: 21, kind: input, shape index: {}]   ;;  %s9772_s22 = inlined_call_operand.vmem [shape: f32[1,128], index: 22, kind: input, shape index: {}]   ;;  %s9773_s23 = inlined_call_operand.hbm [shape: f32[2,1,128], index: 23, kind: output, shape index: {}]  }
   0x1   :  { %9792 = sst [smem:[#allocation12_spill]] %s9750_s0 }
   0x2   :  { %9793 = sst [smem:[#allocation13_spill]] %s9751_s1 }
   0x3   :  { %9794 = sst [smem:[#allocation14_spill]] %s9752_s2 }
   0x4   :  { %9795 = sst [smem:[#allocation15_spill]] %s9753_s3 }
   0x5   :  { %9796 = sst [smem:[#allocation16_spill]] %s9754_s4 }
   0x6   :  { %9797 = sst [smem:[#allocation17_spill]] %s9755_s5 }
   0x7   :  { %9798 = sst [smem:[#allocation18_spill]] %s9756_s6 }
   0x8   :  { %9799 = sst [smem:[#allocation19_spill]] %s9757_s7 }
   0x9   :  { %9800 = sst [smem:[#allocation20_spill]] %s9758_s8 }
   0xa   :  { %9801 = sst [smem:[#allocation21_spill]] %s9772_s22 }
   0xb   :  { %9802 = sst [smem:[#allocation22_spill]] %s9773_s23 }
   0xc   :  { %28 = vsyncpa [#allocation3], 0 }
   0xd   :  { %30 = vsyncpa [#allocation3 + $0x1], 0  ;;  %s8020_s4 = smov 0   ;;  %s8022_s30 = smov 0  }
   0xe   :  { %s8024_s24 = smov 0   ;;  %s8026_s25 = smov 0  }
   0xf LB: > { %9803 = sst [smem:[#allocation5_spill]] %s7882_s4  ;;  %s8041_s5 = sadd.s32 4294967295, %s7894_s25   ;;  %s7894_s25 = sphi %s8026_s25, %s9829_s25   ;;  %s7890_s24 = sphi %s8024_s24, %s9831_s24   ;;  %s7886_s30 = sphi %s8022_s30, %s9833_s30   ;;  %s7882_s4 = sphi %s8020_s4, %s9832_s4  }
  0x10   : > { %9804 = sst [smem:[#allocation6_spill]] %s7890_s24  ;;  %s5745_s1 = sadd.s32 4294967294, %s7894_s25  }
  0x11   : > { %9805 = sst [smem:[#allocation7_spill]] %s7894_s25  ;;  %s8045_s26 = sadd.s32 1, %s7894_s25  }
  0x12   : > { %9806 = sst [smem:[#allocation8_spill]] %s8045_s26  ;;  %s531_s2 = sadd.s32 1, %s7890_s24 }
  0x13   : > { %s528_s6 = ssub.s32 %s7894_s25, %s8045_s26  ;;  %p541_p0 = scmp.ne.s32.totalorder %s7890_s24, %s7886_s30 }
  0x14   : > { %p529_p1 = scmp.eq.s32.totalorder %s528_s6, 0  ;;  %p542_p2 = scmp.eq.s32.totalorder %s8041_s5, 1 }
  0x15   : > { %p547_p3 = scmp.ne.s32.totalorder %s7886_s30, %s7882_s4  ;;  %p548_p4 = scmp.eq.s32.totalorder %s5745_s1, 1 }
  0x16   : > { %s8056_s27 = scalar_select %p529_p1, %s7890_s24, %s531_s2  }
  0x17   : > { %p8058_p5 = por %p542_p2, %p541_p0  ;;  %p8062_p6 = por %p548_p4, %p547_p3 }
  0x18   : > { %9807 = sst [smem:[#allocation9_spill]] %s8056_s27  ;;  %p5748_p7 = scmp.ge.s32.totalorder %s7894_s25, 1 }
  0x19   : > { %s9808_s7 = scalar_select %p8058_p5, 1, 0 }
  0x1a   : > { %s9810_s28 = scalar_select %p8062_p6, 1, 0 }
  0x1b   : > { %9809 = sst [smem:[#allocation10_spill]] %s9808_s7  ;;  %p640_p8 = scmp.lt.s32.totalorder %s7894_s25, 3 }
  0x1c   : > { %9811 = sst [smem:[#allocation11_spill]] %s9810_s28 }
  0x1d   : > { %p641_p9 = pnand %p5748_p7, %p640_p8 }
  0x1e   : > { %s9812_s0 = sld [smem:[#allocation13_spill]] (!%p641_p9)  ;;  %p703_p10 = scmp.lt.s32.totalorder (!%p641_p9), %s8041_s5, 1  ;;  %vm1023_vm0 = vcmask (!%p641_p9), 520192   ;;  %vm7897_vm1 = vmmov (!%p641_p9), 0   ;;  %vm1067_vm2 = vcmask (!%p641_p9), 523264   ;;  %vm1311_vm3 = vcmask (!%p641_p9), 130048  }
  0x1f   : > { %644 = sbr.rel (%p641_p9) target bundleno = 10810 (0x2a3a), region = 112  ;;  %s9813_s29 = sld [smem:[#allocation12_spill]] (!%p641_p9)  ;;  %vm1404_vm4 = vcmask (!%p641_p9), 1044480   ;;  %vm1388_vm5 = vcmask (!%p641_p9), 36864   ;;  %vm1400_vm6 = vcmask (!%p641_p9), 39936  }
  0x20   : > { %s9814_s1 = sld [smem:[#allocation14_spill]] (!%p641_p9)  ;;  %s9815_s4 = sld [smem:[#allocation17_spill]] (!%p641_p9) }
  0x21   : > { %s9820_s6 = sld [smem:[#allocation16_spill]] (!%p641_p9)  ;;  %s9821_s8 = sld [smem:[#allocation20_spill]] (!%p641_p9) }
  0x22   : > { %s701_s25 = sand.u32 (!%p641_p9), 1, %s7886_s30   ;;  %s9824_s7 = sld [smem:[#allocation21_spill]] (!%p641_p9) }
  0x23   : > { %s6091_s2 = sshll.u32 (!%p641_p9), %s8041_s5, 4 }
  0x24   : > { %v730_v0 = vld [vmem:[%s9812_s0 + $0x80] sm:$0xff] (!%p641_p9)  ;;  %v731_v1 = vld [vmem:[%s9812_s0 + $0x88] sm:$0xff] (!%p641_p9)  ;;  %v732_v11 = vld [vmem:[%s9812_s0 + $0x90] sm:$0xff] (!%p641_p9) }
  0x25   : > { %v714_v2 = vld [vmem:[%s9812_s0] sm:$0xff] (!%p641_p9)  ;;  %v7251_v3 = vpack.c.bf16 (!%p641_p9), %v731_v1, %v730_v0  ;;  %v715_v4 = vld [vmem:[%s9812_s0 + $0x8] sm:$0xff] (!%p641_p9)  ;;  %v733_v13 = vld [vmem:[%s9812_s0 + $0x98] sm:$0xff] (!%p641_p9) }
  0x26   : > { %v762_v5 = vld [vmem:[%s9812_s0 + $0x180] sm:$0xff]  ;;  %v763_v6 = vld [vmem:[%s9812_s0 + $0x188] sm:$0xff]  ;;  %v7253_v7 = vpack.c.bf16 %v715_v4, %v714_v2  ;;  %v716_v14 = vld [vmem:[%s9812_s0 + $0x10] sm:$0xff]  ;;  %v7255_v16 = vpack.c.bf16 %v733_v13, %v732_v11  ;;  %s8162_s24 = scalar_select %p703_p10, %s8041_s5, 1 }
  0x27   : > { %v7283_v8 = vpack.c.bf16 %v763_v6, %v762_v5  ;;  %v746_v9 = vld [vmem:[%s9812_s0 + $0x100] sm:$0xff]  ;;  %v747_v10 = vld [vmem:[%s9812_s0 + $0x108] sm:$0xff]  ;;  %7252 = vmatprep.subr.bf16.mxu0 %v7251_v3  ;;  %v717_v15 = vld [vmem:[%s9812_s0 + $0x18] sm:$0xff]  ;;  %s9816_s28 = smov %s9815_s4  ;;  %s7899_s5 = smov [#allocation2]  }
  0x28   : > { %v7285_v12 = vpack.c.bf16 %v747_v10, %v746_v9  ;;  %7254 = vmatpush3.bf16.msra.mxu0 %v7253_v7  ;;  %v7257_v17 = vpack.c.bf16 %v717_v15, %v716_v14  ;;  %v764_v18 = vld [vmem:[%s9812_s0 + $0x190] sm:$0xff]  ;;  %v765_v19 = vld [vmem:[%s9812_s0 + $0x198] sm:$0xff]  ;;  %v734_v23 = vld [vmem:[%s9812_s0 + $0xa0] sm:$0xff]  ;;  %s7743_s27 = smul.u32 48, %s8162_s24  ;;  %s702_s24 = scalar_lea.vmem [#allocation2], %s701_s25 }
  0x29   : > { %7284 = vmatprep.subr.bf16.mxu1 %v7283_v8  ;;  %v748_v20 = vld [vmem:[%s9812_s0 + $0x110] sm:$0xff]  ;;  %v7287_v21 = vpack.c.bf16 %v765_v19, %v764_v18  ;;  %v749_v22 = vld [vmem:[%s9812_s0 + $0x118] sm:$0xff]  ;;  %v735_v24 = vld [vmem:[%s9812_s0 + $0xa8] sm:$0xff]  ;;  %7256 = vmatprep.subr.bf16.mxu0 %v7255_v16  ;;  %s5690_s23 = sshll.u32 %s702_s24, 4  ;;  %s7836_s22 = sshll.u32 %s7899_s5, 4  ;;  %s9710_s23 = int_to_ptr.vmem [resolvable:$true] %s5690_s23  ;;  %s7837_s22 = int_to_ptr.vmem [resolvable:$false] %s7836_s22 }
  0x2a   : > { %7286 = vmatpush3.bf16.msra.mxu1 %v7285_v12  ;;  %v7289_v25 = vpack.c.bf16 %v749_v22, %v748_v20  ;;  %v7259_v26 = vpack.c.bf16 %v735_v24, %v734_v23  ;;  %v718_v27 = vld [vmem:[%s9812_s0 + $0x20] sm:$0xff]  ;;  %v719_v28 = vld [vmem:[%s9812_s0 + $0x28] sm:$0xff]  ;;  %v736_v35 = vld [vmem:[%s9812_s0 + $0xb0] sm:$0xff]  ;;  %s8219_s3 = scalar_lea.vmem %s9813_s29, %s7743_s27  ;;  %s9822_s29 = sld [smem:[#allocation18_spill]] }
  0x2b   : > { %v766_v29 = vld [vmem:[%s9812_s0 + $0x1a0] sm:$0xff]  ;;  %7288 = vmatprep.subr.bf16.mxu1 %v7287_v21  ;;  %v767_v30 = vld [vmem:[%s9812_s0 + $0x1a8] sm:$0xff]  ;;  %v7261_v33 = vpack.c.bf16 %v719_v28, %v718_v27  ;;  %v737_v36 = vld [vmem:[%s9812_s0 + $0xb8] sm:$0xff]  ;;  %p7839_p0 = scmp.lt.s32.totalorder %s9710_s23, %s7837_s22 }
  0x2c   : > { %v750_v31 = vld [vmem:[%s9812_s0 + $0x120] sm:$0xff]  ;;  %v751_v32 = vld [vmem:[%s9812_s0 + $0x128] sm:$0xff]  ;;  %7258 = vmatpush3.bf16.msra.mxu0 %v7257_v17  ;;  %v7291_v34 = vpack.c.bf16 %v767_v30, %v766_v29  ;;  %v720_v37 = vld [vmem:[%s9812_s0 + $0x30] sm:$0xff]  ;;  %v7263_v39 = vpack.c.bf16 %v737_v36, %v736_v35 }
  0x2d   : > { %7260 = vmatprep.subr.bf16.mxu0 %v7259_v26  ;;  %v7293_v38 = vpack.c.bf16 %v751_v32, %v750_v31  ;;  %v721_v40 = vld [vmem:[%s9812_s0 + $0x38] sm:$0xff]  ;;  %v768_v41 = vld [vmem:[%s9812_s0 + $0x1b0] sm:$0xff]  ;;  %v738_v46 = vld [vmem:[%s9812_s0 + $0xc0] sm:$0xff] }
  0x2e   : > { %7290 = vmatpush3.bf16.msra.mxu1 %v7289_v25  ;;  %v769_v42 = vld [vmem:[%s9812_s0 + $0x1b8] sm:$0xff]  ;;  %v752_v44 = vld [vmem:[%s9812_s0 + $0x130] sm:$0xff]  ;;  %v739_v47 = vld [vmem:[%s9812_s0 + $0xc8] sm:$0xff]  ;;  %v7265_v48 = vpack.c.bf16 %v721_v40, %v720_v37 }
  0x2f   : > { %7292 = vmatprep.subr.bf16.mxu1 %v7291_v34  ;;  %v7295_v43 = vpack.c.bf16 %v769_v42, %v768_v41  ;;  %v753_v45 = vld [vmem:[%s9812_s0 + $0x138] sm:$0xff]  ;;  %v770_v49 = vld [vmem:[%s9812_s0 + $0x1c0] sm:$0xff]  ;;  %v771_v50 = vld [vmem:[%s9812_s0 + $0x1c8] sm:$0xff]  ;;  %v7267_v52 = vpack.c.bf16 %v739_v47, %v738_v46 }
  0x30   : > { %7262 = vmatpush3.bf16.msra.mxu0 %v7261_v33  ;;  %v7297_v51 = vpack.c.bf16 %v753_v45, %v752_v44  ;;  %v722_v53 = vld [vmem:[%s9812_s0 + $0x40] sm:$0xff]  ;;  %v723_v54 = vld [vmem:[%s9812_s0 + $0x48] sm:$0xff]  ;;  %v7299_v56 = vpack.c.bf16 %v771_v50, %v770_v49  ;;  %v740_v58 = vld [vmem:[%s9812_s0 + $0xd0] sm:$0xff] }
  0x31   : > { %7264 = vmatprep.subr.bf16.mxu0 %v7263_v39  ;;  %v754_v55 = vld [vmem:[%s9812_s0 + $0x140] sm:$0xff]  ;;  %v755_v57 = vld [vmem:[%s9812_s0 + $0x148] sm:$0xff]  ;;  %v741_v59 = vld [vmem:[%s9812_s0 + $0xd8] sm:$0xff]  ;;  %v7269_v62 = vpack.c.bf16 %v723_v54, %v722_v53 }
  0x32   : > { %7294 = vmatpush3.bf16.msra.mxu1 %v7293_v38  ;;  %v772_v60 = vld [vmem:[%s9812_s0 + $0x1d0] sm:$0xff]  ;;  %v773_v61 = vld [vmem:[%s9812_s0 + $0x1d8] sm:$0xff]  ;;  %v7301_v63 = vpack.c.bf16 %v755_v57, %v754_v55  ;;  %v7271_v0 = vpack.c.bf16 %v741_v59, %v740_v58  ;;  %v742_v6 = vld [vmem:[%s9812_s0 + $0xe0] sm:$0xff] }
  0x33   : > { %7296 = vmatprep.subr.bf16.mxu1 %v7295_v43  ;;  %v724_v1 = vld [vmem:[%s9812_s0 + $0x50] sm:$0xff]  ;;  %v725_v2 = vld [vmem:[%s9812_s0 + $0x58] sm:$0xff]  ;;  %v7303_v4 = vpack.c.bf16 %v773_v61, %v772_v60  ;;  %v743_v7 = vld [vmem:[%s9812_s0 + $0xe8] sm:$0xff] }
  0x34   : > { %7266 = vmatpush3.bf16.msra.mxu0 %v7265_v48  ;;  %v756_v3 = vld [vmem:[%s9812_s0 + $0x150] sm:$0xff]  ;;  %v757_v5 = vld [vmem:[%s9812_s0 + $0x158] sm:$0xff]  ;;  %v774_v8 = vld [vmem:[%s9812_s0 + $0x1e0] sm:$0xff]  ;;  %v7273_v10 = vpack.c.bf16 %v725_v2, %v724_v1  ;;  %v7275_v14 = vpack.c.bf16 %v743_v7, %v742_v6 }
  0x35   : > { %7268 = vmatprep.subr.bf16.mxu0 %v7267_v52  ;;  %v775_v9 = vld [vmem:[%s9812_s0 + $0x1e8] sm:$0xff]  ;;  %v726_v11 = vld [vmem:[%s9812_s0 + $0x60] sm:$0xff]  ;;  %v7305_v13 = vpack.c.bf16 %v757_v5, %v756_v3  ;;  %v744_v19 = vld [vmem:[%s9812_s0 + $0xf0] sm:$0xff] }
  0x36   : > { %7298 = vmatpush3.bf16.msra.mxu1 %v7297_v51  ;;  %v709_v12 = vld [vmem:[%s8219_s3 + $0x8] sm:$0x1f]  ;;  %v758_v16 = vld [vmem:[%s9812_s0 + $0x160] sm:$0xff]  ;;  %v7307_v18 = vpack.c.bf16 %v775_v9, %v774_v8  ;;  %v745_v20 = vld [vmem:[%s9812_s0 + $0xf8] sm:$0xff] }
  0x37   : > { %7300 = vmatprep.subr.bf16.mxu1 %v7299_v56  ;;  %v727_v15 = vld [vmem:[%s9812_s0 + $0x68] sm:$0xff]  ;;  %875 = vmatprep.mubr.f32.mxu0 %v709_v12  ;;  %v711_v21 = vld [vmem:[%s8219_s3 + $0x18] sm:$0x1f]  ;;  %v776_v22 = vld [vmem:[%s9812_s0 + $0x1f0] sm:$0xff]  ;;  %v7279_v26 = vpack.c.bf16 %v745_v20, %v744_v19 }
  0x38   : > { %7270 = vmatpush3.bf16.msra.mxu0 %v7269_v62  ;;  %v759_v17 = vld [vmem:[%s9812_s0 + $0x168] sm:$0xff]  ;;  %v777_v23 = vld [vmem:[%s9812_s0 + $0x1f8] sm:$0xff]  ;;  %945 = vmatprep.mubr.f32.mxu1 %v711_v21  ;;  %v7277_v24 = vpack.c.bf16 %v727_v15, %v726_v11  ;;  %v728_v27 = vld [vmem:[%s9812_s0 + $0x70] sm:$0xff] }
  0x39   : > { %7272 = vmatprep.subr.bf16.mxu0 %v7271_v0  ;;  %v7309_v25 = vpack.c.bf16 %v759_v17, %v758_v16  ;;  %v729_v28 = vld [vmem:[%s9812_s0 + $0x78] sm:$0xff]  ;;  %v760_v29 = vld [vmem:[%s9812_s0 + $0x170] sm:$0xff]  ;;  %v7311_v30 = vpack.c.bf16 %v777_v23, %v776_v22  ;;  %v794_v32 = vld [vmem:[%s9812_s0 + $0x280] sm:$0xff] }
  0x3a   : > { %7302 = vmatpush3.bf16.msra.mxu1 %v7301_v63  ;;  %v761_v31 = vld [vmem:[%s9812_s0 + $0x178] sm:$0xff]  ;;  %v795_v33 = vld [vmem:[%s9812_s0 + $0x288] sm:$0xff]  ;;  %v7281_v34 = vpack.c.bf16 %v729_v28, %v728_v27  ;;  %v778_v37 = vld [vmem:[%s9812_s0 + $0x200] sm:$0xff] }
  0x3b   : > { %7304 = vmatprep.subr.bf16.mxu1 %v7303_v4  ;;  %v7313_v35 = vpack.c.bf16 %v761_v31, %v760_v29  ;;  %v7315_v36 = vpack.c.bf16 %v795_v33, %v794_v32  ;;  %v779_v38 = vld [vmem:[%s9812_s0 + $0x208] sm:$0xff]  ;;  %v796_v39 = vld [vmem:[%s9812_s0 + $0x290] sm:$0xff]  ;;  %v797_v40 = vld [vmem:[%s9812_s0 + $0x298] sm:$0xff] }
  0x3c   : > { %7274 = vmatpush3.bf16.msra.mxu0 %v7273_v10  ;;  %v708_v41 = vld [vmem:[%s8219_s3] sm:$0x1f]  ;;  %v7317_v42 = vpack.c.bf16 %v779_v38, %v778_v37  ;;  %v710_v43 = vld [vmem:[%s8219_s3 + $0x10] sm:$0x1f]  ;;  %v7319_v44 = vpack.c.bf16 %v797_v40, %v796_v39  ;;  %v781_v46 = vld [vmem:[%s9812_s0 + $0x218] sm:$0xff] }
  0x3d   : > { %7276 = vmatprep.subr.bf16.mxu0 %v7275_v14  ;;  %v780_v45 = vld [vmem:[%s9812_s0 + $0x210] sm:$0xff]  ;;  %v798_v47 = vld [vmem:[%s9812_s0 + $0x2a0] sm:$0xff]  ;;  %v799_v48 = vld [vmem:[%s9812_s0 + $0x2a8] sm:$0xff] }
  0x3e   : > { %7306 = vmatpush3.bf16.msra.mxu1 %v7305_v13  ;;  %v713_v49 = vld [vmem:[%s8219_s3 + $0x28] sm:$0x1f]  ;;  %v7321_v50 = vpack.c.bf16 %v781_v46, %v780_v45  ;;  %v7323_v51 = vpack.c.bf16 %v799_v48, %v798_v47  ;;  %v782_v52 = vld [vmem:[%s9812_s0 + $0x220] sm:$0xff]  ;;  %v800_v54 = vld [vmem:[%s9812_s0 + $0x2b0] sm:$0xff]  ;;  %v7896_v46 = vmov 0.0|0.0  }
  0x3f   : > { %7308 = vmatprep.subr.bf16.mxu1 %v7307_v18  ;;  %v783_v53 = vld [vmem:[%s9812_s0 + $0x228] sm:$0xff]  ;;  %v801_v55 = vld [vmem:[%s9812_s0 + $0x2b8] sm:$0xff]  ;;  %v784_v58 = vld [vmem:[%s9812_s0 + $0x230] sm:$0xff] }
  0x40   : > { %7278 = vmatpush3.bf16.msra.mxu0 %v7277_v24  ;;  %v7325_v56 = vpack.c.bf16 %v783_v53, %v782_v52  ;;  %v7327_v57 = vpack.c.bf16 %v801_v55, %v800_v54  ;;  %v785_v59 = vld [vmem:[%s9812_s0 + $0x238] sm:$0xff]  ;;  %v802_v60 = vld [vmem:[%s9812_s0 + $0x2c0] sm:$0xff]  ;;  %v803_v61 = vld [vmem:[%s9812_s0 + $0x2c8] sm:$0xff] }
  0x41   : > { %7280 = vmatprep.subr.bf16.mxu0 %v7279_v26  ;;  %v7329_v62 = vpack.c.bf16 %v785_v59, %v784_v58  ;;  %v7331_v63 = vpack.c.bf16 %v803_v61, %v802_v60  ;;  %v786_v0 = vld [vmem:[%s9812_s0 + $0x240] sm:$0xff]  ;;  %v787_v1 = vld [vmem:[%s9812_s0 + $0x248] sm:$0xff]  ;;  %v804_v2 = vld [vmem:[%s9812_s0 + $0x2d0] sm:$0xff] }
  0x42   : > { %7310 = vmatpush3.bf16.msra.mxu1 %v7309_v25  ;;  %v805_v3 = vld [vmem:[%s9812_s0 + $0x2d8] sm:$0xff]  ;;  %v7333_v4 = vpack.c.bf16 %v787_v1, %v786_v0  ;;  %v788_v6 = vld [vmem:[%s9812_s0 + $0x250] sm:$0xff]  ;;  %v806_v8 = vld [vmem:[%s9812_s0 + $0x2e0] sm:$0xff] }
  0x43   : > { %7312 = vmatprep.subr.bf16.mxu1 %v7311_v30  ;;  %v7335_v5 = vpack.c.bf16 %v805_v3, %v804_v2  ;;  %v789_v7 = vld [vmem:[%s9812_s0 + $0x258] sm:$0xff]  ;;  %v807_v9 = vld [vmem:[%s9812_s0 + $0x2e8] sm:$0xff]  ;;  %v790_v12 = vld [vmem:[%s9812_s0 + $0x260] sm:$0xff]  ;;  %v7898_v2 = vmov 0.0  }
  0x44   : > { %7282 = vmatpush3.bf16.msra.mxu0 %v7281_v34  ;;  %v7337_v10 = vpack.c.bf16 %v789_v7, %v788_v6  ;;  %v7339_v11 = vpack.c.bf16 %v807_v9, %v806_v8  ;;  %v791_v13 = vld [vmem:[%s9812_s0 + $0x268] sm:$0xff]  ;;  %v808_v14 = vld [vmem:[%s9812_s0 + $0x2f0] sm:$0xff]  ;;  %v809_v15 = vld [vmem:[%s9812_s0 + $0x2f8] sm:$0xff] }
  0x45   : > { %7316 = vmatprep.subr.bf16.mxu0 %v7315_v36  ;;  %v7341_v16 = vpack.c.bf16 %v791_v13, %v790_v12  ;;  %v7343_v17 = vpack.c.bf16 %v809_v15, %v808_v14  ;;  %v792_v18 = vld [vmem:[%s9812_s0 + $0x270] sm:$0xff]  ;;  %v793_v19 = vld [vmem:[%s9812_s0 + $0x278] sm:$0xff]  ;;  %v712_v21 = vld [vmem:[%s8219_s3 + $0x20] sm:$0x1f]  ;;  %s7832_s0 = scalar_lea.vmem %s9710_s23, 16 }
  0x46   : > { %7314 = vmatpush3.bf16.msra.mxu1 %v7313_v35  ;;  %v7345_v20 = vpack.c.bf16 %v793_v19, %v792_v18  ;;  %v810_v23 = vld [vmem:[%s9814_s1] sm:$0x1f]  ;;  %v1227_v45 = vld [vmem:[%s9759_s9 + $0x8] sm:$0xff]  ;;  %v1054_v48 = vld [vmem:[%s9816_s28 + $0x10] sm:$0xff]  ;;  %s9817_s1 = sld [smem:[#allocation15_spill]]  ;;  %p7833_p11 = scmp.ne.s32.totalorder %s9710_s23, %s7832_s0 }
  0x47   : > { %876 = vmatmul.mubr.f32.vlgmr.msra.gmra.mrb[0].mxu0 %v708_v41  ;;  %v1052_v41 = vld [vmem:[%s9815_s4] sm:$0xff]  ;;  %7347 = vmatprep.subr.bf16.mxu1 %v7896_v46  ;;  %v1229_v52 = vld [vmem:[%s9759_s9 + $0x18] sm:$0xff]  ;;  %v1057_v55 = vld [vmem:[%s9816_s28 + $0x28] sm:$0xff]  ;;  %s9818_s4 = sld [smem:[#allocation19_spill]] }
  0x48   : > { %7318 = vmatpush3.bf16.msra.mxu0 %v7317_v42  ;;  %1015 = vmatprep.mubr.f32.mxu0 %v713_v49  ;;  %v1053_v42 = vld [vmem:[%s9816_s28 + $0x8] sm:$0xff]  ;;  %v1055_v49 = vld [vmem:[%s9816_s28 + $0x18] sm:$0xff]  ;;  %v1056_v54 = vld [vmem:[%s9816_s28 + $0x20] sm:$0xff]  ;;  %p7834_p12 = pnand %p7833_p11, %p8058_p5 }
  0x49   : > { %946 = vmatmul.mubr.f32.vlgmr.msra.gmra.mrb[0].mxu1 %v710_v43  ;;  %7320 = vmatprep.subr.bf16.mxu0 %v7319_v44  ;;  %v1226_v43 = vld [vmem:[%s9759_s9] sm:$0xff]  ;;  %v7348_v44 = vpack.c.bf16 %v1053_v42, %v1052_v41  ;;  %v1231_v58 = vld [vmem:[%s9759_s9 + $0x28] sm:$0xff]  ;;  %v1058_v60 = vld [vmem:[%s9816_s28 + $0x30] sm:$0xff] }
  0x4a   : > { %v7372_v47 = vpack.c.bf16 %v1227_v45, %v1226_v43  ;;  %v1059_v61 = vld [vmem:[%s9816_s28 + $0x38] sm:$0xff]  ;;  %6548 = vmatprep.mubr.msk.f32.mxu1 %vm7897_vm1, %v7898_v2  ;;  %v5751_v13 = vld [vmem:[%s9820_s6] ss:$0 sm:$0xff]  ;;  %v5782_v42 = vld [vmem:[%s9821_s8 + $0x1] ss:$0 sm:$0xff]  ;;  %p7835_p13 = pneg %p7834_p12 }
  0x4b   : > { %7349 = vmatpush3.bf16.msra.mxu1 %v7348_v44  ;;  %v1233_v0 = vld [vmem:[%s9759_s9 + $0x38] sm:$0xff]  ;;  %v5754_v41 = vld [vmem:[%s9821_s8] ss:$0 sm:$0xff] }
  0x4c   : > { %7322 = vmatpush3.bf16.msra.mxu0 %v7321_v50  ;;  %7350 = vmatprep.subr.bf16.mxu1 %v7896_v46  ;;  %v1228_v50 = vld [vmem:[%s9759_s9 + $0x10] sm:$0xff]  ;;  %v5750_v7 = vld [vmem:[%s9817_s1] ss:$0 sm:$0xff] }
  0x4d   : > { %7324 = vmatprep.subr.bf16.mxu0 %v7323_v51  ;;  %v7351_v51 = vpack.c.bf16 %v1055_v49, %v1054_v48  ;;  %v7375_v53 = vpack.c.bf16 %v1229_v52, %v1228_v50  ;;  %s9819_s27 = smov %s9818_s4  ;;  %v1141_v8 = vld [vmem:[%s9818_s4] sm:$0xff] }
  0x4e   : > { %v5774_v12 = vld [vmem:[%s9819_s27 + $0x48] sm:$0xff]  ;;  %v1144_v19 = vld [vmem:[%s9819_s27 + $0x18] sm:$0xff]  ;;  %v5752_v45 = vld [vmem:[%s9822_s29] ss:$0 sm:$0xff] }
  0x4f   : > { %7352 = vmatpush3.bf16.msra.mxu1 %v7351_v51  ;;  %v5756_v51 = vld [vmem:[%s9760_s10] ss:$0 sm:$0xff] }
  0x50   : > { %7326 = vmatpush3.bf16.msra.mxu0 %v7325_v56  ;;  %7353 = vmatprep.subr.bf16.mxu1 %v7896_v46  ;;  %v1230_v56 = vld [vmem:[%s9759_s9 + $0x20] sm:$0xff] }
  0x51   : > { %7328 = vmatprep.subr.bf16.mxu0 %v7327_v57  ;;  %v7354_v57 = vpack.c.bf16 %v1057_v55, %v1056_v54  ;;  %v7378_v59 = vpack.c.bf16 %v1231_v58, %v1230_v56 }
  0x53   : > { %7355 = vmatpush3.bf16.msra.mxu1 %v7354_v57 }
  0x54   : > { %7330 = vmatpush3.bf16.msra.mxu0 %v7329_v62  ;;  %7356 = vmatprep.subr.bf16.mxu1 %v7896_v46  ;;  %v1232_v62 = vld [vmem:[%s9759_s9 + $0x30] sm:$0xff] }
  0x55   : > { %7332 = vmatprep.subr.bf16.mxu0 %v7331_v63  ;;  %v7357_v63 = vpack.c.bf16 %v1059_v61, %v1058_v60  ;;  %v7381_v1 = vpack.c.bf16 %v1233_v0, %v1232_v62  ;;  %v5763_v0 = vld [vmem:[%s9816_s28 + $0x48] sm:$0xff] }
  0x57   : > { %7358 = vmatpush3.bf16.msra.mxu1 %v7357_v63  ;;  %v5762_v63 = vld [vmem:[%s9816_s28 + $0x40] sm:$0xff] }
  0x58   : > { %7334 = vmatpush3.bf16.msra.mxu0 %v7333_v4  ;;  %7359 = vmatprep.subr.bf16.mxu1 %v7896_v46 }
  0x59   : > { %7336 = vmatprep.subr.bf16.mxu0 %v7335_v5 }
  0x5c   : > { %7338 = vmatpush3.bf16.msra.mxu0 %v7337_v10  ;;  %v1142_v10 = vld [vmem:[%s9819_s27 + $0x8] sm:$0xff] }
  0x5d   : > { %7340 = vmatprep.subr.bf16.mxu0 %v7339_v11  ;;  %v5773_v11 = vld [vmem:[%s9819_s27 + $0x40] sm:$0xff]  ;;  %v7360_v15 = vpack.c.bf16 %v1142_v10, %v1141_v8 }
  0x5e   : > { %v5766_v8 = vld [vmem:[%s9816_s28 + $0x60] sm:$0xff] }
  0x60   : > { %7342 = vmatpush3.bf16.msra.mxu0 %v7341_v16  ;;  %v7396_v16 = vpack.c.bf16 %v5774_v12, %v5773_v11  ;;  %v5768_v11 = vld [vmem:[%s9816_s28 + $0x70] sm:$0xff]  ;;  %v5769_v12 = vld [vmem:[%s9816_s28 + $0x78] sm:$0xff] }
  0x61   : > { %7344 = vmatprep.subr.bf16.mxu0 %v7343_v17  ;;  %v1143_v17 = vld [vmem:[%s9819_s27 + $0x10] sm:$0xff] }
  0x64   : > { %7346 = vmatpush3.bf16.msra.mxu0 %v7345_v20  ;;  %v5775_v20 = vld [vmem:[%s9819_s27 + $0x50] sm:$0xff] }
  0x65   : > { %7371 = vmatprep.subr.bf16.mxu0 %v7896_v46 }
  0x67   : > { %1016 = vmatmul.mubr.f32.vlgmr.msra.gmra.mrb[2].mxu0 %v712_v21  ;;  %v5776_v21 = vld [vmem:[%s9819_s27 + $0x58] sm:$0xff] }
  0x68   : > { %7373 = vmatpush3.bf16.msra.mxu0 %v7372_v47  ;;  %6586 = vmatprep.mubr.msk.f32.mxu0 %vm7897_vm1, %v7898_v2 }
  0x69   : > { %7374 = vmatprep.subr.bf16.mxu0 %v7896_v46 }
  0x6c   : > { %7376 = vmatpush3.bf16.msra.mxu0 %v7375_v53 }
  0x6d   : > { %7377 = vmatprep.subr.bf16.mxu0 %v7896_v46 }
  0x70   : > { %7379 = vmatpush3.bf16.msra.mxu0 %v7378_v59 }
  0x71   : > { %7380 = vmatprep.subr.bf16.mxu0 %v7896_v46 }
  0x74   : > { %7382 = vmatpush3.bf16.msra.mxu0 %v7381_v1 }
  0x75   : > { %7395 = vmatprep.subr.bf16.mxu0 %v7896_v46 }
 0x11a   : > { %v6126_v22 = vpop.f32.mrb[0].mxu0 }
 0x11b   : > { %v6127_v24 = vpop.f32.mrb[1].mxu0 }
 0x11c   : > { %v6161_v25 = vpop.f32.mrb[0].mxu1  ;;  %v6128_v26 = vadd.f32 %v6127_v24, %v6126_v22  ;;  %v7363_v22 = vpack.c.bf16 %v1144_v19, %v1143_v17  ;;  %v1145_v24 = vld [vmem:[%s9819_s27 + $0x20] sm:$0xff]  ;;  %v5786_v17 = vld [vmem:[%s9759_s9 + $0x50] sm:$0xff]  ;;  %v5787_v19 = vld [vmem:[%s9759_s9 + $0x58] sm:$0xff] }
 0x11d   : > { %v6162_v27 = vpop.f32.mrb[1].mxu1 }
 0x11e   : > { %v6163_v28 = vadd.f32 %v6162_v27, %v6161_v25  ;;  %v878_v29 = vadd.f32 %v6128_v26, %v810_v23  ;;  %v7399_v23 = vpack.c.bf16 %v5776_v21, %v5775_v20  ;;  %v1146_v25 = vld [vmem:[%s9819_s27 + $0x28] sm:$0xff]  ;;  %v5777_v26 = vld [vmem:[%s9819_s27 + $0x60] sm:$0xff]  ;;  %v7411_v20 = vpack.c.bf16 %v5787_v19, %v5786_v17 }
 0x11f   : > { %v5778_v27 = vld [vmem:[%s9819_s27 + $0x68] sm:$0xff]  ;;  %v5788_v21 = vld [vmem:[%s9759_s9 + $0x60] sm:$0xff] }
 0x120   : > { %v948_v30 = vadd.f32 %v6163_v28, %v878_v29  ;;  %v7366_v28 = vpack.c.bf16 %v1146_v25, %v1145_v24  ;;  %v7402_v29 = vpack.c.bf16 %v5778_v27, %v5777_v26  ;;  %v5790_v24 = vld [vmem:[%s9759_s9 + $0x70] sm:$0xff]  ;;  %v5791_v25 = vld [vmem:[%s9759_s9 + $0x78] sm:$0xff]  ;;  %v1478_v27 = vld [vmem:[%s9761_s11] sm:$0xff] }
 0x121   : > { %v7417_v26 = vpack.c.bf16 %v5791_v25, %v5790_v24  ;;  %v5810_v24 = vld [vmem:[%s9816_s28 + $0xb8] sm:$0xff] }
 0x13a   : > { %v6196_v31 = vpop.f32.mrb[2].mxu0 }
 0x13b   : > { %v6197_v32 = vpop.f32.mrb[3].mxu0 }
 0x13c   : > { %v6198_v33 = vadd.f32 %v6197_v32, %v6196_v31  ;;  %v1148_v31 = vld [vmem:[%s9819_s27 + $0x38] sm:$0xff]  ;;  %v5779_v32 = vld [vmem:[%s9819_s27 + $0x70] sm:$0xff] }
 0x13e   : > { %v8377_v34 = vadd.f32 %v6198_v33, %v948_v30  ;;  %v1147_v30 = vld [vmem:[%s9819_s27 + $0x30] sm:$0xff]  ;;  %v5780_v33 = vld [vmem:[%s9819_s27 + $0x78] sm:$0xff] }
 0x140   : > { %v1024_v35 = vsel %vm1023_vm0, %v8377_v34, 0.0 }
 0x141   : > { %1025 = vadd.xlane.f32.xlu0 %v1024_v35  ;;  %v7369_v35 = vpack.c.bf16 %v1148_v31, %v1147_v30  ;;  %v5814_v30 = vld [vmem:[%s9819_s27 + $0x80] sm:$0xff]  ;;  %v5815_v31 = vld [vmem:[%s9819_s27 + $0x88] sm:$0xff] }
 0x1ce   : > { %v1026_v36 = vpop.xlane.xlu0 %1025 }
 0x1cf   : > { %v1028_v37 = vmul.f32 0.015625, %v1026_v36  ;;  %v7405_v36 = vpack.c.bf16 %v5780_v33, %v5779_v32  ;;  %v7438_v32 = vpack.c.bf16 %v5815_v31, %v5814_v30  ;;  %v5816_v33 = vld [vmem:[%s9819_s27 + $0x90] sm:$0xff]  ;;  %v5828_v30 = vld [vmem:[%s9759_s9 + $0x98] sm:$0xff] }
 0x1d1   : > { %v1029_v38 = vsub.f32 %v8377_v34, %v1028_v37 }
 0x1d3   : > { %v1030_v39 = vmul.f32 %v1029_v38, %v1029_v38 }
 0x1d5   : > { %v1031_v40 = vsel %vm1023_vm0, %v1030_v39, 0.0 }
 0x1d6   : > { %1032 = vadd.xlane.f32.xlu0 %v1031_v40 }
 0x263   : > { %v1033_v3 = vpop.xlane.xlu0 %1032 }
 0x264   : > { %v1034_v4 = vmul.f32 0.015625, %v1033_v3  ;;  %v7384_v3 = vpack.c.bf16 %v5763_v0, %v5762_v63 }
 0x266   : > { %v1035_v5 = vadd.f32 1e-12, %v1034_v4 }
 0x268   : > { %7786 = vrsqrt.f32 %v1035_v5  ;;  %v5764_v5 = vld [vmem:[%s9816_s28 + $0x50] sm:$0xff] }
 0x272   : > { %v7787_v6 = vpop.eup %7786 }
 0x273   : > { %v1037_v9 = vmul.f32 %v7787_v6, %v1029_v38  ;;  %v5765_v6 = vld [vmem:[%s9816_s28 + $0x58] sm:$0xff] }
 0x275   : > { %v1044_v14 = vmul.f32 %v5750_v7, %v1037_v9  ;;  %v7387_v7 = vpack.c.bf16 %v5765_v6, %v5764_v5  ;;  %v5767_v9 = vld [vmem:[%s9816_s28 + $0x68] sm:$0xff]  ;;  %v5799_v6 = vld [vmem:[%s9761_s11 + $0x10] sm:$0xff] }
 0x276   : > { %v7390_v10 = vpack.c.bf16 %v5767_v9, %v5766_v8 }
 0x277   : > { %v8466_v18 = vadd.f32 %v5751_v13, %v1044_v14  ;;  %v7393_v13 = vpack.c.bf16 %v5769_v12, %v5768_v11  ;;  %v5784_v14 = vld [vmem:[%s9759_s9 + $0x40] sm:$0xff]  ;;  %v5804_v12 = vld [vmem:[%s9816_s28 + $0x88] sm:$0xff] }
 0x278   : > { %v5803_v11 = vld [vmem:[%s9816_s28 + $0x80] sm:$0xff] }
 0x279   : > { %6549 = vmatmul.mubr.msk.f32.vlgmr.msra.gmra.mrb[2].mxu1 %vm1067_vm2, %v8466_v18  ;;  %6587 = vmatmul.mubr.msk.f32.vlgmr.msra.gmra.mrb[4].mxu0 %vm1067_vm2, %v8466_v18 }
 0x27a   : > { %7361 = vmatpush3.bf16.msra.mxu1 %v7360_v15  ;;  %7397 = vmatpush3.bf16.msra.mxu0 %v7396_v16  ;;  %v5785_v15 = vld [vmem:[%s9759_s9 + $0x48] sm:$0xff] }
 0x27b   : > { %7362 = vmatprep.subr.bf16.mxu1 %v7896_v46  ;;  %7398 = vmatprep.subr.bf16.mxu0 %v7896_v46  ;;  %v7408_v16 = vpack.c.bf16 %v5785_v15, %v5784_v14  ;;  %v5805_v14 = vld [vmem:[%s9816_s28 + $0x90] sm:$0xff]  ;;  %v5806_v15 = vld [vmem:[%s9816_s28 + $0x98] sm:$0xff] }
 0x27c   : > { %6567 = vmatprep.mubr.msk.f32.mxu1 %vm7897_vm1, %v7898_v2  ;;  %6634 = vmatprep.mubr.msk.f32.mxu0 %vm7897_vm1, %v7898_v2  ;;  %v7429_v19 = vpack.c.bf16 %v5806_v15, %v5805_v14  ;;  %v5841_v14 = vld [vmem:[%s9761_s11 + $0x28] sm:$0xff] }
 0x27e   : > { %7364 = vmatpush3.bf16.msra.mxu1 %v7363_v22  ;;  %7400 = vmatpush3.bf16.msra.mxu0 %v7399_v23  ;;  %v5789_v22 = vld [vmem:[%s9759_s9 + $0x68] sm:$0xff] }
 0x27f   : > { %7365 = vmatprep.subr.bf16.mxu1 %v7896_v46  ;;  %7401 = vmatprep.subr.bf16.mxu0 %v7896_v46  ;;  %v7414_v23 = vpack.c.bf16 %v5789_v22, %v5788_v21  ;;  %v5808_v21 = vld [vmem:[%s9816_s28 + $0xa8] sm:$0xff] }
 0x282   : > { %7367 = vmatpush3.bf16.msra.mxu1 %v7366_v28  ;;  %7403 = vmatpush3.bf16.msra.mxu0 %v7402_v29  ;;  %v1479_v28 = vld [vmem:[%s9761_s11 + $0x8] sm:$0xff] }
 0x283   : > { %7368 = vmatprep.subr.bf16.mxu1 %v7896_v46  ;;  %7404 = vmatprep.subr.bf16.mxu0 %v7896_v46  ;;  %v7423_v29 = vpack.c.bf16 %v1479_v28, %v1478_v27  ;;  %v5826_v27 = vld [vmem:[%s9759_s9 + $0x88] sm:$0xff] }
 0x286   : > { %7370 = vmatpush3.bf16.msra.mxu1 %v7369_v35  ;;  %7406 = vmatpush3.bf16.msra.mxu0 %v7405_v36  ;;  %v5817_v35 = vld [vmem:[%s9819_s27 + $0x98] sm:$0xff] }
 0x287   : > { %6589 = vmatprep.subr.mxu1 %v7898_v2  ;;  %6656 = vmatprep.subr.mxu0 %v7898_v2 }
 0x289   : > { %6568 = vmatmul.mubr.msk.f32.vlgmr.msra.gmra.mrb[4].mxu1 %vm1067_vm2, %v8466_v18  ;;  %6635 = vmatmul.mubr.msk.f32.vlgmr.msra.gmra.mrb[6].mxu0 %vm1067_vm2, %v8466_v18 }
 0x28a   : > { %6591 = vmatprep.mubr.msk.f32.mxu1 %vm7897_vm1, %v7898_v2  ;;  %6658 = vmatprep.mubr.msk.f32.mxu0 %vm7897_vm1, %v7898_v2 }
 0x34c   : > { %v1137_v37 = vpop.f32.mrb[2].mxu1  ;;  %v1307_v38 = vpop.f32.mrb[4].mxu0 }
 0x34d   : > { %v6550_v39 = vpop.f32.mrb[3].mxu1  ;;  %v6588_v40 = vpop.f32.mrb[5].mxu0  ;;  %v1138_v52 = vadd.f32 %v5752_v45, %v1137_v37  ;;  %v1308_v53 = vadd.f32 %v5756_v51, %v1307_v38  ;;  %v7441_v38 = vpack.c.bf16 %v5817_v35, %v5816_v33  ;;  %v5771_v45 = vld [vmem:[%s9822_s29 + $0x1] ss:$0 sm:$0xff]  ;;  %v5830_v33 = vld [vmem:[%s9759_s9 + $0xa8] sm:$0xff] }
 0x34e   : > { %v5818_v39 = vld [vmem:[%s9819_s27 + $0xa0] sm:$0xff]  ;;  %v5819_v40 = vld [vmem:[%s9819_s27 + $0xa8] sm:$0xff] }
 0x35c   : > { %v1222_v43 = vpop.f32.mrb[4].mxu1  ;;  %v1650_v44 = vpop.f32.mrb[6].mxu0 }
 0x35d   : > { %v1223_v47 = vadd.f32 %v5754_v41, %v1222_v43  ;;  %v1651_v48 = vadd.f32 %v5782_v42, %v1650_v44  ;;  %v6569_v49 = vpop.f32.mrb[5].mxu1  ;;  %v6636_v50 = vpop.f32.mrb[7].mxu0  ;;  %v7444_v41 = vpack.c.bf16 %v5819_v40, %v5818_v39  ;;  %v5820_v42 = vld [vmem:[%s9819_s27 + $0xb0] sm:$0xff]  ;;  %v5821_v43 = vld [vmem:[%s9819_s27 + $0xb8] sm:$0xff]  ;;  %v5854_v39 = vld [vmem:[%s9819_s27 + $0xc0] sm:$0xff] }
 0x35e   : > { %v7447_v44 = vpack.c.bf16 %v5821_v43, %v5820_v42  ;;  %v5793_v50 = vld [vmem:[%s9760_s10 + $0x1] ss:$0 sm:$0xff]  ;;  %v5855_v40 = vld [vmem:[%s9819_s27 + $0xc8] sm:$0xff]  ;;  %v5856_v42 = vld [vmem:[%s9819_s27 + $0xd0] sm:$0xff] }
 0x35f   : > { %6590 = vmatpush3.xpose.msk.msra.mxu1 %vm1311_vm3, %v1223_v47  ;;  %6657 = vmatpush3.xpose.msk.msra.mxu0 %vm1311_vm3, %v1651_v48  ;;  %v5857_v43 = vld [vmem:[%s9819_s27 + $0xd8] sm:$0xff] }
 0x360   : > { %6594 = vmatprep.subr.mxu1 %v7898_v2  ;;  %6661 = vmatprep.subr.mxu0 %v7898_v2 }
 0x362   : > { %6592 = vmatmul.mubr.msk.f32.vlgmr.msra.gmra.mrb[6].mxu1 %vm1311_vm3, %v1138_v52 }
 0x363   : > { %6595 = vmatpush3.msk.msra.mxu1 %vm1404_vm4, %v1308_v53  ;;  %6596 = vmatprep.mubr.msk.f32.mxu1 %vm7897_vm1, %v7898_v2 }
 0x364   : > { %7383 = vmatprep.subr.bf16.mxu1 %v7896_v46 }
 0x435   : > { %v1384_v54 = vpop.f32.mrb[6].mxu1 }
 0x436   : > { %v6593_v55 = vpop.f32.mrb[7].mxu1  ;;  %v1389_v56 = vsel %vm1388_vm5, %v1384_v54, -inf }
 0x437   : > { %1390 = vmax.xlane.f32.xlu1 %v1389_v56  ;;  %v5823_v56 = vld [vmem:[%s9821_s8 + $0x2] ss:$0 sm:$0xff] }
 0x4c4   : > { %v1391_v57 = vpop.xlane.xlu1 %1390 }
 0x4c5   : > { %v1392_v58 = vsub.f32 %v1384_v54, %v1391_v57 }
 0x4c7   : > { %v1393_v59 = vmul.f32 1.442695, %v1392_v58 }
 0x4c9   : > { %7788 = vpow2.f32 %v1393_v59 }
 0x4d3   : > { %v7789_v60 = vpop.eup %7788 }
 0x4d4   : > { %v1395_v61 = vsel %vm1388_vm5, %v7789_v60, 0.0 }
 0x4d5   : > { %1396 = vadd.xlane.f32.xlu1 %v1395_v61 }
 0x562   : > { %v1397_v62 = vpop.xlane.xlu1 %1396 }
 0x563   : > { %7790 = vrcp.f32 %v1397_v62 }
 0x56d   : > { %v7791_v1 = vpop.eup %7790 }
 0x56e   : > { %v1399_v4 = vmul.f32 %v7791_v1, %v7789_v60 }
 0x570   : > { %6597 = vmatmul.mubr.msk.f32.vlgmr.msra.gmra.mrb[8].mxu1 %vm1400_vm6, %v1399_v4 }
 0x571   : > { %7385 = vmatpush3.bf16.msra.mxu1 %v7384_v3  ;;  %6615 = vmatprep.mubr.msk.f32.mxu1 %vm7897_vm1, %v7898_v2 }
 0x572   : > { %7386 = vmatprep.subr.bf16.mxu1 %v7896_v46 }
 0x575   : > { %7388 = vmatpush3.bf16.msra.mxu1 %v7387_v7  ;;  %v5800_v7 = vld [vmem:[%s9761_s11 + $0x18] sm:$0xff] }
 0x576   : > { %7389 = vmatprep.subr.bf16.mxu1 %v7896_v46  ;;  %v7420_v9 = vpack.c.bf16 %v5800_v7, %v5799_v6 }
 0x579   : > { %7391 = vmatpush3.bf16.msra.mxu1 %v7390_v10 }
 0x57a   : > { %7392 = vmatprep.subr.bf16.mxu1 %v7896_v46 }
 0x57d   : > { %7394 = vmatpush3.bf16.msra.mxu1 %v7393_v13  ;;  %v7426_v13 = vpack.c.bf16 %v5804_v12, %v5803_v11 }
 0x57e   : > { %7407 = vmatprep.subr.bf16.mxu1 %v7896_v46 }
 0x580   : > { %6616 = vmatmul.mubr.msk.f32.vlgmr.msra.gmra.mrb[10].mxu1 %vm1067_vm2, %v8466_v18 }
 0x581   : > { %7409 = vmatpush3.bf16.msra.mxu1 %v7408_v16  ;;  %6653 = vmatprep.mubr.msk.f32.mxu1 %vm7897_vm1, %v7898_v2 }
 0x582   : > { %7410 = vmatprep.subr.bf16.mxu1 %v7896_v46 }
 0x585   : > { %7412 = vmatpush3.bf16.msra.mxu1 %v7411_v20  ;;  %v5807_v20 = vld [vmem:[%s9816_s28 + $0xa0] sm:$0xff] }
 0x586   : > { %7413 = vmatprep.subr.bf16.mxu1 %v7896_v46  ;;  %v7432_v22 = vpack.c.bf16 %v5808_v21, %v5807_v20  ;;  %v5844_v20 = vld [vmem:[%s9816_s28 + $0xc8] sm:$0xff] }
 0x589   : > { %7415 = vmatpush3.bf16.msra.mxu1 %v7414_v23  ;;  %v5809_v23 = vld [vmem:[%s9816_s28 + $0xb0] sm:$0xff] }
 0x58a   : > { %7416 = vmatprep.subr.bf16.mxu1 %v7896_v46  ;;  %v7435_v25 = vpack.c.bf16 %v5810_v24, %v5809_v23  ;;  %v5846_v23 = vld [vmem:[%s9816_s28 + $0xd8] sm:$0xff] }
 0x58d   : > { %7418 = vmatpush3.bf16.msra.mxu1 %v7417_v26  ;;  %v5825_v26 = vld [vmem:[%s9759_s9 + $0x80] sm:$0xff] }
 0x58e   : > { %7422 = vmatprep.subr.bf16.mxu1 %v7896_v46  ;;  %v7450_v28 = vpack.c.bf16 %v5826_v27, %v5825_v26  ;;  %v5847_v27 = vld [vmem:[%s9816_s28 + $0xe0] sm:$0xff] }
 0x590   : > { %6654 = vmatmul.mubr.msk.f32.vlgmr.msra.gmra.mrb[12].mxu1 %vm1067_vm2, %v8466_v18 }
 0x591   : > { %7424 = vmatpush3.bf16.msra.mxu1 %v7423_v29  ;;  %6677 = vmatprep.mubr.msk.f32.mxu1 %vm7897_vm1, %v7898_v2  ;;  %v5827_v29 = vld [vmem:[%s9759_s9 + $0x90] sm:$0xff] }
 0x592   : > { %7437 = vmatprep.subr.bf16.mxu1 %v7896_v46  ;;  %v7453_v31 = vpack.c.bf16 %v5828_v30, %v5827_v29  ;;  %v5849_v30 = vld [vmem:[%s9816_s28 + $0xf0] sm:$0xff] }
 0x643   : > { %v1474_v36 = vpop.f32.mrb[8].mxu1 }
 0x644   : > { %v6598_v37 = vpop.f32.mrb[9].mxu1  ;;  %6678 = vmatmul.mubr.msk.f32.vlgmr.msra.gmra.mrb[14].mxu1 %vm1311_vm3, %v1474_v36  ;;  %v5831_v36 = vld [vmem:[%s9759_s9 + $0xb0] sm:$0xff] }
 0x645   : > { %7439 = vmatpush3.bf16.msra.mxu1 %v7438_v32  ;;  %6715 = vmatprep.mubr.msk.f32.mxu1 %vm7897_vm1, %v7898_v2  ;;  %v5829_v32 = vld [vmem:[%s9759_s9 + $0xa0] sm:$0xff]  ;;  %v5832_v37 = vld [vmem:[%s9759_s9 + $0xb8] sm:$0xff] }
 0x646   : > { %7440 = vmatprep.subr.bf16.mxu1 %v7896_v46  ;;  %v7456_v35 = vpack.c.bf16 %v5830_v33, %v5829_v32  ;;  %v5865_v33 = vld [vmem:[%s9759_s9 + $0xc0] sm:$0xff] }
 0x649   : > { %7442 = vmatpush3.bf16.msra.mxu1 %v7441_v38  ;;  %v7459_v38 = vpack.c.bf16 %v5832_v37, %v5831_v36  ;;  %v5867_v37 = vld [vmem:[%s9759_s9 + $0xd0] sm:$0xff] }
 0x64a   : > { %7443 = vmatprep.subr.bf16.mxu1 %v7896_v46 }
 0x64d   : > { %7445 = vmatpush3.bf16.msra.mxu1 %v7444_v41  ;;  %v7477_v41 = vpack.c.bf16 %v5855_v40, %v5854_v39  ;;  %v5869_v40 = vld [vmem:[%s9759_s9 + $0xe0] sm:$0xff] }
 0x64e   : > { %7446 = vmatprep.subr.bf16.mxu1 %v7896_v46 }
 0x651   : > { %7448 = vmatpush3.bf16.msra.mxu1 %v7447_v44  ;;  %v7480_v44 = vpack.c.bf16 %v5857_v43, %v5856_v42  ;;  %v5871_v43 = vld [vmem:[%s9759_s9 + $0xf0] sm:$0xff] }
 0x652   : > { %6737 = vmatprep.subr.mxu1 %v7898_v2 }
 0x653   : > { %v1563_v47 = vpop.f32.mrb[10].mxu1 }
 0x654   : > { %v1564_v48 = vadd.f32 %v5771_v45, %v1563_v47  ;;  %v6617_v49 = vpop.f32.mrb[11].mxu1  ;;  %6716 = vmatmul.mubr.msk.f32.vlgmr.msra.gmra.mrb[16].mxu1 %vm1067_vm2, %v8466_v18  ;;  %v5858_v45 = vld [vmem:[%s9819_s27 + $0xe0] sm:$0xff]  ;;  %v5859_v47 = vld [vmem:[%s9819_s27 + $0xe8] sm:$0xff] }
 0x655   : > { %6739 = vmatprep.mubr.msk.f32.mxu1 %vm7897_vm1, %v7898_v2  ;;  %v5860_v49 = vld [vmem:[%s9819_s27 + $0xf0] sm:$0xff] }
 0x656   : > { %6659 = vmatmul.mubr.msk.f32.vlgmr.msra.gmra.mrb[8].mxu0 %vm1311_vm3, %v1564_v48  ;;  %v7483_v48 = vpack.c.bf16 %v5859_v47, %v5858_v45 }
 0x657   : > { %6663 = vmatprep.mubr.msk.f32.mxu0 %vm7897_vm1, %v7898_v2 }
 0x663   : > { %v1737_v51 = vpop.f32.mrb[12].mxu1 }
 0x664   : > { %v1738_v52 = vadd.f32 %v5793_v50, %v1737_v51  ;;  %v6655_v53 = vpop.f32.mrb[13].mxu1  ;;  %v5861_v50 = vld [vmem:[%s9819_s27 + $0xf8] sm:$0xff] }
 0x665   : > { %v7486_v51 = vpack.c.bf16 %v5861_v50, %v5860_v49  ;;  %v5852_v50 = vld [vmem:[%s9822_s29 + $0x3] ss:$0 sm:$0xff] }
 0x666   : > { %6662 = vmatpush3.msk.msra.mxu0 %vm1404_vm4, %v1738_v52 }
 0x667   : > { %7419 = vmatprep.subr.bf16.mxu0 %v7896_v46 }
 0x717   : > { %v8668_v54 = vpop.f32.mrb[14].mxu1 }
 0x718   : > { %v6679_v55 = vpop.f32.mrb[15].mxu1 }
 0x727   : > { %v2223_v57 = vpop.f32.mrb[16].mxu1 }
 0x728   : > { %v2224_v58 = vadd.f32 %v5823_v56, %v2223_v57  ;;  %v6717_v59 = vpop.f32.mrb[17].mxu1  ;;  %v5812_v56 = vld [vmem:[%s9822_s29 + $0x2] ss:$0 sm:$0xff] }
 0x729   : > { %v1813_v60 = vpop.f32.mrb[8].mxu0 }
 0x72a   : > { %v6660_v61 = vpop.f32.mrb[9].mxu0  ;;  %6738 = vmatpush3.xpose.msk.msra.mxu1 %vm1311_vm3, %v2224_v58  ;;  %v1817_v62 = vsel %vm1388_vm5, %v1813_v60, -inf }
 0x72b   : > { %1818 = vmax.xlane.f32.xlu0 %v1817_v62  ;;  %6742 = vmatprep.subr.mxu1 %v7898_v2 }
 0x7b8   : > { %v1819_v63 = vpop.xlane.xlu0 %1818 }
 0x7b9   : > { %v1820_v0 = vsub.f32 %v1813_v60, %v1819_v63  ;;  %v5834_v60 = vld [vmem:[%s9760_s10 + $0x2] ss:$0 sm:$0xff]  ;;  %v5863_v63 = vld [vmem:[%s9821_s8 + $0x3] ss:$0 sm:$0xff] }
 0x7bb   : > { %v1821_v1 = vmul.f32 1.442695, %v1820_v0 }
 0x7bd   : > { %7792 = vpow2.f32 %v1821_v1 }
 0x7c7   : > { %v7793_v3 = vpop.eup %7792 }
 0x7c8   : > { %v1823_v4 = vsel %vm1388_vm5, %v7793_v3, 0.0 }
 0x7c9   : > { %1824 = vadd.xlane.f32.xlu1 %v1823_v4 }
 0x856   : > { %v1825_v5 = vpop.xlane.xlu1 %1824 }
 0x857   : > { %7794 = vrcp.f32 %v1825_v5 }
 0x861   : > { %v7795_v8 = vpop.eup %7794 }
 0x862   : > { %v1827_v10 = vmul.f32 %v7795_v8, %v7793_v3 }
 0x864   : > { %6664 = vmatmul.mubr.msk.f32.vlgmr.msra.gmra.mrb[10].mxu0 %vm1400_vm6, %v1827_v10 }
 0x865   : > { %7421 = vmatpush3.bf16.msra.mxu0 %v7420_v9  ;;  %6670 = vmatprep.mubr.msk.f32.mxu0 %vm7897_vm1, %v7898_v2 }
 0x866   : > { %7425 = vmatprep.subr.bf16.mxu0 %v7896_v46 }
 0x937   : > { %v1900_v16 = vpop.f32.mrb[10].mxu0 }
 0x938   : > { %v6665_v17 = vpop.f32.mrb[11].mxu0  ;;  %6671 = vmatmul.mubr.msk.f32.vlgmr.msra.gmra.mrb[12].mxu0 %vm1311_vm3, %v1900_v16 }
 0x939   : > { %7427 = vmatpush3.bf16.msra.mxu0 %v7426_v13  ;;  %6696 = vmatprep.mubr.msk.f32.mxu0 %vm7897_vm1, %v7898_v2  ;;  %v5840_v13 = vld [vmem:[%s9761_s11 + $0x20] sm:$0xff] }
 0x93a   : > { %7428 = vmatprep.subr.bf16.mxu0 %v7896_v46  ;;  %v7462_v16 = vpack.c.bf16 %v5841_v14, %v5840_v13  ;;  %v5883_v13 = vld [vmem:[%s9762_s12] ss:$0 sm:$0xff] }
 0x93d   : > { %7430 = vmatpush3.bf16.msra.mxu0 %v7429_v19  ;;  %v5843_v19 = vld [vmem:[%s9816_s28 + $0xc0] sm:$0xff] }
 0x93e   : > { %7431 = vmatprep.subr.bf16.mxu0 %v7896_v46  ;;  %v7465_v21 = vpack.c.bf16 %v5844_v20, %v5843_v19 }
 0x941   : > { %7433 = vmatpush3.bf16.msra.mxu0 %v7432_v22  ;;  %v5845_v22 = vld [vmem:[%s9816_s28 + $0xd0] sm:$0xff] }
 0x942   : > { %7434 = vmatprep.subr.bf16.mxu0 %v7896_v46  ;;  %v7468_v26 = vpack.c.bf16 %v5846_v23, %v5845_v22  ;;  %v3093_v23 = vld [vmem:[%s9765_s15] sm:$0xff] }
 0x945   : > { %7436 = vmatpush3.bf16.msra.mxu0 %v7435_v25 }
 0x946   : > { %7449 = vmatprep.subr.bf16.mxu0 %v7896_v46 }
 0x948   : > { %6697 = vmatmul.mubr.msk.f32.vlgmr.msra.gmra.mrb[14].mxu0 %vm1067_vm2, %v8466_v18 }
 0x949   : > { %7451 = vmatpush3.bf16.msra.mxu0 %v7450_v28  ;;  %6734 = vmatprep.mubr.msk.f32.mxu0 %vm7897_vm1, %v7898_v2  ;;  %v5848_v28 = vld [vmem:[%s9816_s28 + $0xe8] sm:$0xff] }
 0x94a   : > { %7452 = vmatprep.subr.bf16.mxu0 %v7896_v46  ;;  %v7471_v29 = vpack.c.bf16 %v5848_v28, %v5847_v27  ;;  %v3097_v28 = vld [vmem:[%s9765_s15 + $0x20] sm:$0xff] }
 0x94d   : > { %7454 = vmatpush3.bf16.msra.mxu0 %v7453_v31  ;;  %v5850_v31 = vld [vmem:[%s9816_s28 + $0xf8] sm:$0xff] }
 0x94e   : > { %7455 = vmatprep.subr.bf16.mxu0 %v7896_v46  ;;  %v7474_v32 = vpack.c.bf16 %v5850_v31, %v5849_v30  ;;  %v3099_v31 = vld [vmem:[%s9765_s15 + $0x30] sm:$0xff] }
 0x951   : > { %7457 = vmatpush3.bf16.msra.mxu0 %v7456_v35  ;;  %v5866_v35 = vld [vmem:[%s9759_s9 + $0xc8] sm:$0xff] }
 0x952   : > { %7458 = vmatprep.subr.bf16.mxu0 %v7896_v46  ;;  %v7489_v36 = vpack.c.bf16 %v5866_v35, %v5865_v33  ;;  %v3190_v35 = vld [vmem:[%s9767_s17] sm:$0xff] }
 0x955   : > { %7460 = vmatpush3.bf16.msra.mxu0 %v7459_v38  ;;  %v5868_v38 = vld [vmem:[%s9759_s9 + $0xd8] sm:$0xff] }
 0x956   : > { %7476 = vmatprep.subr.bf16.mxu0 %v7896_v46  ;;  %v7492_v39 = vpack.c.bf16 %v5868_v38, %v5867_v37 }
 0x958   : > { %6735 = vmatmul.mubr.msk.f32.vlgmr.msra.gmra.mrb[16].mxu0 %vm1067_vm2, %v8466_v18 }
 0x959   : > { %7478 = vmatpush3.bf16.msra.mxu0 %v7477_v41  ;;  %6789 = vmatprep.mubr.msk.f32.mxu0 %vm7897_vm1, %v7898_v2  ;;  %v5870_v41 = vld [vmem:[%s9759_s9 + $0xe8] sm:$0xff] }
 0x95a   : > { %7479 = vmatprep.subr.bf16.mxu0 %v7896_v46  ;;  %v7495_v42 = vpack.c.bf16 %v5870_v41, %v5869_v40 }
 0x95d   : > { %7481 = vmatpush3.bf16.msra.mxu0 %v7480_v44  ;;  %v5872_v44 = vld [vmem:[%s9759_s9 + $0xf8] sm:$0xff] }
 0x95e   : > { %7482 = vmatprep.subr.bf16.mxu0 %v7896_v46  ;;  %v7498_v45 = vpack.c.bf16 %v5872_v44, %v5871_v43  ;;  %v5885_v44 = vld [vmem:[%s9764_s14] ss:$0 sm:$0xff] }
 0x961   : > { %7484 = vmatpush3.bf16.msra.mxu0 %v7483_v48 }
 0x962   : > { %7485 = vmatprep.subr.bf16.mxu0 %v7896_v46 }
 0x965   : > { %7487 = vmatpush3.bf16.msra.mxu0 %v7486_v51 }
 0x966   : > { %6811 = vmatprep.subr.mxu0 %v7898_v2 }
 0x968   : > { %6790 = vmatmul.mubr.msk.f32.vlgmr.msra.gmra.mrb[18].mxu0 %vm1067_vm2, %v8466_v18 }
 0x969   : > { %6813 = vmatprep.mubr.msk.f32.mxu0 %vm7897_vm1, %v7898_v2 }
 0xa0b   : > { %v1976_v52 = vpop.f32.mrb[12].mxu0 }
 0xa0c   : > { %v8787_v53 = vadd.f32 %v8668_v54, %v1976_v52  ;;  %v6672_v55 = vpop.f32.mrb[13].mxu0 }
 0xa1b   : > { %v2136_v57 = vpop.f32.mrb[14].mxu0 }
 0xa1c   : > { %v2137_v58 = vadd.f32 %v5812_v56, %v2136_v57  ;;  %v6698_v59 = vpop.f32.mrb[15].mxu0 }
 0xa1e   : > { %6740 = vmatmul.mubr.msk.f32.vlgmr.msra.gmra.mrb[18].mxu1 %vm1311_vm3, %v2137_v58 }
 0xa1f   : > { %6744 = vmatprep.mubr.msk.f32.mxu1 %vm7897_vm1, %v7898_v2 }
 0xa2b   : > { %v2310_v61 = vpop.f32.mrb[16].mxu0 }
 0xa2c   : > { %v2311_v54 = vadd.f32 %v5834_v60, %v2310_v61  ;;  %v6736_v62 = vpop.f32.mrb[17].mxu0 }
 0xa2e   : > { %6743 = vmatpush3.msk.msra.mxu1 %vm1404_vm4, %v2311_v54 }
 0xa2f   : > { %7461 = vmatprep.subr.bf16.mxu1 %v7896_v46 }
 0xa3b   : > { %v2724_v0 = vpop.f32.mrb[18].mxu0 }
 0xa3c   : > { %v2725_v1 = vadd.f32 %v5863_v63, %v2724_v0  ;;  %v6791_v3 = vpop.f32.mrb[19].mxu0 }
 0xa3d   : > { %v5880_v3 = vld [vmem:[%s9761_s11 + $0x30] sm:$0xff] }
 0xa3e   : > { %6812 = vmatpush3.xpose.msk.msra.mxu0 %vm1311_vm3, %v2725_v1 }
 0xa3f   : > { %6816 = vmatprep.subr.mxu0 %v7898_v2 }
 0xaf1   : > { %v2386_v4 = vpop.f32.mrb[18].mxu1 }
 0xaf2   : > { %v6741_v5 = vpop.f32.mrb[19].mxu1  ;;  %v2390_v6 = vsel %vm1388_vm5, %v2386_v4, -inf }
 0xaf3   : > { %2391 = vmax.xlane.f32.xlu0 %v2390_v6 }
 0xb80   : > { %v2392_v7 = vpop.xlane.xlu0 %2391 }
 0xb81   : > { %v2393_v8 = vsub.f32 %v2386_v4, %v2392_v7  ;;  %v5881_v4 = vld [vmem:[%s9761_s11 + $0x38] sm:$0xff] }
 0xb82   : > { %v7501_v6 = vpack.c.bf16 %v5881_v4, %v5880_v3  ;;  %v3205_v3 = vld [vmem:[%s9767_s17 + $0x78] sm:$0xff] }
 0xb83   : > { %v2394_v9 = vmul.f32 1.442695, %v2393_v8 }
 0xb85   : > { %7796 = vpow2.f32 %v2394_v9 }
 0xb8f   : > { %v7797_v10 = vpop.eup %7796 }
 0xb90   : > { %v2396_v11 = vsel %vm1388_vm5, %v7797_v10, 0.0 }
 0xb91   : > { %2397 = vadd.xlane.f32.xlu1 %v2396_v11 }
 0xc1e   : > { %v2398_v12 = vpop.xlane.xlu1 %2397 }
 0xc1f   : > { %7798 = vrcp.f32 %v2398_v12 }
 0xc29   : > { %v7799_v15 = vpop.eup %7798 }
 0xc2a   : > { %v2400_v17 = vmul.f32 %v7799_v15, %v7797_v10 }
 0xc2c   : > { %6745 = vmatmul.mubr.msk.f32.vlgmr.msra.gmra.mrb[20].mxu1 %vm1400_vm6, %v2400_v17 }
 0xc2d   : > { %7463 = vmatpush3.bf16.msra.mxu1 %v7462_v16  ;;  %6751 = vmatprep.mubr.msk.f32.mxu1 %vm7897_vm1, %v7898_v2 }
 0xc2e   : > { %7464 = vmatprep.subr.bf16.mxu1 %v7896_v46 }
 0xcff   : > { %v2473_v24 = vpop.f32.mrb[20].mxu1 }
 0xd00   : > { %v6746_v25 = vpop.f32.mrb[21].mxu1  ;;  %6752 = vmatmul.mubr.msk.f32.vlgmr.msra.gmra.mrb[22].mxu1 %vm1311_vm3, %v2473_v24 }
 0xd01   : > { %7466 = vmatpush3.bf16.msra.mxu1 %v7465_v21  ;;  %6770 = vmatprep.mubr.msk.f32.mxu1 %vm7897_vm1, %v7898_v2  ;;  %v3095_v25 = vld [vmem:[%s9765_s15 + $0x10] sm:$0xff] }
 0xd02   : > { %7467 = vmatprep.subr.bf16.mxu1 %v7896_v46 }
 0xd05   : > { %7469 = vmatpush3.bf16.msra.mxu1 %v7468_v26  ;;  %v3096_v26 = vld [vmem:[%s9765_s15 + $0x18] sm:$0xff] }
 0xd06   : > { %7470 = vmatprep.subr.bf16.mxu1 %v7896_v46  ;;  %v7507_v27 = vpack.c.bf16 %v3096_v26, %v3095_v25 }
 0xd09   : > { %7472 = vmatpush3.bf16.msra.mxu1 %v7471_v29  ;;  %v3098_v29 = vld [vmem:[%s9765_s15 + $0x28] sm:$0xff] }
 0xd0a   : > { %7473 = vmatprep.subr.bf16.mxu1 %v7896_v46  ;;  %v7510_v30 = vpack.c.bf16 %v3098_v29, %v3097_v28 }
 0xd0d   : > { %7475 = vmatpush3.bf16.msra.mxu1 %v7474_v32  ;;  %v3100_v32 = vld [vmem:[%s9765_s15 + $0x38] sm:$0xff] }
 0xd0e   : > { %7488 = vmatprep.subr.bf16.mxu1 %v7896_v46  ;;  %v7513_v33 = vpack.c.bf16 %v3100_v32, %v3099_v31  ;;  %v5915_v32 = vld [vmem:[%s9759_s9 + $0x100] sm:$0xff] }
 0xd10   : > { %6771 = vmatmul.mubr.msk.f32.vlgmr.msra.gmra.mrb[24].mxu1 %vm1067_vm2, %v8466_v18 }
 0xd11   : > { %7490 = vmatpush3.bf16.msra.mxu1 %v7489_v36  ;;  %6808 = vmatprep.mubr.msk.f32.mxu1 %vm7897_vm1, %v7898_v2  ;;  %v3191_v36 = vld [vmem:[%s9767_s17 + $0x8] sm:$0xff] }
 0xd12   : > { %7491 = vmatprep.subr.bf16.mxu1 %v7896_v46  ;;  %v7516_v37 = vpack.c.bf16 %v3191_v36, %v3190_v35  ;;  %v5895_v36 = vld [vmem:[%s9816_s28 + $0x110] sm:$0xff] }
 0xd15   : > { %7493 = vmatpush3.bf16.msra.mxu1 %v7492_v39 }
 0xd16   : > { %7494 = vmatprep.subr.bf16.mxu1 %v7896_v46 }
 0xd19   : > { %7496 = vmatpush3.bf16.msra.mxu1 %v7495_v42  ;;  %v5884_v42 = vld [vmem:[%s9763_s13] ss:$0 sm:$0xff] }
 0xd1a   : > { %7497 = vmatprep.subr.bf16.mxu1 %v7896_v46 }
 0xd1d   : > { %7499 = vmatpush3.bf16.msra.mxu1 %v7498_v45 }
 0xd1e   : > { %7515 = vmatprep.subr.bf16.mxu1 %v7896_v46 }
 0xd20   : > { %6809 = vmatmul.mubr.msk.f32.vlgmr.msra.gmra.mrb[26].mxu1 %vm1067_vm2, %v8466_v18  ;;  %v5874_v18 = vld [vmem:[%s9760_s10 + $0x3] ss:$0 sm:$0xff] }
 0xd21   : > { %6879 = vmatprep.mubr.msk.f32.mxu1 %vm7897_vm1, %v7898_v2  ;;  %7517 = vmatpush3.bf16.msra.mxu1 %v7516_v37  ;;  %v5896_v37 = vld [vmem:[%s9816_s28 + $0x118] sm:$0xff] }
 0xd22   : > { %7518 = vmatprep.subr.bf16.mxu1 %v7896_v46 }
 0xdd3   : > { %v2549_v47 = vpop.f32.mrb[22].mxu1 }
 0xdd4   : > { %v2553_v48 = vadd.f32 %v2549_v47, %v8787_v53  ;;  %v6753_v49 = vpop.f32.mrb[23].mxu1 }
 0xdd5   : > { %v3193_v49 = vld [vmem:[%s9767_s17 + $0x18] sm:$0xff] }
 0xde3   : > { %v2637_v51 = vpop.f32.mrb[24].mxu1 }
 0xde4   : > { %v2638_v52 = vadd.f32 %v5852_v50, %v2637_v51  ;;  %v6772_v55 = vpop.f32.mrb[25].mxu1  ;;  %v3194_v51 = vld [vmem:[%s9767_s17 + $0x20] sm:$0xff] }
 0xde6   : > { %6814 = vmatmul.mubr.msk.f32.vlgmr.msra.gmra.mrb[20].mxu0 %vm1311_vm3, %v2638_v52  ;;  %v3195_v52 = vld [vmem:[%s9767_s17 + $0x28] sm:$0xff] }
 0xde7   : > { %6818 = vmatprep.mubr.msk.f32.mxu0 %vm7897_vm1, %v7898_v2  ;;  %v7522_v55 = vpack.c.bf16 %v3195_v52, %v3194_v51  ;;  %v5921_v52 = vld [vmem:[%s9759_s9 + $0x130] sm:$0xff] }
 0xdf3   : > { %v2811_v56 = vpop.f32.mrb[26].mxu1 }
 0xdf4   : > { %v2812_v57 = vadd.f32 %v5874_v18, %v2811_v56  ;;  %v6810_v53 = vpop.f32.mrb[27].mxu1  ;;  %v3196_v18 = vld [vmem:[%s9767_s17 + $0x30] sm:$0xff]  ;;  %v3197_v56 = vld [vmem:[%s9767_s17 + $0x38] sm:$0xff] }
 0xdf5   : > { %v3198_v53 = vld [vmem:[%s9767_s17 + $0x40] sm:$0xff] }
 0xdf6   : > { %6817 = vmatpush3.msk.msra.mxu0 %vm1404_vm4, %v2812_v57  ;;  %v7525_v57 = vpack.c.bf16 %v3197_v56, %v3196_v18 }
 0xdf7   : > { %7500 = vmatprep.subr.bf16.mxu0 %v7896_v46 }
 0xeb9   : > { %v2887_v58 = vpop.f32.mrb[20].mxu0 }
 0xeba   : > { %v6815_v59 = vpop.f32.mrb[21].mxu0  ;;  %v2891_v60 = vsel %vm1388_vm5, %v2887_v58, -inf }
 0xebb   : > { %2892 = vmax.xlane.f32.xlu0 %v2891_v60  ;;  %v3200_v60 = vld [vmem:[%s9767_s17 + $0x50] sm:$0xff] }
 0xf48   : > { %v2893_v61 = vpop.xlane.xlu0 %2892 }
 0xf49   : > { %v2894_v54 = vsub.f32 %v2887_v58, %v2893_v61  ;;  %v3199_v58 = vld [vmem:[%s9767_s17 + $0x48] sm:$0xff]  ;;  %v3201_v61 = vld [vmem:[%s9767_s17 + $0x58] sm:$0xff] }
 0xf4a   : > { %v7528_v59 = vpack.c.bf16 %v3199_v58, %v3198_v53 }
 0xf4b   : > { %v2895_v62 = vmul.f32 1.442695, %v2894_v54  ;;  %v7531_v54 = vpack.c.bf16 %v3201_v61, %v3200_v60  ;;  %v5904_v61 = vld [vmem:[%s9819_s27 + $0x100] sm:$0xff] }
 0xf4d   : > { %7800 = vpow2.f32 %v2895_v62  ;;  %v3202_v62 = vld [vmem:[%s9767_s17 + $0x60] sm:$0xff] }
 0xf57   : > { %v7801_v63 = vpop.eup %7800 }
 0xf58   : > { %v2897_v0 = vsel %vm1388_vm5, %v7801_v63, 0.0 }
 0xf59   : > { %2898 = vadd.xlane.f32.xlu1 %v2897_v0 }
 0xfe6   : > { %v2899_v1 = vpop.xlane.xlu1 %2898 }
 0xfe7   : > { %7802 = vrcp.f32 %v2899_v1  ;;  %v3204_v1 = vld [vmem:[%s9767_s17 + $0x70] sm:$0xff] }
 0xfe8   : > { %v7537_v4 = vpack.c.bf16 %v3205_v3, %v3204_v1  ;;  %v5906_v3 = vld [vmem:[%s9819_s27 + $0x110] sm:$0xff] }
 0xff1   : > { %v7803_v5 = vpop.eup %7802 }
 0xff2   : > { %v2901_v7 = vmul.f32 %v7803_v5, %v7801_v63  ;;  %v3203_v63 = vld [vmem:[%s9767_s17 + $0x68] sm:$0xff]  ;;  %v5886_v5 = vld [vmem:[%s9766_s16] ss:$0 sm:$0xff] }
 0xff3   : > { %v7534_v0 = vpack.c.bf16 %v3203_v63, %v3202_v62  ;;  %v5892_v62 = vld [vmem:[%s9820_s6 + $0x1] ss:$0 sm:$0xff] }
 0xff4   : > { %6819 = vmatmul.mubr.msk.f32.vlgmr.msra.gmra.mrb[22].mxu0 %vm1400_vm6, %v2901_v7 }
 0xff5   : > { %7502 = vmatpush3.bf16.msra.mxu0 %v7501_v6  ;;  %6825 = vmatprep.mubr.msk.f32.mxu0 %vm7897_vm1, %v7898_v2 }
 0xff6   : > { %7503 = vmatprep.subr.bf16.mxu0 %v7896_v46 }
0x10c7   : > { %v2974_v8 = vpop.f32.mrb[22].mxu0 }
0x10c8   : > { %v6820_v9 = vpop.f32.mrb[23].mxu0  ;;  %6826 = vmatmul.mubr.msk.f32.vlgmr.msra.gmra.mrb[24].mxu0 %vm1311_vm3, %v2974_v8 }
0x10c9   : > { %6844 = vmatprep.mubr.msk.f32.mxu0 %vm7897_vm1, %v7898_v2 }
0x119b   : > { %v3050_v10 = vpop.f32.mrb[24].mxu0 }
0x119c   : > { %v3054_v11 = vadd.f32 %v3050_v10, %v2553_v48  ;;  %v6827_v12 = vpop.f32.mrb[25].mxu0  ;;  %v3192_v48 = vld [vmem:[%s9767_s17 + $0x10] sm:$0xff] }
0x119d   : > { %v7519_v50 = vpack.c.bf16 %v3193_v49, %v3192_v48  ;;  %v5899_v49 = vld [vmem:[%s9816_s28 + $0x130] sm:$0xff] }
0x119e   : > { %v3055_v14 = vadd.f32 %v3054_v11, %v8377_v34  ;;  %v3094_v34 = vld [vmem:[%s9765_s15 + $0x8] sm:$0xff] }
0x119f   : > { %v7504_v24 = vpack.c.bf16 %v3094_v34, %v3093_v23  ;;  %7520 = vmatpush3.bf16.msra.mxu1 %v7519_v50  ;;  %v5900_v50 = vld [vmem:[%s9816_s28 + $0x138] sm:$0xff] }
0x11a0   : > { %v8915_v15 = vadd.f32 %v5883_v13, %v3055_v14  ;;  %7521 = vmatprep.subr.bf16.mxu1 %v7896_v46  ;;  %v7549_v51 = vpack.c.bf16 %v5900_v50, %v5899_v49  ;;  %v5961_v49 = vld [vmem:[%s9759_s9 + $0x178] sm:$0xff] }
0x11a1   : > { %7505 = vmatpush3.bf16.msra.mxu0 %v7504_v24 }
0x11a2   : > { %v3066_v16 = vsel %vm1023_vm0, %v8915_v15, 0.0  ;;  %7506 = vmatprep.subr.bf16.mxu0 %v7896_v46 }
0x11a3   : > { %3067 = vadd.xlane.f32.xlu0 %v3066_v16  ;;  %7523 = vmatpush3.bf16.msra.mxu1 %v7522_v55  ;;  %v5922_v55 = vld [vmem:[%s9759_s9 + $0x138] sm:$0xff] }
0x11a4   : > { %7524 = vmatprep.subr.bf16.mxu1 %v7896_v46  ;;  %v7573_v18 = vpack.c.bf16 %v5922_v55, %v5921_v52  ;;  %v5974_v52 = vld [vmem:[%s9816_s28 + $0x188] sm:$0xff] }
0x11a5   : > { %7508 = vmatpush3.bf16.msra.mxu0 %v7507_v27 }
0x11a6   : > { %7509 = vmatprep.subr.bf16.mxu0 %v7896_v46 }
0x11a7   : > { %7526 = vmatpush3.bf16.msra.mxu1 %v7525_v57 }
0x11a8   : > { %7527 = vmatprep.subr.bf16.mxu1 %v7896_v46 }
0x11a9   : > { %7511 = vmatpush3.bf16.msra.mxu0 %v7510_v30  ;;  %v5893_v30 = vld [vmem:[%s9816_s28 + $0x100] sm:$0xff] }
0x11aa   : > { %7512 = vmatprep.subr.bf16.mxu0 %v7896_v46 }
0x11ab   : > { %7529 = vmatpush3.bf16.msra.mxu1 %v7528_v59  ;;  %v5891_v59 = vld [vmem:[%s9817_s1 + $0x1] ss:$0 sm:$0xff]  ;;  %s9825_s1 = sld [smem:[#allocation22_spill]] }
0x11ac   : > { %7530 = vmatprep.subr.bf16.mxu1 %v7896_v46 }
0x11ad   : > { %7514 = vmatpush3.bf16.msra.mxu0 %v7513_v33  ;;  %v5916_v33 = vld [vmem:[%s9759_s9 + $0x108] sm:$0xff] }
0x11ae   : > { %7539 = vmatprep.subr.bf16.mxu0 %v7896_v46  ;;  %v7564_v35 = vpack.c.bf16 %v5916_v33, %v5915_v32  ;;  %v5937_v32 = vld [vmem:[%s9816_s28 + $0x168] sm:$0xff] }
0x11af   : > { %7532 = vmatpush3.bf16.msra.mxu1 %v7531_v54  ;;  %v5905_v54 = vld [vmem:[%s9819_s27 + $0x108] sm:$0xff] }
0x11b0   : > { %7533 = vmatprep.subr.bf16.mxu1 %v7896_v46 }
0x11b1   : > { %s9708_s6 = scalar_lea.hbm %s9825_s1, %s6091_s2 }
0x11b3   : > { %7535 = vmatpush3.bf16.msra.mxu1 %v7534_v0  ;;  %v7552_v0 = vpack.c.bf16 %v5905_v54, %v5904_v61  ;;  %v5980_v61 = vld [vmem:[%s9816_s28 + $0x1b8] sm:$0xff] }
0x11b4   : > { %7536 = vmatprep.subr.bf16.mxu1 %v7896_v46 }
0x11b7   : > { %7538 = vmatpush3.bf16.msra.mxu1 %v7537_v4  ;;  %v5907_v4 = vld [vmem:[%s9819_s27 + $0x118] sm:$0xff] }
0x11b8   : > { %7563 = vmatprep.subr.bf16.mxu1 %v7896_v46 }
0x1230   : > { %v3068_v17 = vpop.xlane.xlu0 %3067 }
0x1231   : > { %v3069_v19 = vmul.f32 0.015625, %v3068_v17 }
0x1233   : > { %v3070_v20 = vsub.f32 %v8915_v15, %v3069_v19 }
0x1235   : > { %v3071_v21 = vmul.f32 %v3070_v20, %v3070_v20 }
0x1237   : > { %v3072_v22 = vsel %vm1023_vm0, %v3071_v21, 0.0 }
0x1238   : > { %3073 = vadd.xlane.f32.xlu1 %v3072_v22 }
0x12c5   : > { %v3074_v38 = vpop.xlane.xlu1 %3073 }
0x12c6   : > { %v3075_v39 = vmul.f32 0.015625, %v3074_v38  ;;  %v7543_v38 = vpack.c.bf16 %v5896_v37, %v5895_v36  ;;  %v5939_v36 = vld [vmem:[%s9816_s28 + $0x178] sm:$0xff] }
0x12c8   : > { %v3076_v40 = vadd.f32 1e-12, %v3075_v39  ;;  %v5917_v39 = vld [vmem:[%s9759_s9 + $0x110] sm:$0xff] }
0x12ca   : > { %7804 = vrsqrt.f32 %v3076_v40  ;;  %v5918_v40 = vld [vmem:[%s9759_s9 + $0x118] sm:$0xff] }
0x12d4   : > { %v7805_v41 = vpop.eup %7804 }
0x12d5   : > { %v3078_v43 = vmul.f32 %v7805_v41, %v3070_v20  ;;  %v5888_v20 = vld [vmem:[%s9768_s18] ss:$0 sm:$0xff]  ;;  %v7567_v41 = vpack.c.bf16 %v5918_v40, %v5917_v39  ;;  %v5955_v39 = vld [vmem:[%s9759_s9 + $0x148] sm:$0xff] }
0x12d7   : > { %v3085_v45 = vmul.f32 %v5884_v42, %v3078_v43  ;;  %v5897_v42 = vld [vmem:[%s9816_s28 + $0x120] sm:$0xff]  ;;  %v5898_v43 = vld [vmem:[%s9816_s28 + $0x128] sm:$0xff] }
0x12d9   : > { %v3092_v47 = vadd.f32 %v5885_v44, %v3085_v45  ;;  %v7546_v44 = vpack.c.bf16 %v5898_v43, %v5897_v42  ;;  %v5919_v45 = vld [vmem:[%s9759_s9 + $0x120] sm:$0xff]  ;;  %v5957_v42 = vld [vmem:[%s9759_s9 + $0x158] sm:$0xff] }
0x12db   : > { %6845 = vmatmul.mubr.msk.f32.vlgmr.msra.gmra.mrb[26].mxu0 %vm1067_vm2, %v3092_v47  ;;  %v5920_v47 = vld [vmem:[%s9759_s9 + $0x128] sm:$0xff] }
0x12dc   : > { %6898 = vmatprep.mubr.msk.f32.mxu0 %vm7897_vm1, %v7898_v2  ;;  %v7570_v48 = vpack.c.bf16 %v5920_v47, %v5919_v45  ;;  %v5959_v45 = vld [vmem:[%s9759_s9 + $0x168] sm:$0xff] }
0x13ae   : > { %v3177_v6 = vpop.f32.mrb[26].mxu0 }
0x13af   : > { %v3178_v7 = vadd.f32 %v5886_v5, %v3177_v6  ;;  %v6846_v8 = vpop.f32.mrb[27].mxu0  ;;  %v7555_v5 = vpack.c.bf16 %v5907_v4, %v5906_v3  ;;  %v5908_v6 = vld [vmem:[%s9819_s27 + $0x120] sm:$0xff]  ;;  %v5997_v3 = vld [vmem:[%s9759_s9 + $0x190] sm:$0xff]  ;;  %v5998_v4 = vld [vmem:[%s9759_s9 + $0x198] sm:$0xff] }
0x13b1   : > { %v3182_v9 = vmul.f32 0.044715, %v3178_v7  ;;  %v3181_v16 = vmul.f32 0.5, %v3178_v7 }
0x13b3   : > { %v3183_v10 = vmul.f32 %v3182_v9, %v3178_v7  ;;  %v5910_v9 = vld [vmem:[%s9819_s27 + $0x130] sm:$0xff] }
0x13b5   : > { %v3184_v11 = vmul.f32 %v3183_v10, %v3178_v7  ;;  %v5911_v10 = vld [vmem:[%s9819_s27 + $0x138] sm:$0xff] }
0x13b7   : > { %v3185_v12 = vadd.f32 %v3184_v11, %v3178_v7  ;;  %v5909_v7 = vld [vmem:[%s9819_s27 + $0x128] sm:$0xff]  ;;  %v7561_v11 = vpack.c.bf16 %v5911_v10, %v5910_v9  ;;  %v6001_v9 = vld [vmem:[%s9759_s9 + $0x1b0] sm:$0xff]  ;;  %v6002_v10 = vld [vmem:[%s9759_s9 + $0x1b8] sm:$0xff] }
0x13b8   : > { %v7558_v8 = vpack.c.bf16 %v5909_v7, %v5908_v6  ;;  %v5999_v6 = vld [vmem:[%s9759_s9 + $0x1a0] sm:$0xff]  ;;  %v6000_v7 = vld [vmem:[%s9759_s9 + $0x1a8] sm:$0xff] }
0x13b9   : > { %v3186_v13 = vmul.f32 0.7978846, %v3185_v12  ;;  %v5924_v12 = vld [vmem:[%s9760_s10 + $0x4] ss:$0 sm:$0xff] }
0x13bb   : > { %7806 = vtanh.f32 %v3186_v13 }
0x13c5   : > { %v7807_v14 = vpop.eup %7806 }
0x13c6   : > { %v3188_v17 = vadd.f32 1.0, %v7807_v14 }
0x13c8   : > { %v3189_v19 = vmul.f32 %v3188_v17, %v3181_v16 }
0x13ca   : > { %6880 = vmatmul.mubr.f32.vlgmr.msra.gmra.mrb[28].mxu1 %v3189_v19 }
0x13cb   : > { %6936 = vmatprep.mubr.msk.f32.mxu1 %vm7897_vm1, %v7898_v2  ;;  %7565 = vmatpush3.bf16.msra.mxu1 %v7564_v35  ;;  %v5938_v35 = vld [vmem:[%s9816_s28 + $0x170] sm:$0xff] }
0x13cc   : > { %7566 = vmatprep.subr.bf16.mxu1 %v7896_v46  ;;  %v7585_v37 = vpack.c.bf16 %v5939_v36, %v5938_v35 }
0x13cf   : > { %7568 = vmatpush3.bf16.msra.mxu1 %v7567_v41  ;;  %v5956_v41 = vld [vmem:[%s9759_s9 + $0x150] sm:$0xff] }
0x13d0   : > { %7569 = vmatprep.subr.bf16.mxu1 %v7896_v46  ;;  %v7603_v43 = vpack.c.bf16 %v5957_v42, %v5956_v41 }
0x13d3   : > { %7571 = vmatpush3.bf16.msra.mxu1 %v7570_v48  ;;  %v5960_v48 = vld [vmem:[%s9759_s9 + $0x170] sm:$0xff] }
0x13d4   : > { %7572 = vmatprep.subr.bf16.mxu1 %v7896_v46  ;;  %v7609_v50 = vpack.c.bf16 %v5961_v49, %v5960_v48  ;;  %v5943_v48 = vld [vmem:[%s9819_s27 + $0x140] sm:$0xff]  ;;  %v5944_v49 = vld [vmem:[%s9819_s27 + $0x148] sm:$0xff] }
0x13d7   : > { %7574 = vmatpush3.bf16.msra.mxu1 %v7573_v18  ;;  %v5975_v18 = vld [vmem:[%s9816_s28 + $0x190] sm:$0xff] }
0x13d8   : > { %6944 = vmatprep.subr.mxu1 %v7898_v2 }
0x149d   : > { %v3279_v21 = vpop.f32.mrb[28].mxu1 }
0x149e   : > { %v3280_v22 = vadd.f32 %v5888_v20, %v3279_v21  ;;  %v6881_v23 = vpop.f32.mrb[29].mxu1  ;;  %v5913_v20 = vld [vmem:[%s9821_s8 + $0x4] ss:$0 sm:$0xff] }
0x149f   : > { %v5933_v23 = vld [vmem:[%s9816_s28 + $0x148] sm:$0xff] }
0x14a0   : > { %v9023_v34 = vadd.f32 %v3280_v22, %v8915_v15  ;;  %v5894_v15 = vld [vmem:[%s9816_s28 + $0x108] sm:$0xff]  ;;  %v5932_v22 = vld [vmem:[%s9816_s28 + $0x140] sm:$0xff] }
0x14a1   : > { %v7540_v31 = vpack.c.bf16 %v5894_v15, %v5893_v30  ;;  %v5935_v30 = vld [vmem:[%s9816_s28 + $0x158] sm:$0xff] }
0x14a2   : > { %v3288_v24 = vsel %vm1023_vm0, %v9023_v34, 0.0 }
0x14a3   : > { %3289 = vadd.xlane.f32.xlu0 %v3288_v24  ;;  %7541 = vmatpush3.bf16.msra.mxu0 %v7540_v31  ;;  %v5902_v24 = vld [vmem:[%s9822_s29 + $0x4] ss:$0 sm:$0xff] }
0x14a4   : > { %7542 = vmatprep.subr.bf16.mxu0 %v7896_v46  ;;  %v5936_v31 = vld [vmem:[%s9816_s28 + $0x160] sm:$0xff] }
0x14a5   : > { %v7582_v33 = vpack.c.bf16 %v5937_v32, %v5936_v31 }
0x14a7   : > { %7544 = vmatpush3.bf16.msra.mxu0 %v7543_v38  ;;  %v5954_v38 = vld [vmem:[%s9759_s9 + $0x140] sm:$0xff] }
0x14a8   : > { %7545 = vmatprep.subr.bf16.mxu0 %v7896_v46  ;;  %v7600_v40 = vpack.c.bf16 %v5955_v39, %v5954_v38 }
0x14ab   : > { %7547 = vmatpush3.bf16.msra.mxu0 %v7546_v44  ;;  %v5958_v44 = vld [vmem:[%s9759_s9 + $0x160] sm:$0xff] }
0x14ac   : > { %7548 = vmatprep.subr.bf16.mxu0 %v7896_v46  ;;  %v7606_v47 = vpack.c.bf16 %v5959_v45, %v5958_v44 }
0x14af   : > { %7550 = vmatpush3.bf16.msra.mxu0 %v7549_v51  ;;  %v5973_v51 = vld [vmem:[%s9816_s28 + $0x180] sm:$0xff] }
0x14b0   : > { %7551 = vmatprep.subr.bf16.mxu0 %v7896_v46  ;;  %v7618_v55 = vpack.c.bf16 %v5974_v52, %v5973_v51  ;;  %v7588_v51 = vpack.c.bf16 %v5944_v49, %v5943_v48 }
0x1530   : > { %v3290_v25 = vpop.xlane.xlu0 %3289 }
0x1531   : > { %v3291_v26 = vmul.f32 0.015625, %v3290_v25 }
0x1533   : > { %v3292_v27 = vsub.f32 %v9023_v34, %v3291_v26 }
0x1535   : > { %v3293_v28 = vmul.f32 %v3292_v27, %v3292_v27 }
0x1537   : > { %v3294_v29 = vsel %vm1023_vm0, %v3293_v28, 0.0 }
0x1538   : > { %3295 = vadd.xlane.f32.xlu1 %v3294_v29  ;;  %v5934_v29 = vld [vmem:[%s9816_s28 + $0x150] sm:$0xff] }
0x1539   : > { %v7579_v15 = vpack.c.bf16 %v5935_v30, %v5934_v29 }
0x15c5   : > { %v3296_v56 = vpop.xlane.xlu1 %3295 }
0x15c6   : > { %v3297_v57 = vmul.f32 0.015625, %v3296_v56  ;;  %v5976_v56 = vld [vmem:[%s9816_s28 + $0x198] sm:$0xff] }
0x15c8   : > { %v3298_v53 = vadd.f32 1e-12, %v3297_v57  ;;  %v7621_v57 = vpack.c.bf16 %v5976_v56, %v5975_v18  ;;  %v5946_v18 = vld [vmem:[%s9819_s27 + $0x158] sm:$0xff] }
0x15ca   : > { %7808 = vrsqrt.f32 %v3298_v53  ;;  %v5977_v53 = vld [vmem:[%s9816_s28 + $0x1a0] sm:$0xff] }
0x15d4   : > { %v7809_v58 = vpop.eup %7808 }
0x15d5   : > { %v3300_v60 = vmul.f32 %v7809_v58, %v3292_v27  ;;  %v7576_v27 = vpack.c.bf16 %v5933_v23, %v5932_v22  ;;  %v5978_v58 = vld [vmem:[%s9816_s28 + $0x1a8] sm:$0xff]  ;;  %v6030_v23 = vld [vmem:[%s9819_s27 + $0x1f0] sm:$0xff] }
0x15d7   : > { %v3307_v63 = vmul.f32 %v5891_v59, %v3300_v60  ;;  %v7624_v59 = vpack.c.bf16 %v5978_v58, %v5977_v53  ;;  %v5979_v60 = vld [vmem:[%s9816_s28 + $0x1b0] sm:$0xff]  ;;  %v5948_v53 = vld [vmem:[%s9819_s27 + $0x168] sm:$0xff] }
0x15d8   : > { %v7627_v54 = vpack.c.bf16 %v5980_v61, %v5979_v60  ;;  %v5950_v60 = vld [vmem:[%s9819_s27 + $0x178] sm:$0xff] }
0x15d9   : > { %v9097_v1 = vadd.f32 %v5892_v62, %v3307_v63  ;;  %v5995_v62 = vld [vmem:[%s9759_s9 + $0x180] sm:$0xff]  ;;  %v5996_v63 = vld [vmem:[%s9759_s9 + $0x188] sm:$0xff] }
0x15db   : > { %6899 = vmatmul.mubr.msk.f32.vlgmr.msra.gmra.mrb[28].mxu0 %vm1067_vm2, %v9097_v1  ;;  %6937 = vmatmul.mubr.msk.f32.vlgmr.msra.gmra.mrb[30].mxu1 %vm1067_vm2, %v9097_v1 }
0x15dc   : > { %7553 = vmatpush3.bf16.msra.mxu0 %v7552_v0  ;;  %6917 = vmatprep.mubr.msk.f32.mxu0 %vm7897_vm1, %v7898_v2  ;;  %v7642_v0 = vpack.c.bf16 %v5996_v63, %v5995_v62  ;;  %v5952_v63 = vld [vmem:[%s9821_s8 + $0x5] ss:$0 sm:$0xff] }
0x15dd   : > { %7554 = vmatprep.subr.bf16.mxu0 %v7896_v46  ;;  %6946 = vmatprep.mubr.msk.f32.mxu1 %vm7897_vm1, %v7898_v2 }
0x15e0   : > { %7556 = vmatpush3.bf16.msra.mxu0 %v7555_v5  ;;  %v7645_v5 = vpack.c.bf16 %v5998_v4, %v5997_v3  ;;  %v5941_v3 = vld [vmem:[%s9822_s29 + $0x5] ss:$0 sm:$0xff] }
0x15e1   : > { %7557 = vmatprep.subr.bf16.mxu0 %v7896_v46 }
0x15e4   : > { %7559 = vmatpush3.bf16.msra.mxu0 %v7558_v8  ;;  %v7648_v8 = vpack.c.bf16 %v6000_v7, %v5999_v6  ;;  %v5963_v6 = vld [vmem:[%s9760_s10 + $0x5] ss:$0 sm:$0xff] }
0x15e5   : > { %7560 = vmatprep.subr.bf16.mxu0 %v7896_v46 }
0x15e8   : > { %7562 = vmatpush3.bf16.msra.mxu0 %v7561_v11  ;;  %v7651_v11 = vpack.c.bf16 %v6002_v10, %v6001_v9 }
0x15e9   : > { %6939 = vmatprep.subr.mxu0 %v7898_v2 }
0x15eb   : > { %6918 = vmatmul.mubr.msk.f32.vlgmr.msra.gmra.mrb[30].mxu0 %vm1067_vm2, %v9097_v1 }
0x15ec   : > { %6941 = vmatprep.mubr.msk.f32.mxu0 %vm7897_vm1, %v7898_v2 }
0x16ae   : > { %v3401_v13 = vpop.f32.mrb[28].mxu0  ;;  %v3575_v14 = vpop.f32.mrb[30].mxu1 }
0x16af   : > { %v3576_v16 = vadd.f32 %v5924_v12, %v3575_v14  ;;  %v6900_v17 = vpop.f32.mrb[29].mxu0  ;;  %v6938_v19 = vpop.f32.mrb[31].mxu1  ;;  %v3402_v28 = vadd.f32 %v5902_v24, %v3401_v13  ;;  %v6024_v12 = vld [vmem:[%s9819_s27 + $0x1c0] sm:$0xff]  ;;  %v6025_v13 = vld [vmem:[%s9819_s27 + $0x1c8] sm:$0xff]  ;;  %v6031_v24 = vld [vmem:[%s9819_s27 + $0x1f8] sm:$0xff] }
0x16b0   : > { %v7669_v14 = vpack.c.bf16 %v6025_v13, %v6024_v12  ;;  %v6027_v17 = vld [vmem:[%s9819_s27 + $0x1d8] sm:$0xff] }
0x16b1   : > { %6945 = vmatpush3.msk.msra.mxu1 %vm1404_vm4, %v3576_v16  ;;  %v6026_v16 = vld [vmem:[%s9819_s27 + $0x1d0] sm:$0xff] }
0x16b2   : > { %7587 = vmatprep.subr.bf16.mxu1 %v7896_v46  ;;  %v7672_v19 = vpack.c.bf16 %v6027_v17, %v6026_v16 }
0x16be   : > { %v3488_v21 = vpop.f32.mrb[30].mxu0 }
0x16bf   : > { %v3489_v25 = vadd.f32 %v5913_v20, %v3488_v21  ;;  %v6919_v26 = vpop.f32.mrb[31].mxu0  ;;  %v6028_v20 = vld [vmem:[%s9819_s27 + $0x1e0] sm:$0xff]  ;;  %v6029_v21 = vld [vmem:[%s9819_s27 + $0x1e8] sm:$0xff] }
0x16c0   : > { %v7675_v22 = vpack.c.bf16 %v6029_v21, %v6028_v20  ;;  %v5969_v20 = vld [vmem:[%s9761_s11 + $0x50] sm:$0xff]  ;;  %v5970_v21 = vld [vmem:[%s9761_s11 + $0x58] sm:$0xff] }
0x16c1   : > { %6940 = vmatpush3.xpose.msk.msra.mxu0 %vm1311_vm3, %v3489_v25  ;;  %v7678_v25 = vpack.c.bf16 %v6031_v24, %v6030_v23  ;;  %v7612_v23 = vpack.c.bf16 %v5970_v21, %v5969_v20  ;;  %v6019_v20 = vld [vmem:[%s9816_s28 + $0x1f0] sm:$0xff]  ;;  %v6020_v21 = vld [vmem:[%s9816_s28 + $0x1f8] sm:$0xff] }
0x16c2   : > { %7575 = vmatprep.subr.bf16.mxu0 %v7896_v46 }
0x16c4   : > { %6942 = vmatmul.mubr.msk.f32.vlgmr.msra.gmra.mrb[32].mxu0 %vm1311_vm3, %v3402_v28 }
0x16c5   : > { %7577 = vmatpush3.bf16.msra.mxu0 %v7576_v27  ;;  %6965 = vmatprep.mubr.msk.f32.mxu0 %vm7897_vm1, %v7898_v2 }
0x16c6   : > { %7578 = vmatprep.subr.bf16.mxu0 %v7896_v46 }
0x16c9   : > { %7580 = vmatpush3.bf16.msra.mxu0 %v7579_v15 }
0x16ca   : > { %7581 = vmatprep.subr.bf16.mxu0 %v7896_v46 }
0x16cd   : > { %7583 = vmatpush3.bf16.msra.mxu0 %v7582_v33 }
0x16ce   : > { %7584 = vmatprep.subr.bf16.mxu0 %v7896_v46 }
0x16d1   : > { %7586 = vmatpush3.bf16.msra.mxu0 %v7585_v37  ;;  %v6033_v37 = vld [vmem:[%s9821_s8 + $0x7] ss:$0 sm:$0xff] }
0x16d2   : > { %7599 = vmatprep.subr.bf16.mxu0 %v7896_v46 }
0x16d4   : > { %6966 = vmatmul.mubr.msk.f32.vlgmr.msra.gmra.mrb[34].mxu0 %vm1067_vm2, %v9097_v1 }
0x16d5   : > { %7601 = vmatpush3.bf16.msra.mxu0 %v7600_v40  ;;  %7003 = vmatprep.mubr.msk.f32.mxu0 %vm7897_vm1, %v7898_v2 }
0x16d6   : > { %7602 = vmatprep.subr.bf16.mxu0 %v7896_v46 }
0x16d9   : > { %7604 = vmatpush3.bf16.msra.mxu0 %v7603_v43 }
0x16da   : > { %7605 = vmatprep.subr.bf16.mxu0 %v7896_v46 }
0x16dd   : > { %7607 = vmatpush3.bf16.msra.mxu0 %v7606_v47 }
0x16de   : > { %7608 = vmatprep.subr.bf16.mxu0 %v7896_v46 }
0x16e1   : > { %7610 = vmatpush3.bf16.msra.mxu0 %v7609_v50 }
0x16e2   : > { %7617 = vmatprep.subr.bf16.mxu0 %v7896_v46 }
0x16e4   : > { %7004 = vmatmul.mubr.msk.f32.vlgmr.msra.gmra.mrb[36].mxu0 %vm1067_vm2, %v9097_v1 }
0x16e5   : > { %7619 = vmatpush3.bf16.msra.mxu0 %v7618_v55  ;;  %7046 = vmatprep.mubr.msk.f32.mxu0 %vm7897_vm1, %v7898_v2  ;;  %v5945_v55 = vld [vmem:[%s9819_s27 + $0x150] sm:$0xff] }
0x16e6   : > { %7620 = vmatprep.subr.bf16.mxu0 %v7896_v46  ;;  %v7591_v56 = vpack.c.bf16 %v5946_v18, %v5945_v55 }
0x16e9   : > { %7622 = vmatpush3.bf16.msra.mxu0 %v7621_v57  ;;  %v5947_v57 = vld [vmem:[%s9819_s27 + $0x160] sm:$0xff] }
0x16ea   : > { %7623 = vmatprep.subr.bf16.mxu0 %v7896_v46  ;;  %v7594_v58 = vpack.c.bf16 %v5948_v53, %v5947_v57 }
0x16ed   : > { %7625 = vmatpush3.bf16.msra.mxu0 %v7624_v59  ;;  %v5949_v59 = vld [vmem:[%s9819_s27 + $0x170] sm:$0xff] }
0x16ee   : > { %7626 = vmatprep.subr.bf16.mxu0 %v7896_v46  ;;  %v7597_v61 = vpack.c.bf16 %v5950_v60, %v5949_v59 }
0x16f1   : > { %7628 = vmatpush3.bf16.msra.mxu0 %v7627_v54 }
0x16f2   : > { %7641 = vmatprep.subr.bf16.mxu0 %v7896_v46 }
0x16f4   : > { %7047 = vmatmul.mubr.msk.f32.vlgmr.msra.gmra.mrb[38].mxu0 %vm1067_vm2, %v9097_v1 }
0x16f5   : > { %7643 = vmatpush3.bf16.msra.mxu0 %v7642_v0  ;;  %7084 = vmatprep.mubr.msk.f32.mxu0 %vm7897_vm1, %v7898_v2 }
0x16f6   : > { %7644 = vmatprep.subr.bf16.mxu0 %v7896_v46 }
0x16f9   : > { %7646 = vmatpush3.bf16.msra.mxu0 %v7645_v5 }
0x16fa   : > { %7647 = vmatprep.subr.bf16.mxu0 %v7896_v46 }
0x16fd   : > { %7649 = vmatpush3.bf16.msra.mxu0 %v7648_v8 }
0x16fe   : > { %7650 = vmatprep.subr.bf16.mxu0 %v7896_v46 }
0x1701   : > { %7652 = vmatpush3.bf16.msra.mxu0 %v7651_v11 }
0x1702   : > { %7668 = vmatprep.subr.bf16.mxu0 %v7896_v46 }
0x1704   : > { %7085 = vmatmul.mubr.msk.f32.vlgmr.msra.gmra.mrb[40].mxu0 %vm1067_vm2, %v9097_v1 }
0x1705   : > { %7670 = vmatpush3.bf16.msra.mxu0 %v7669_v14  ;;  %7139 = vmatprep.mubr.msk.f32.mxu0 %vm7897_vm1, %v7898_v2 }
0x1706   : > { %7671 = vmatprep.subr.bf16.mxu0 %v7896_v46 }
0x1709   : > { %7673 = vmatpush3.bf16.msra.mxu0 %v7672_v19 }
0x170a   : > { %7674 = vmatprep.subr.bf16.mxu0 %v7896_v46 }
0x170d   : > { %7676 = vmatpush3.bf16.msra.mxu0 %v7675_v22 }
0x170e   : > { %7677 = vmatprep.subr.bf16.mxu0 %v7896_v46 }
0x1711   : > { %7679 = vmatpush3.bf16.msra.mxu0 %v7678_v25  ;;  %v5930_v25 = vld [vmem:[%s9761_s11 + $0x40] sm:$0xff] }
0x1712   : > { %7161 = vmatprep.subr.mxu0 %v7898_v2 }
0x1714   : > { %7140 = vmatmul.mubr.msk.f32.vlgmr.msra.gmra.mrb[42].mxu0 %vm1067_vm2, %v9097_v1 }
0x1715   : > { %7163 = vmatprep.mubr.msk.f32.mxu0 %vm7897_vm1, %v7898_v2 }
0x1797   : > { %v3651_v26 = vpop.f32.mrb[32].mxu0 }
0x1798   : > { %v6943_v27 = vpop.f32.mrb[33].mxu0  ;;  %v3655_v28 = vsel %vm1388_vm5, %v3651_v26, -inf }
0x1799   : > { %3656 = vmax.xlane.f32.xlu0 %v3655_v28  ;;  %v5984_v28 = vld [vmem:[%s9819_s27 + $0x180] sm:$0xff] }
0x17a7   : > { %v3828_v29 = vpop.f32.mrb[34].mxu0 }
0x17a8   : > { %v6967_v30 = vpop.f32.mrb[35].mxu0  ;;  %v3829_v7 = vadd.f32 %v5941_v3, %v3828_v29  ;;  %v5985_v29 = vld [vmem:[%s9819_s27 + $0x188] sm:$0xff] }
0x17a9   : > { %v6011_v3 = vld [vmem:[%s9761_s11 + $0x68] sm:$0xff] }
0x17b7   : > { %v4002_v15 = vpop.f32.mrb[36].mxu0 }
0x17b8   : > { %v7005_v31 = vpop.f32.mrb[37].mxu0  ;;  %v4003_v8 = vadd.f32 %v5963_v6, %v4002_v15 }
0x17b9   : > { %v7630_v31 = vpack.c.bf16 %v5985_v29, %v5984_v28  ;;  %v6039_v29 = vld [vmem:[%s9759_s9 + $0x1e0] sm:$0xff] }
0x17c7   : > { %v9310_v32 = vpop.f32.mrb[38].mxu0 }
0x17c8   : > { %v7048_v33 = vpop.f32.mrb[39].mxu0 }
0x17c9   : > { %v5986_v33 = vld [vmem:[%s9819_s27 + $0x190] sm:$0xff] }
0x17d7   : > { %v9312_v35 = vpop.f32.mrb[40].mxu0 }
0x17d8   : > { %v7086_v36 = vpop.f32.mrb[41].mxu0 }
0x17d9   : > { %v5987_v36 = vld [vmem:[%s9819_s27 + $0x198] sm:$0xff] }
0x17e7   : > { %v4989_v38 = vpop.f32.mrb[42].mxu0 }
0x17e8   : > { %v4990_v39 = vadd.f32 %v6033_v37, %v4989_v38  ;;  %v7141_v40 = vpop.f32.mrb[43].mxu0  ;;  %v7633_v37 = vpack.c.bf16 %v5987_v36, %v5986_v33  ;;  %v5988_v38 = vld [vmem:[%s9819_s27 + $0x1a0] sm:$0xff]  ;;  %v6042_v33 = vld [vmem:[%s9759_s9 + $0x1f8] sm:$0xff] }
0x17ea   : > { %7162 = vmatpush3.xpose.msk.msra.mxu0 %vm1311_vm3, %v4990_v39  ;;  %v5989_v39 = vld [vmem:[%s9819_s27 + $0x1a8] sm:$0xff] }
0x17eb   : > { %7166 = vmatprep.subr.mxu0 %v7898_v2  ;;  %v7636_v40 = vpack.c.bf16 %v5989_v39, %v5988_v38 }
0x1826   : > { %v3657_v41 = vpop.xlane.xlu0 %3656 }
0x1827   : > { %v3658_v42 = vsub.f32 %v3651_v26, %v3657_v41  ;;  %v5931_v26 = vld [vmem:[%s9761_s11 + $0x48] sm:$0xff]  ;;  %v5990_v41 = vld [vmem:[%s9819_s27 + $0x1b0] sm:$0xff] }
0x1828   : > { %v7615_v27 = vpack.c.bf16 %v5931_v26, %v5930_v25  ;;  %v6037_v26 = vld [vmem:[%s9759_s9 + $0x1d0] sm:$0xff] }
0x1829   : > { %v3659_v43 = vmul.f32 1.442695, %v3658_v42  ;;  %v5991_v42 = vld [vmem:[%s9819_s27 + $0x1b8] sm:$0xff] }
0x182b   : > { %7810 = vpow2.f32 %v3659_v43  ;;  %v7639_v43 = vpack.c.bf16 %v5991_v42, %v5990_v41 }
0x1835   : > { %v7811_v44 = vpop.eup %7810 }
0x1836   : > { %v3661_v45 = vsel %vm1388_vm5, %v7811_v44, 0.0 }
0x1837   : > { %3662 = vadd.xlane.f32.xlu1 %v3661_v45 }
0x18c4   : > { %v3663_v47 = vpop.xlane.xlu1 %3662 }
0x18c5   : > { %7812 = vrcp.f32 %v3663_v47 }
0x18cf   : > { %v7813_v50 = vpop.eup %7812 }
0x18d0   : > { %v3665_v52 = vmul.f32 %v7813_v50, %v7811_v44  ;;  %v5993_v50 = vld [vmem:[%s9821_s8 + $0x6] ss:$0 sm:$0xff]  ;;  %s5678_s8 = scalar_lea.sflag [#allocation3], %s701_s25 }
0x18d2   : > { %6947 = vmatmul.mubr.msk.f32.vlgmr.msra.gmra.mrb[32].mxu1 %vm1400_vm6, %v3665_v52  ;;  %v5982_v52 = vld [vmem:[%s9822_s29 + $0x6] ss:$0 sm:$0xff] }
0x18d3   : > { %7589 = vmatpush3.bf16.msra.mxu1 %v7588_v51  ;;  %6984 = vmatprep.mubr.msk.f32.mxu1 %vm7897_vm1, %v7898_v2  ;;  %v4402_v57 = vadd.f32 %v5982_v52, %v9310_v32 }
0x18d4   : > { %7590 = vmatprep.subr.bf16.mxu1 %v7896_v46 }
0x18d7   : > { %7592 = vmatpush3.bf16.msra.mxu1 %v7591_v56  ;;  %v6004_v56 = vld [vmem:[%s9760_s10 + $0x6] ss:$0 sm:$0xff] }
0x18d8   : > { %7593 = vmatprep.subr.bf16.mxu1 %v7896_v46  ;;  %v4576_v53 = vadd.f32 %v6004_v56, %v9312_v35 }
0x18db   : > { %7595 = vmatpush3.bf16.msra.mxu1 %v7594_v58 }
0x18dc   : > { %7596 = vmatprep.subr.bf16.mxu1 %v7896_v46 }
0x18df   : > { %7598 = vmatpush3.bf16.msra.mxu1 %v7597_v61 }
0x18e0   : > { %7006 = vmatprep.subr.mxu1 %v7898_v2 }
0x18e2   : > { %6985 = vmatmul.mubr.msk.f32.vlgmr.msra.gmra.mrb[34].mxu1 %vm1067_vm2, %v9097_v1 }
0x18e3   : > { %7008 = vmatprep.mubr.msk.f32.mxu1 %vm7897_vm1, %v7898_v2 }
0x19a5   : > { %v3738_v54 = vpop.f32.mrb[32].mxu1 }
0x19a6   : > { %v6948_v62 = vpop.f32.mrb[33].mxu1 }
0x19b5   : > { %v3915_v0 = vpop.f32.mrb[34].mxu1 }
0x19b6   : > { %v3916_v4 = vadd.f32 %v5952_v63, %v3915_v0  ;;  %v6986_v5 = vpop.f32.mrb[35].mxu1  ;;  %v6010_v0 = vld [vmem:[%s9761_s11 + $0x60] sm:$0xff] }
0x19b7   : > { %v7654_v5 = vpack.c.bf16 %v6011_v3, %v6010_v0  ;;  %v6054_v0 = vld [vmem:[%s9762_s12 + $0x1] ss:$0 sm:$0xff] }
0x19b8   : > { %7007 = vmatpush3.xpose.msk.msra.mxu1 %vm1311_vm3, %v3916_v4 }
0x19b9   : > { %7011 = vmatprep.subr.mxu1 %v7898_v2 }
0x19bb   : > { %7009 = vmatmul.mubr.msk.f32.vlgmr.msra.gmra.mrb[36].mxu1 %vm1311_vm3, %v3829_v7  ;;  %v6013_v7 = vld [vmem:[%s9816_s28 + $0x1c0] sm:$0xff] }
0x19bc   : > { %7012 = vmatpush3.msk.msra.mxu1 %vm1404_vm4, %v4003_v8  ;;  %7013 = vmatprep.mubr.msk.f32.mxu1 %vm7897_vm1, %v7898_v2  ;;  %v6014_v8 = vld [vmem:[%s9816_s28 + $0x1c8] sm:$0xff] }
0x19bd   : > { %7611 = vmatprep.subr.bf16.mxu1 %v7896_v46 }
0x1a8e   : > { %v4078_v9 = vpop.f32.mrb[36].mxu1 }
0x1a8f   : > { %v7010_v10 = vpop.f32.mrb[37].mxu1  ;;  %v4082_v11 = vsel %vm1388_vm5, %v4078_v9, -inf }
0x1a90   : > { %4083 = vmax.xlane.f32.xlu0 %v4082_v11  ;;  %v6015_v10 = vld [vmem:[%s9816_s28 + $0x1d0] sm:$0xff]  ;;  %v6016_v11 = vld [vmem:[%s9816_s28 + $0x1d8] sm:$0xff] }
0x1b1d   : > { %v4084_v12 = vpop.xlane.xlu0 %4083 }
0x1b1e   : > { %v4085_v13 = vsub.f32 %v4078_v9, %v4084_v12  ;;  %v7657_v9 = vpack.c.bf16 %v6014_v8, %v6013_v7 }
0x1b20   : > { %v4086_v14 = vmul.f32 1.442695, %v4085_v13 }
0x1b22   : > { %7814 = vpow2.f32 %v4086_v14  ;;  %v7660_v14 = vpack.c.bf16 %v6016_v11, %v6015_v10  ;;  %v6059_v11 = vld [vmem:[%s9765_s15 + $0x40] sm:$0xff] }
0x1b2c   : > { %v7815_v16 = vpop.eup %7814 }
0x1b2d   : > { %v4088_v17 = vsel %vm1388_vm5, %v7815_v16, 0.0 }
0x1b2e   : > { %4089 = vadd.xlane.f32.xlu1 %v4088_v17  ;;  %v6018_v17 = vld [vmem:[%s9816_s28 + $0x1e8] sm:$0xff] }
0x1bbb   : > { %v4090_v19 = vpop.xlane.xlu1 %4089 }
0x1bbc   : > { %7816 = vrcp.f32 %v4090_v19 }
0x1bc6   : > { %v7817_v22 = vpop.eup %7816 }
0x1bc7   : > { %v4092_v24 = vmul.f32 %v7817_v22, %v7815_v16  ;;  %v6017_v16 = vld [vmem:[%s9816_s28 + $0x1e0] sm:$0xff]  ;;  %v7666_v22 = vpack.c.bf16 %v6020_v21, %v6019_v20  ;;  %v6065_v21 = vld [vmem:[%s9765_s15 + $0x70] sm:$0xff] }
0x1bc8   : > { %v7663_v19 = vpack.c.bf16 %v6018_v17, %v6017_v16  ;;  %v6063_v17 = vld [vmem:[%s9765_s15 + $0x60] sm:$0xff] }
0x1bc9   : > { %7014 = vmatmul.mubr.msk.f32.vlgmr.msra.gmra.mrb[38].mxu1 %vm1400_vm6, %v4092_v24  ;;  %v6036_v24 = vld [vmem:[%s9759_s9 + $0x1c8] sm:$0xff] }
0x1bca   : > { %7613 = vmatpush3.bf16.msra.mxu1 %v7612_v23  ;;  %7020 = vmatprep.mubr.msk.f32.mxu1 %vm7897_vm1, %v7898_v2  ;;  %v6035_v23 = vld [vmem:[%s9759_s9 + $0x1c0] sm:$0xff] }
0x1bcb   : > { %7614 = vmatprep.subr.bf16.mxu1 %v7896_v46  ;;  %v7681_v25 = vpack.c.bf16 %v6036_v24, %v6035_v23  ;;  %v6070_v24 = vld [vmem:[%s9767_s17 + $0x80] sm:$0xff] }
0x1c9c   : > { %v4165_v30 = vpop.f32.mrb[38].mxu1 }
0x1c9d   : > { %v7015_v15 = vpop.f32.mrb[39].mxu1  ;;  %7021 = vmatmul.mubr.msk.f32.vlgmr.msra.gmra.mrb[40].mxu1 %vm1311_vm3, %v4165_v30  ;;  %v6040_v30 = vld [vmem:[%s9759_s9 + $0x1e8] sm:$0xff] }
0x1c9e   : > { %7616 = vmatpush3.bf16.msra.mxu1 %v7615_v27  ;;  %7027 = vmatprep.mubr.msk.f32.mxu1 %vm7897_vm1, %v7898_v2  ;;  %v6038_v27 = vld [vmem:[%s9759_s9 + $0x1d8] sm:$0xff]  ;;  %v7687_v15 = vpack.c.bf16 %v6040_v30, %v6039_v29 }
0x1c9f   : > { %7629 = vmatprep.subr.bf16.mxu1 %v7896_v46  ;;  %v7684_v28 = vpack.c.bf16 %v6038_v27, %v6037_v26 }
0x1ca1   : > { %7028 = vmatmul.mubr.msk.f32.vlgmr.msra.gmra.mrb[42].mxu1 %vm1311_vm3, %v3738_v54 }
0x1ca2   : > { %7631 = vmatpush3.bf16.msra.mxu1 %v7630_v31  ;;  %7065 = vmatprep.mubr.msk.f32.mxu1 %vm7897_vm1, %v7898_v2  ;;  %v6041_v31 = vld [vmem:[%s9759_s9 + $0x1f0] sm:$0xff] }
0x1ca3   : > { %7632 = vmatprep.subr.bf16.mxu1 %v7896_v46  ;;  %v7690_v36 = vpack.c.bf16 %v6042_v33, %v6041_v31  ;;  %v6058_v33 = vld [vmem:[%s9764_s14 + $0x1] ss:$0 sm:$0xff] }
0x1ca6   : > { %7634 = vmatpush3.bf16.msra.mxu1 %v7633_v37 }
0x1ca7   : > { %7635 = vmatprep.subr.bf16.mxu1 %v7896_v46 }
0x1caa   : > { %7637 = vmatpush3.bf16.msra.mxu1 %v7636_v40  ;;  %v6022_v40 = vld [vmem:[%s9822_s29 + $0x7] ss:$0 sm:$0xff] }
0x1cab   : > { %7638 = vmatprep.subr.bf16.mxu1 %v7896_v46 }
0x1cae   : > { %7640 = vmatpush3.bf16.msra.mxu1 %v7639_v43 }
0x1caf   : > { %7087 = vmatprep.subr.mxu1 %v7898_v2 }
0x1cb1   : > { %7066 = vmatmul.mubr.msk.f32.vlgmr.msra.gmra.mrb[44].mxu1 %vm1067_vm2, %v9097_v1 }
0x1cb2   : > { %7089 = vmatprep.mubr.msk.f32.mxu1 %vm7897_vm1, %v7898_v2 }
0x1d70   : > { %v4241_v44 = vpop.f32.mrb[40].mxu1 }
0x1d71   : > { %v7022_v45 = vpop.f32.mrb[41].mxu1 }
0x1d74   : > { %v4314_v47 = vpop.f32.mrb[42].mxu1 }
0x1d75   : > { %v9428_v48 = vadd.f32 %v4314_v47, %v4241_v44  ;;  %v7029_v49 = vpop.f32.mrb[43].mxu1 }
0x1d84   : > { %v4488_v51 = vpop.f32.mrb[44].mxu1 }
0x1d85   : > { %v4489_v55 = vadd.f32 %v5993_v50, %v4488_v51  ;;  %v7067_v18 = vpop.f32.mrb[45].mxu1 }
0x1d87   : > { %7088 = vmatpush3.xpose.msk.msra.mxu1 %vm1311_vm3, %v4489_v55 }
0x1d88   : > { %7092 = vmatprep.subr.mxu1 %v7898_v2 }
0x1d8a   : > { %7090 = vmatmul.mubr.msk.f32.vlgmr.msra.gmra.mrb[46].mxu1 %vm1311_vm3, %v4402_v57 }
0x1d8b   : > { %7093 = vmatpush3.msk.msra.mxu1 %vm1404_vm4, %v4576_v53  ;;  %7094 = vmatprep.mubr.msk.f32.mxu1 %vm7897_vm1, %v7898_v2  ;;  %v6050_v53 = vld [vmem:[%s9761_s11 + $0x70] sm:$0xff] }
0x1d8c   : > { %7653 = vmatprep.subr.bf16.mxu1 %v7896_v46 }
0x1e5d   : > { %v4651_v58 = vpop.f32.mrb[46].mxu1 }
0x1e5e   : > { %v7091_v59 = vpop.f32.mrb[47].mxu1  ;;  %v4655_v60 = vsel %vm1388_vm5, %v4651_v58, -inf }
0x1e5f   : > { %4656 = vmax.xlane.f32.xlu0 %v4655_v60 }
0x1eec   : > { %v4657_v61 = vpop.xlane.xlu0 %4656 }
0x1eed   : > { %v4658_v32 = vsub.f32 %v4651_v58, %v4657_v61  ;;  %v6051_v58 = vld [vmem:[%s9761_s11 + $0x78] sm:$0xff] }
0x1eee   : > { %v7693_v60 = vpack.c.bf16 %v6051_v58, %v6050_v53  ;;  %v6068_v58 = vld [vmem:[%s9766_s16 + $0x1] ss:$0 sm:$0xff] }
0x1eef   : > { %v4659_v54 = vmul.f32 1.442695, %v4658_v32 }
0x1ef1   : > { %7818 = vpow2.f32 %v4659_v54 }
0x1efb   : > { %v7819_v62 = vpop.eup %7818 }
0x1efc   : > { %v4661_v35 = vsel %vm1388_vm5, %v7819_v62, 0.0 }
0x1efd   : > { %4662 = vadd.xlane.f32.xlu1 %v4661_v35 }
0x1f8a   : > { %v4663_v63 = vpop.xlane.xlu1 %4662 }
0x1f8b   : > { %7820 = vrcp.f32 %v4663_v63 }
0x1f95   : > { %v7821_v4 = vpop.eup %7820 }
0x1f96   : > { %v4665_v6 = vmul.f32 %v7821_v4, %v7819_v62 }
0x1f98   : > { %7095 = vmatmul.mubr.msk.f32.vlgmr.msra.gmra.mrb[48].mxu1 %vm1400_vm6, %v4665_v6 }
0x1f99   : > { %7655 = vmatpush3.bf16.msra.mxu1 %v7654_v5  ;;  %7101 = vmatprep.mubr.msk.f32.mxu1 %vm7897_vm1, %v7898_v2 }
0x1f9a   : > { %7656 = vmatprep.subr.bf16.mxu1 %v7896_v46 }
0x206b   : > { %v4738_v12 = vpop.f32.mrb[48].mxu1 }
0x206c   : > { %v7096_v13 = vpop.f32.mrb[49].mxu1  ;;  %7102 = vmatmul.mubr.msk.f32.vlgmr.msra.gmra.mrb[50].mxu1 %vm1311_vm3, %v4738_v12 }
0x206d   : > { %7658 = vmatpush3.bf16.msra.mxu1 %v7657_v9  ;;  %7120 = vmatprep.mubr.msk.f32.mxu1 %vm7897_vm1, %v7898_v2  ;;  %v6061_v13 = vld [vmem:[%s9765_s15 + $0x50] sm:$0xff] }
0x206e   : > { %7659 = vmatprep.subr.bf16.mxu1 %v7896_v46 }
0x2071   : > { %7661 = vmatpush3.bf16.msra.mxu1 %v7660_v14  ;;  %v6062_v14 = vld [vmem:[%s9765_s15 + $0x58] sm:$0xff] }
0x2072   : > { %7662 = vmatprep.subr.bf16.mxu1 %v7896_v46  ;;  %v7699_v16 = vpack.c.bf16 %v6062_v14, %v6061_v13 }
0x2075   : > { %7664 = vmatpush3.bf16.msra.mxu1 %v7663_v19  ;;  %v6064_v19 = vld [vmem:[%s9765_s15 + $0x68] sm:$0xff] }
0x2076   : > { %7665 = vmatprep.subr.bf16.mxu1 %v7896_v46  ;;  %v7702_v20 = vpack.c.bf16 %v6064_v19, %v6063_v17  ;;  %v5594_v19 = vld [vmem:[%s9771_s21] sm:$0xff] }
0x2079   : > { %7667 = vmatpush3.bf16.msra.mxu1 %v7666_v22  ;;  %v6066_v22 = vld [vmem:[%s9765_s15 + $0x78] sm:$0xff] }
0x207a   : > { %7680 = vmatprep.subr.bf16.mxu1 %v7896_v46  ;;  %v7705_v23 = vpack.c.bf16 %v6066_v22, %v6065_v21  ;;  %v5597_v22 = vld [vmem:[%s9771_s21 + $0x18] sm:$0xff] }
0x207c   : > { %7121 = vmatmul.mubr.msk.f32.vlgmr.msra.gmra.mrb[52].mxu1 %vm1067_vm2, %v9097_v1 }
0x207d   : > { %7682 = vmatpush3.bf16.msra.mxu1 %v7681_v25  ;;  %7158 = vmatprep.mubr.msk.f32.mxu1 %vm7897_vm1, %v7898_v2  ;;  %v6071_v25 = vld [vmem:[%s9767_s17 + $0x88] sm:$0xff] }
0x207e   : > { %7683 = vmatprep.subr.bf16.mxu1 %v7896_v46  ;;  %v7708_v26 = vpack.c.bf16 %v6071_v25, %v6070_v24  ;;  %v5598_v24 = vld [vmem:[%s9771_s21 + $0x20] sm:$0xff]  ;;  %v5599_v25 = vld [vmem:[%s9771_s21 + $0x28] sm:$0xff] }
0x2081   : > { %7685 = vmatpush3.bf16.msra.mxu1 %v7684_v28 }
0x2082   : > { %7686 = vmatprep.subr.bf16.mxu1 %v7896_v46 }
0x2085   : > { %7688 = vmatpush3.bf16.msra.mxu1 %v7687_v15  ;;  %v6057_v15 = vld [vmem:[%s9763_s13 + $0x1] ss:$0 sm:$0xff] }
0x2086   : > { %7689 = vmatprep.subr.bf16.mxu1 %v7896_v46 }
0x2089   : > { %7691 = vmatpush3.bf16.msra.mxu1 %v7690_v36 }
0x208a   : > { %7707 = vmatprep.subr.bf16.mxu1 %v7896_v46 }
0x208c   : > { %7159 = vmatmul.mubr.msk.f32.vlgmr.msra.gmra.mrb[54].mxu1 %vm1067_vm2, %v9097_v1  ;;  %v6044_v1 = vld [vmem:[%s9760_s10 + $0x7] ss:$0 sm:$0xff] }
0x208d   : > { %7229 = vmatprep.mubr.msk.f32.mxu1 %vm7897_vm1, %v7898_v2  ;;  %7709 = vmatpush3.bf16.msra.mxu1 %v7708_v26  ;;  %v7738_v26 = vpack.c.bf16 %v5599_v25, %v5598_v24 }
0x208e   : > { %7710 = vmatprep.subr.bf16.mxu1 %v7896_v46 }
0x213f   : > { %v4814_v37 = vpop.f32.mrb[50].mxu1 }
0x2140   : > { %v4818_v38 = vadd.f32 %v4814_v37, %v9428_v48  ;;  %v7103_v39 = vpop.f32.mrb[51].mxu1 }
0x2141   : > { %v6073_v39 = vld [vmem:[%s9767_s17 + $0x98] sm:$0xff] }
0x214f   : > { %v4902_v41 = vpop.f32.mrb[52].mxu1 }
0x2150   : > { %v4903_v42 = vadd.f32 %v6022_v40, %v4902_v41  ;;  %v7122_v43 = vpop.f32.mrb[53].mxu1  ;;  %v6074_v41 = vld [vmem:[%s9767_s17 + $0xa0] sm:$0xff] }
0x2151   : > { %v6076_v43 = vld [vmem:[%s9767_s17 + $0xb0] sm:$0xff] }
0x2152   : > { %7164 = vmatmul.mubr.msk.f32.vlgmr.msra.gmra.mrb[44].mxu0 %vm1311_vm3, %v4903_v42 }
0x2153   : > { %7168 = vmatprep.mubr.msk.f32.mxu0 %vm7897_vm1, %v7898_v2 }
0x215f   : > { %v5076_v44 = vpop.f32.mrb[54].mxu1 }
0x2160   : > { %v5077_v45 = vadd.f32 %v6044_v1, %v5076_v44  ;;  %v7160_v47 = vpop.f32.mrb[55].mxu1  ;;  %v6077_v1 = vld [vmem:[%s9767_s17 + $0xb8] sm:$0xff] }
0x2161   : > { %v7717_v44 = vpack.c.bf16 %v6077_v1, %v6076_v43  ;;  %v6079_v47 = vld [vmem:[%s9767_s17 + $0xc8] sm:$0xff] }
0x2162   : > { %7167 = vmatpush3.msk.msra.mxu0 %vm1404_vm4, %v5077_v45  ;;  %v6078_v45 = vld [vmem:[%s9767_s17 + $0xc0] sm:$0xff] }
0x2163   : > { %7692 = vmatprep.subr.bf16.mxu0 %v7896_v46 }
0x2225   : > { %v5152_v48 = vpop.f32.mrb[44].mxu0 }
0x2226   : > { %v7165_v49 = vpop.f32.mrb[45].mxu0  ;;  %v5156_v50 = vsel %vm1388_vm5, %v5152_v48, -inf }
0x2227   : > { %5157 = vmax.xlane.f32.xlu0 %v5156_v50  ;;  %v6080_v49 = vld [vmem:[%s9767_s17 + $0xd0] sm:$0xff]  ;;  %v6081_v50 = vld [vmem:[%s9767_s17 + $0xd8] sm:$0xff] }
0x22b4   : > { %v5158_v51 = vpop.xlane.xlu0 %5157 }
0x22b5   : > { %v5159_v52 = vsub.f32 %v5152_v48, %v5158_v51  ;;  %v7720_v48 = vpack.c.bf16 %v6079_v47, %v6078_v45  ;;  %v7723_v51 = vpack.c.bf16 %v6081_v50, %v6080_v49  ;;  %v5602_v47 = vld [vmem:[%s9824_s7] sm:$0x1]  ;;  %s7838_s7 = scalar_lea.vmem %s7837_s22, 32 }
0x22b6   : > { %p7840_p1 = scmp.lt.s32.totalorder %s7838_s7, %s7832_s0 }
0x22b7   : > { %v5160_v55 = vmul.f32 1.442695, %v5159_v52  ;;  %v6082_v52 = vld [vmem:[%s9767_s17 + $0xe0] sm:$0xff] }
0x22b8   : > { %p7841_p2 = por %p7840_p1, %p7839_p0 }
0x22b9   : > { %7822 = vpow2.f32 %v5160_v55  ;;  %v6083_v55 = vld [vmem:[%s9767_s17 + $0xe8] sm:$0xff] }
0x22ba   : > { %p7842_p3 = pnand %p7841_p2, %p7835_p13 }
0x22c3   : > { %v7823_v18 = vpop.eup %7822 }
0x22c4   : > { %v5162_v56 = vsel %vm1388_vm5, %v7823_v18, 0.0 }
0x22c5   : > { %5163 = vadd.xlane.f32.xlu1 %v5162_v56  ;;  %v6084_v56 = vld [vmem:[%s9767_s17 + $0xf0] sm:$0xff] }
0x2352   : > { %v5164_v57 = vpop.xlane.xlu1 %5163 }
0x2353   : > { %7824 = vrcp.f32 %v5164_v57  ;;  %v6085_v57 = vld [vmem:[%s9767_s17 + $0xf8] sm:$0xff] }
0x2354   : > { %v7729_v53 = vpack.c.bf16 %v6085_v57, %v6084_v56 }
0x235d   : > { %v7825_v59 = vpop.eup %7824 }
0x235e   : > { %v5166_v61 = vmul.f32 %v7825_v59, %v7823_v18  ;;  %v7726_v18 = vpack.c.bf16 %v6083_v55, %v6082_v52 }
0x2360   : > { %7169 = vmatmul.mubr.msk.f32.vlgmr.msra.gmra.mrb[46].mxu0 %vm1400_vm6, %v5166_v61 }
0x2361   : > { %7694 = vmatpush3.bf16.msra.mxu0 %v7693_v60  ;;  %7175 = vmatprep.mubr.msk.f32.mxu0 %vm7897_vm1, %v7898_v2 }
0x2362   : > { %7695 = vmatprep.subr.bf16.mxu0 %v7896_v46 }
0x2433   : > { %v5239_v32 = vpop.f32.mrb[46].mxu0 }
0x2434   : > { %v7170_v54 = vpop.f32.mrb[47].mxu0  ;;  %7176 = vmatmul.mubr.msk.f32.vlgmr.msra.gmra.mrb[48].mxu0 %vm1311_vm3, %v5239_v32 }
0x2435   : > { %7194 = vmatprep.mubr.msk.f32.mxu0 %vm7897_vm1, %v7898_v2 }
0x2507   : > { %v5315_v62 = vpop.f32.mrb[48].mxu0 }
0x2508   : > { %v5319_v35 = vadd.f32 %v5315_v62, %v4818_v38  ;;  %v7177_v63 = vpop.f32.mrb[49].mxu0  ;;  %v6072_v38 = vld [vmem:[%s9767_s17 + $0x90] sm:$0xff] }
0x2509   : > { %v7711_v40 = vpack.c.bf16 %v6073_v39, %v6072_v38  ;;  %v6089_v38 = vld [vmem:[%s9770_s20] ss:$0 sm:$0xff] }
0x250a   : > { %v5320_v3 = vadd.f32 %v5319_v35, %v9023_v34  ;;  %v6060_v34 = vld [vmem:[%s9765_s15 + $0x48] sm:$0xff] }
0x250b   : > { %v7696_v12 = vpack.c.bf16 %v6060_v34, %v6059_v11  ;;  %7712 = vmatpush3.bf16.msra.mxu1 %v7711_v40 }
0x250c   : > { %v9558_v4 = vadd.f32 %v6054_v0, %v5320_v3  ;;  %7713 = vmatprep.subr.bf16.mxu1 %v7896_v46 }
0x250d   : > { %7697 = vmatpush3.bf16.msra.mxu0 %v7696_v12 }
0x250e   : > { %v5334_v5 = vsel %vm1023_vm0, %v9558_v4, 0.0  ;;  %7698 = vmatprep.subr.bf16.mxu0 %v7896_v46 }
0x250f   : > { %5335 = vadd.xlane.f32.xlu0 %v5334_v5 }
0x2511   : > { %7700 = vmatpush3.bf16.msra.mxu0 %v7699_v16 }
0x2512   : > { %7701 = vmatprep.subr.bf16.mxu0 %v7896_v46 }
0x2515   : > { %7703 = vmatpush3.bf16.msra.mxu0 %v7702_v20  ;;  %v5595_v20 = vld [vmem:[%s9771_s21 + $0x8] sm:$0xff] }
0x2516   : > { %7704 = vmatprep.subr.bf16.mxu0 %v7896_v46  ;;  %v7732_v21 = vpack.c.bf16 %v5595_v20, %v5594_v19 }
0x2519   : > { %7706 = vmatpush3.bf16.msra.mxu0 %v7705_v23 }
0x251a   : > { %7731 = vmatprep.subr.bf16.mxu0 %v7896_v46 }
0x259c   : > { %v5336_v6 = vpop.xlane.xlu0 %5335 }
0x259d   : > { %v5337_v7 = vmul.f32 0.015625, %v5336_v6 }
0x259f   : > { %v5338_v8 = vsub.f32 %v9558_v4, %v5337_v7  ;;  %v6087_v7 = vld [vmem:[%s9768_s18 + $0x1] ss:$0 sm:$0xff] }
0x25a1   : > { %v5339_v9 = vmul.f32 %v5338_v8, %v5338_v8 }
0x25a3   : > { %v5340_v10 = vsel %vm1023_vm0, %v5339_v9, 0.0 }
0x25a4   : > { %5341 = vadd.xlane.f32.xlu1 %v5340_v10 }
0x2631   : > { %v5342_v27 = vpop.xlane.xlu1 %5341 }
0x2632   : > { %v5343_v28 = vmul.f32 0.015625, %v5342_v27  ;;  %v5600_v27 = vld [vmem:[%s9771_s21 + $0x30] sm:$0xff] }
0x2634   : > { %v5344_v29 = vadd.f32 1e-12, %v5343_v28  ;;  %v5601_v28 = vld [vmem:[%s9771_s21 + $0x38] sm:$0xff] }
0x2636   : > { %7826 = vrsqrt.f32 %v5344_v29  ;;  %v7741_v29 = vpack.c.bf16 %v5601_v28, %v5600_v27 }
0x2640   : > { %v7827_v30 = vpop.eup %7826 }
0x2641   : > { %v5346_v31 = vmul.f32 %v7827_v30, %v5338_v8 }
0x2643   : > { %v5353_v36 = vmul.f32 %v6057_v15, %v5346_v31 }
0x2645   : > { %v5360_v37 = vadd.f32 %v6058_v33, %v5353_v36  ;;  %v6088_v36 = vld [vmem:[%s9769_s19] ss:$0 sm:$0xff] }
0x2647   : > { %7195 = vmatmul.mubr.msk.f32.vlgmr.msra.gmra.mrb[50].mxu0 %vm1067_vm2, %v5360_v37 }
0x2648   : > { %7248 = vmatprep.mubr.msk.f32.mxu0 %vm7897_vm1, %v7898_v2  ;;  %v6075_v2 = vld [vmem:[%s9767_s17 + $0xa8] sm:$0xff]  ;;  %7733 = vmatpush3.bf16.msra.mxu0 %v7732_v21 }
0x2649   : > { %v7714_v42 = vpack.c.bf16 %v6075_v2, %v6074_v41  ;;  %7734 = vmatprep.subr.bf16.mxu0 %v7896_v46 }
0x264b   : > { %7715 = vmatpush3.bf16.msra.mxu1 %v7714_v42 }
0x264c   : > { %7716 = vmatprep.subr.bf16.mxu1 %v7896_v46 }
0x264f   : > { %7718 = vmatpush3.bf16.msra.mxu1 %v7717_v44 }
0x2650   : > { %7719 = vmatprep.subr.bf16.mxu1 %v7896_v46 }
0x2653   : > { %7721 = vmatpush3.bf16.msra.mxu1 %v7720_v48 }
0x2654   : > { %7722 = vmatprep.subr.bf16.mxu1 %v7896_v46 }
0x2657   : > { %7724 = vmatpush3.bf16.msra.mxu1 %v7723_v51 }
0x2658   : > { %7725 = vmatprep.subr.bf16.mxu1 %v7896_v46 }
0x265b   : > { %7727 = vmatpush3.bf16.msra.mxu1 %v7726_v18 }
0x265c   : > { %7728 = vmatprep.subr.bf16.mxu1 %v7896_v46 }
0x265f   : > { %7730 = vmatpush3.bf16.msra.mxu1 %v7729_v53 }
0x271a   : > { %v5447_v59 = vpop.f32.mrb[50].mxu0 }
0x271b   : > { %v5448_v60 = vadd.f32 %v6068_v58, %v5447_v59  ;;  %v7196_v61 = vpop.f32.mrb[51].mxu0 }
0x271d   : > { %v5452_v32 = vmul.f32 0.044715, %v5448_v60  ;;  %v5451_v3 = vmul.f32 0.5, %v5448_v60 }
0x271f   : > { %v5453_v54 = vmul.f32 %v5452_v32, %v5448_v60 }
0x2721   : > { %v5454_v62 = vmul.f32 %v5453_v54, %v5448_v60 }
0x2723   : > { %v5455_v35 = vadd.f32 %v5454_v62, %v5448_v60 }
0x2725   : > { %v5456_v63 = vmul.f32 0.7978846, %v5455_v35 }
0x2727   : > { %7828 = vtanh.f32 %v5456_v63 }
0x2731   : > { %v7829_v0 = vpop.eup %7828 }
0x2732   : > { %v5458_v5 = vadd.f32 1.0, %v7829_v0 }
0x2734   : > { %v5459_v6 = vmul.f32 %v5458_v5, %v5451_v3 }
0x2736   : > { %7230 = vmatmul.mubr.f32.vlgmr.msra.gmra.mrb[56].mxu1 %v5459_v6 }
0x2809   : > { %v5551_v8 = vpop.f32.mrb[56].mxu1 }
0x280a   : > { %v5552_v9 = vadd.f32 %v6087_v7, %v5551_v8  ;;  %v7231_v10 = vpop.f32.mrb[57].mxu1 }
0x280c   : > { %v5555_v11 = vadd.f32 %v5552_v9, %v9558_v4  ;;  %v5596_v4 = vld [vmem:[%s9771_s21 + $0x10] sm:$0xff] }
0x280d   : > { %v7735_v23 = vpack.c.bf16 %v5597_v22, %v5596_v4 }
0x280e   : > { %v5558_v34 = vsel %vm1023_vm0, %v5555_v11, 0.0 }
0x280f   : > { %5559 = vadd.xlane.f32.xlu0 %v5558_v34  ;;  %7736 = vmatpush3.bf16.msra.mxu0 %v7735_v23 }
0x2810   : > { %7737 = vmatprep.subr.bf16.mxu0 %v7896_v46 }
0x2813   : > { %7739 = vmatpush3.bf16.msra.mxu0 %v7738_v26 }
0x2814   : > { %7740 = vmatprep.subr.bf16.mxu0 %v7896_v46 }
0x2817   : > { %7742 = vmatpush3.bf16.msra.mxu0 %v7741_v29 }
0x289c   : > { %v5560_v12 = vpop.xlane.xlu0 %5559 }
0x289d   : > { %v5561_v13 = vmul.f32 0.015625, %v5560_v12 }
0x289f   : > { %v5562_v14 = vsub.f32 %v5555_v11, %v5561_v13 }
0x28a1   : > { %v5563_v16 = vmul.f32 %v5562_v14, %v5562_v14 }
0x28a3   : > { %v5564_v17 = vsel %vm1023_vm0, %v5563_v16, 0.0 }
0x28a4   : > { %5565 = vadd.xlane.f32.xlu1 %v5564_v17 }
0x2931   : > { %v5566_v30 = vpop.xlane.xlu1 %5565 }
0x2932   : > { %v5567_v15 = vmul.f32 0.015625, %v5566_v30 }
0x2934   : > { %v5568_v31 = vadd.f32 1e-12, %v5567_v15 }
0x2936   : > { %7830 = vrsqrt.f32 %v5568_v31 }
0x2940   : > { %v7831_v33 = vpop.eup %7830 }
0x2941   : > { %v5570_v37 = vmul.f32 %v7831_v33, %v5562_v14 }
0x2943   : > { %v5577_v39 = vmul.f32 %v6088_v36, %v5570_v37 }
0x2945   : > { %v5584_v40 = vadd.f32 %v6089_v38, %v5577_v39 }
0x2947   : > { %v5585_v46 = vsel %vm1023_vm0, %v5584_v40, 0.0 }
0x2948   : > { %v5586_v41 = vrot.slane %v5585_v46, 4 }
0x294a   : > { %v5587_v2 = vadd.f32 %v5586_v41, %v5585_v46 }
0x294c   : > { %v5588_v42 = vrot.slane %v5587_v2, 2 }
0x294e   : > { %v5589_v43 = vadd.f32 %v5588_v42, %v5587_v2 }
0x2950   : > { %v5590_v1 = vrot.slane %v5589_v43, 1 }
0x2952   : > { %v5591_v44 = vadd.f32 %v5590_v1, %v5589_v43 }
0x2954   : > { %v5593_v45 = vmul.f32 0.2, %v5591_v44 }
0x2956   : > { %7249 = vmatmul.mubr.msk.f32.vlgmr.msra.gmra.mrb[52].mxu0 %vm1067_vm2, %v5593_v45 }
0x2a29   : > { %v5672_v48 = vpop.f32.mrb[52].mxu0 }
0x2a2a   : > { %v5673_v49 = vadd.f32 %v5672_v48, %v5602_v47  ;;  %v7250_v50 = vpop.f32.mrb[53].mxu0 }
0x2a2c   : > { %5676 = vst [vmem:[%s702_s24] sm:$0x1] %v5673_v49 }
0x2a2d   : > { %7845 = shalt.err (!%p7842_p3)
}
0x2a2e   : > { %s7846_s25 = scalar_lea.hbm %s9708_s6, 16  ;;  %s7850_s3 = scalar_lea.hbm %s9825_s1, 32 }
0x2a2f   : > { %p7847_p4 = scmp.ne.s32.totalorder %s9708_s6, %s7846_s25  ;;  %p7851_p9 = scmp.lt.u32.totalorder %s9708_s6, %s9825_s1 }
0x2a30   : > { %p7852_p10 = scmp.lt.u32.totalorder %s7850_s3, %s7846_s25  ;;  %p7854_p12 = scmp.lt.u32.totalorder %s7846_s25, %s9708_s6 }
0x2a31   : > { %p7848_p7 = pnand %p7847_p4, %p8058_p5 }
0x2a32   : > { %p7853_p11 = por %p7852_p10, %p7851_p9 }
0x2a33   : > { %p7849_p8 = pneg %p7848_p7 }
0x2a34   : > { %p7855_p13 = por %p7854_p12, %p7853_p11 }
0x2a36   : > { %p7856_p0 = pnand %p7855_p13, %p7849_p8 }
0x2a38   : > { %7859 = shalt.err (!%p7856_p0)
}
0x2a39   : > { %7744 = dma.vmem_to_hbm [thread:$0]  (%p8058_p5), %s9710_s23, 16, %s9708_s6, %s5678_s8  }
0x2a3a PF: > { %s9826_s0 = sld [smem:[#allocation7_spill]]  ;;  %s9827_s22 = sld [smem:[#allocation5_spill]] }
0x2a40   : > { %p7750_p1 = scmp.ge.s32.totalorder %s9826_s0, 2  ;;  %s5702_s2 = sand.u32 1, %s9827_s22  }
0x2a41   : > { %s5703_s24 = scalar_lea.sflag [#allocation3], %s5702_s2 }
0x2a42   : > { %p7747_p2 = pnand %p7750_p1, %p8062_p6 }
0x2a44   : > { %7877 = dma.done.wait (!%p7747_p2), %s5703_s24, 16  }
0x2a45   : > { %7879 = vsyncadd (!%p7747_p2), %s5703_s24, 4294967280  ;;  %s9829_s25 = sld [smem:[#allocation8_spill]]  ;;  %s9830_s3 = sld [smem:[#allocation6_spill]] }
0x2a46   : > { %s9831_s24 = sld [smem:[#allocation9_spill]]  ;;  %s9832_s4 = smov %s7886_s30 }
0x2a4b   : > { %p33_p3 = scmp.ge.s32.totalorder %s9829_s25, 4   ;;  %s9833_s30 = smov %s9830_s3 }
0x2a4d   :  { %35 = sbr.rel (!%p33_p3) target bundleno = 15 (0xf), region = 205 }
0x2a54   :  { %5707 = vsyncpa [#allocation3], 1 }
0x2a55   :  { %5709 = vsyncpa [#allocation3 + $0x1], 1 }

</bundles_post_ra>
